<compile_context>
chip_gen: v5e
topology: v5e:2x2
jax: 0.10.0
libtpu: 0.0.40
codegen_flags: <defaults>
</compile_context>

<pallas_src>
import jax
import jax.numpy as jnp
from jax.experimental import pallas as pl
from jax.experimental.pallas import tpu as pltpu


_BN_EPS = 1e-5

EMBEDDING_DIMS = [(2, 1), (5, 3), (2, 1), (2, 1)]   # (num_embeddings, emb_dim)
N_CONTINUOUS = 1
OUTPUT_VECTOR_SIZE = 256                            # must be 256 (see NOTE above)
LIN_DIMS = [(256, 1024), (1024, 512), (512, 256), (256, 256)]
OUT_PAD = 128                                       # lane-dense padded lin2 output
FC1_IN_PAD = 16                                     # one-hot(11) + cont(1) -> pad 16


def _prefix_offsets(sizes):
    offs, total = [], 0
    for s in sizes:
        offs.append(total)
        total += s
    return tuple(offs), total


_CAT_OFFSETS, _N_ONEHOT = _prefix_offsets([v for v, _ in EMBEDDING_DIMS])  # (0,2,7,9)
_CONT_COL = _N_ONEHOT                                                      # lane 11
_N_EMB = sum(d for _, d in EMBEDDING_DIMS)                                 # 6

# Packed (1, N) slabs; every offset/length below is a multiple of 128 lanes.
_BIAS_SIZES = (256, OUTPUT_VECTOR_SIZE) + tuple(do for _, do in LIN_DIMS) + (OUT_PAD,)
_B_OFF, _BIAS_TOTAL = _prefix_offsets(_BIAS_SIZES)        # total 2688
_BN_SIZES = (OUTPUT_VECTOR_SIZE,) + tuple(do for _, do in LIN_DIMS)
_G_OFF, _BN_TOTAL = _prefix_offsets(_BN_SIZES)            # total 2304


# ----------------------------------------------------------------------------
# Fused kernel: one-hot build -> fc1 -> fc2(+ReLU+BN) -> 4x(Linear+ReLU+BN) -> lin2
# ----------------------------------------------------------------------------
def _clinical_fused_kernel(
        cat_ref, cont_ref,                     # (B,4) int32, (B,1) f32
        wm_ref, w2_ref,                        # merged fc1 (16,256), fc2 (256,256)
        wA_hbm, wB_hbm,                        # big weights left in HBM (manual DMA)
        wC_ref, wD_ref, wE_ref,                # (512,256), (256,256), (256,128)
        bias_ref, gamma_ref, beta_ref,         # packed (1, N) f32 slabs
        out_ref, xfe_ref,                      # outputs
        wA_vmem, wB_vmem, dma_sem):            # scratch
    # Kick off the two largest weight DMAs (0.5 MiB + 1.0 MiB) immediately; the
    # one-hot build and fc1/fc2 run while they are in flight.
    cpA = pltpu.make_async_copy(wA_hbm, wA_vmem, dma_sem.at[0])
    cpB = pltpu.make_async_copy(wB_hbm, wB_vmem, dma_sem.at[1])
    cpA.start()
    cpB.start()

    def matmul(x, w, b_off, n):
        # bf16 operands on the MXU, f32 accumulation, f32 bias from packed slab.
        y = jnp.dot(x.astype(jnp.bfloat16), w, preferred_element_type=jnp.float32)
        return y + bias_ref[:, b_off:b_off + n]

    def relu_bn(y, off, n):
        # Linear output -> ReLU -> BatchNorm1d (training mode, biased variance).
        y = jnp.maximum(y, 0.0)
        mean = jnp.mean(y, axis=0, keepdims=True)
        var = jnp.mean(jnp.square(y - mean), axis=0, keepdims=True)
        # Fold gamma / mean into one (1,N) scale/shift, then a single (B,N) FMA.
        scale = gamma_ref[:, off:off + n] * jax.lax.rsqrt(var + _BN_EPS)
        shift = beta_ref[:, off:off + n] - mean * scale
        return y * scale + shift

    # --- fc1 with the embedding lookup folded in algebraically ---------------
    # Embedding -> concat -> Linear == [one-hot(cats) | continuous] @ merged W.
    B = out_ref.shape[0]
    lane = jax.lax.broadcasted_iota(jnp.int32, (B, FC1_IN_PAD), 1)
    onehot = jnp.zeros((B, FC1_IN_PAD), jnp.float32)
    for i, off in enumerate(_CAT_OFFSETS):
        onehot = onehot + (lane == cat_ref[:, i:i + 1] + off).astype(jnp.float32)
    onehot = onehot + jnp.where(lane == _CONT_COL, cont_ref[...], 0.0)

    x = matmul(onehot, wm_ref[...], _B_OFF[0], _BIAS_SIZES[0])          # fc1
    x_fe = relu_bn(matmul(x, w2_ref[...], _B_OFF[1], _BIAS_SIZES[1]),
                   _G_OFF[0], _BN_SIZES[0])                             # fc2
    xfe_ref[...] = x_fe.astype(xfe_ref.dtype)

    cpA.wait()                                                          # 256 -> 1024
    x = relu_bn(matmul(x_fe, wA_vmem[...], _B_OFF[2], _BIAS_SIZES[2]),
                _G_OFF[1], _BN_SIZES[1])
    cpB.wait()                                                          # 1024 -> 512
    x = relu_bn(matmul(x, wB_vmem[...], _B_OFF[3], _BIAS_SIZES[3]),
                _G_OFF[2], _BN_SIZES[2])
    x = relu_bn(matmul(x, wC_ref[...], _B_OFF[4], _BIAS_SIZES[4]),      # 512 -> 256
                _G_OFF[3], _BN_SIZES[3])
    x = relu_bn(matmul(x, wD_ref[...], _B_OFF[5], _BIAS_SIZES[5]),      # 256 -> 256
                _G_OFF[4], _BN_SIZES[4])
    # lin2 (Linear 256 -> 1), written into a lane-dense padded (B,128) slab.
    out_ref[...] = matmul(x, wE_ref[...], _B_OFF[6], _BIAS_SIZES[6]).astype(out_ref.dtype)


# ----------------------------------------------------------------------------
# Deterministic parameter init (PyTorch-default-style, synthetic), device-ready:
# bf16 (in,out) weights, fc1 folded with the embedding tables, packed f32 slabs.
# ----------------------------------------------------------------------------
def _linear_init(key, fan_in, fan_out):
    kw, kb = jax.random.split(key)
    bound = 1.0 / (fan_in ** 0.5)
    w = jax.random.uniform(kw, (fan_in, fan_out), jnp.float32, -bound, bound)
    b = jax.random.uniform(kb, (fan_out,), jnp.float32, -bound, bound)
    return w, b


def init_params(key):
    keys = jax.random.split(key, 16)

    # Embedding tables (PyTorch nn.Embedding default: N(0,1)).
    emb = [jax.random.normal(keys[i], (v, d), jnp.float32)
           for i, (v, d) in enumerate(EMBEDDING_DIMS)]

    # fc1: Linear(7, 256). Fold embeddings: rows 0..10 = concat_i(E_i @ W1_i),
    # row 11 = continuous-feature weight row, rows 12..15 = zero padding.
    w1, b1 = _linear_init(keys[4], _N_EMB + N_CONTINUOUS, 256)
    rows, r = [], 0
    for tbl, (_, d) in zip(emb, EMBEDDING_DIMS):
        rows.append(tbl @ w1[r:r + d, :])
        r += d
    rows.append(w1[r:r + 1, :])                                  # continuous row
    wm = jnp.concatenate(rows, axis=0)                           # (12, 256)
    wm = jnp.pad(wm, ((0, FC1_IN_PAD - wm.shape[0]), (0, 0)))    # (16, 256)

    # fc2 = FC(256, 256, 1): Linear -> ReLU -> BatchNorm1d.
    w2, b2 = _linear_init(keys[5], 256, OUTPUT_VECTOR_SIZE)

    # lin = FC(256, 256, 4): 256->1024->512->256->256, each Linear->ReLU->BN.
    lin_w, lin_b = [], []
    for i, (di, do) in enumerate(LIN_DIMS):
        w, b = _linear_init(keys[6 + i], di, do)
        lin_w.append(w)
        lin_b.append(b)

    # lin2: Linear(256, 1); output lanes zero-padded 1 -> 128 (lane-dense stores).
    wE_raw, bE_raw = _linear_init(keys[10], 256, 1)
    wE = jnp.pad(wE_raw, ((0, 0), (0, OUT_PAD - 1)))
    bE = jnp.pad(bE_raw, ((0, OUT_PAD - 1),))

    # Packed bias / BN slabs (BN init: gamma=1, beta=0).
    biases = jnp.concatenate([b1, b2] + lin_b + [bE]).reshape(1, -1)   # (1, 2688)
    gammas = jnp.ones((1, _BN_TOTAL), jnp.float32)                     # (1, 2304)
    betas = jnp.zeros((1, _BN_TOTAL), jnp.float32)

    bf = lambda a: a.astype(jnp.bfloat16)
    return {
        "wm": bf(wm), "w2": bf(w2),
        "wA": bf(lin_w[0]), "wB": bf(lin_w[1]), "wC": bf(lin_w[2]), "wD": bf(lin_w[3]),
        "wE": bf(wE),
        "biases": biases, "gammas": gammas, "betas": betas,
        # Raw f32 copies kept only for the pure-JAX reference check in __main__.
        "_ref": {"emb": emb, "w1": w1, "b1": b1, "w2": w2, "b2": b2,
                 "lin_w": lin_w, "lin_b": lin_b, "wE": wE_raw, "bE": bE_raw},
    }


# ----------------------------------------------------------------------------
# Forward pass: ONE fused Pallas call, no pre-kernel glue.
# ----------------------------------------------------------------------------
def clinical_net_forward(params, categorical_x, continuous_x):
    """categorical_x: (B, 4) int, continuous_x: (B, 1) float32."""
    categorical_x = categorical_x.astype(jnp.int32)
    continuous_x = continuous_x.astype(jnp.float32)
    B = categorical_x.shape[0]

    flat = [categorical_x, continuous_x,
            params["wm"], params["w2"],
            params["wA"], params["wB"],            # big weights: manual async DMA
            params["wC"], params["wD"], params["wE"],
            params["biases"], params["gammas"], params["betas"]]

    vmem = pl.BlockSpec(memory_space=pltpu.MemorySpace.VMEM)
    any_space = pl.BlockSpec(memory_space=pl.ANY)
    in_specs = [vmem, vmem, vmem, vmem, any_space, any_space,
                vmem, vmem, vmem, vmem, vmem, vmem]

    mm_shapes = ([(FC1_IN_PAD, 256), (256, OUTPUT_VECTOR_SIZE)]
                 + LIN_DIMS + [(256, OUT_PAD)])
    flops = 2 * B * sum(k * n for k, n in mm_shapes)
    bytes_accessed = (2 * sum(k * n for k, n in mm_shapes)            # bf16 weights
                      + 4 * (_BIAS_TOTAL + 2 * _BN_TOTAL)             # f32 slabs
                      + 4 * B * (4 + 1 + OUT_PAD + OUTPUT_VECTOR_SIZE))
    cost = pl.CostEstimate(flops=int(flops), transcendentals=int(_BN_TOTAL),
                           bytes_accessed=int(bytes_accessed))

    out_pad, x_fe = pl.pallas_call(
        _clinical_fused_kernel,
        in_specs=in_specs,
        out_specs=(vmem, vmem),
        out_shape=(jax.ShapeDtypeStruct((B, OUT_PAD), jnp.float32),
                   jax.ShapeDtypeStruct((B, OUTPUT_VECTOR_SIZE), jnp.float32)),
        scratch_shapes=[pltpu.VMEM(LIN_DIMS[0], jnp.bfloat16),   # (256, 1024)
                        pltpu.VMEM(LIN_DIMS[1], jnp.bfloat16),   # (1024, 512)
                        pltpu.SemaphoreType.DMA((2,))],
        cost_estimate=cost,
    )(*flat)

    return out_pad[:, :1], x_fe


# ----------------------------------------------------------------------------
# Pure-JAX f32 reference (mirrors the PyTorch forward) — for sanity checking.
# ----------------------------------------------------------------------------
def clinical_net_reference(params, categorical_x, continuous_x):
    r = params["_ref"]
    cat = categorical_x.astype(jnp.int32)

    def bn(y):  # training-mode BN, gamma=1, beta=0
        m = jnp.mean(y, axis=0, keepdims=True)
        v = jnp.mean(jnp.square(y - m), axis=0, keepdims=True)
        return (y - m) * jax.lax.rsqrt(v + _BN_EPS)

    embs = [jnp.take(tbl, cat[:, i], axis=0) for i, tbl in enumerate(r["emb"])]
    x = jnp.concatenate(embs + [continuous_x.astype(jnp.float32)], axis=1)
    x = x @ r["w1"] + r["b1"]
    x_fe = bn(jnp.maximum(x @ r["w2"] + r["b2"], 0.0))
    h = x_fe
    for w, b in zip(r["lin_w"], r["lin_b"]):
        h = bn(jnp.maximum(h @ w + b, 0.0))
    out = h @ r["wE"] + r["bE"]
    return out, x_fe


# ----------------------------------------------------------------------------
if __name__ == "__main__":
    B = 8
    root = jax.random.PRNGKey(0)
    k_params, k_cat, k_cont = jax.random.split(root, 3)

    params = init_params(k_params)

    cat_keys = jax.random.split(k_cat, len(EMBEDDING_DIMS))
    categorical_x = jnp.stack(
        [jax.random.randint(cat_keys[i], (B,), 0, v)
         for i, (v, _) in enumerate(EMBEDDING_DIMS)],
        axis=1)                                                     # (8, 4) int
    continuous_x = jax.random.normal(k_cont, (B, 1), jnp.float32)   # (8, 1)

    out, x_fe = jax.jit(clinical_net_forward)(params, categorical_x, continuous_x)
    jax.block_until_ready((out, x_fe))

    assert out.shape == (B, 1), out.shape
    assert x_fe.shape == (B, OUTPUT_VECTOR_SIZE), x_fe.shape
    assert jnp.all(jnp.isfinite(out)) and jnp.all(jnp.isfinite(x_fe))

    # Loose sanity check against the f32 reference (bf16 weights drift slightly
    # through the 5 BatchNorm layers; this only catches structural/wiring bugs).
    ref_out, ref_xfe = clinical_net_reference(params, categorical_x, continuous_x)
    assert float(jnp.max(jnp.abs(out - ref_out))) < 0.5
    assert float(jnp.max(jnp.abs(x_fe - ref_xfe))) < 0.5

    print("KERNEL_OK")
</pallas_src>

<mosaic_0001>
module attributes {stable_mosaic.version = 11 : i64} {
  func.func @_clinical_fused_kernel(%arg0: memref<8x4xi32, #tpu.memory_space<vmem>>, %arg1: memref<8x1xf32, #tpu.memory_space<vmem>>, %arg2: memref<16x256xbf16, #tpu.memory_space<vmem>>, %arg3: memref<256x256xbf16, #tpu.memory_space<vmem>>, %arg4: memref<256x1024xbf16, #tpu.memory_space<any>>, %arg5: memref<1024x512xbf16, #tpu.memory_space<any>>, %arg6: memref<512x256xbf16, #tpu.memory_space<vmem>>, %arg7: memref<256x256xbf16, #tpu.memory_space<vmem>>, %arg8: memref<256x128xbf16, #tpu.memory_space<vmem>>, %arg9: memref<1x2688xf32, #tpu.memory_space<vmem>>, %arg10: memref<1x2304xf32, #tpu.memory_space<vmem>>, %arg11: memref<1x2304xf32, #tpu.memory_space<vmem>>, %arg12: memref<8x128xf32, #tpu.memory_space<vmem>>, %arg13: memref<8x256xf32, #tpu.memory_space<vmem>>, %arg14: memref<256x1024xbf16, #tpu.memory_space<vmem>>, %arg15: memref<1024x512xbf16, #tpu.memory_space<vmem>>, %arg16: memref<2x!tpu.dma_semaphore, #tpu.memory_space<semaphore_mem>>) attributes {dimension_semantics = [], scalar_prefetch = 0 : i64, scratch_operands = 3 : i64, tpu.core_type = #tpu.core_type<tc>} {
    %c0_i32 = arith.constant 0 : i32
    %0 = tpu.memref_slice %arg16[%c0_i32] : memref<2x!tpu.dma_semaphore, #tpu.memory_space<semaphore_mem>> -> memref<1x!tpu.dma_semaphore, #tpu.memory_space<semaphore_mem>>
    %1 = tpu.memref_squeeze %0 : memref<1x!tpu.dma_semaphore, #tpu.memory_space<semaphore_mem>> -> memref<!tpu.dma_semaphore, #tpu.memory_space<semaphore_mem>>
    tpu.enqueue_dma source(%arg4 : memref<256x1024xbf16, #tpu.memory_space<any>>) target(%arg14 : memref<256x1024xbf16, #tpu.memory_space<vmem>>) target_semaphore(%1 : memref<!tpu.dma_semaphore, #tpu.memory_space<semaphore_mem>>)
    %c1_i32 = arith.constant 1 : i32
    %2 = tpu.memref_slice %arg16[%c1_i32] : memref<2x!tpu.dma_semaphore, #tpu.memory_space<semaphore_mem>> -> memref<1x!tpu.dma_semaphore, #tpu.memory_space<semaphore_mem>>
    %3 = tpu.memref_squeeze %2 : memref<1x!tpu.dma_semaphore, #tpu.memory_space<semaphore_mem>> -> memref<!tpu.dma_semaphore, #tpu.memory_space<semaphore_mem>>
    tpu.enqueue_dma source(%arg5 : memref<1024x512xbf16, #tpu.memory_space<any>>) target(%arg15 : memref<1024x512xbf16, #tpu.memory_space<vmem>>) target_semaphore(%3 : memref<!tpu.dma_semaphore, #tpu.memory_space<semaphore_mem>>)
    %4 = tpu.iota {dimensions = array<i32: 1>} : vector<8x16xi32>
    %cst = arith.constant 0.000000e+00 : f32
    %5 = vector.broadcast %cst : f32 to vector<8x16xf32>
    %c0 = arith.constant 0 : index
    %c0_0 = arith.constant 0 : index
    %6 = vector.load %arg0[%c0, %c0_0] : memref<8x4xi32, #tpu.memory_space<vmem>>, vector<8x1xi32>
    %c0_i32_1 = arith.constant 0 : i32
    %7 = vector.broadcast %c0_i32_1 : i32 to vector<8x1xi32>
    %8 = arith.addi %6, %7 : vector<8x1xi32>
    %9 = vector.broadcast %8 : vector<8x1xi32> to vector<8x16xi32>
    %10 = arith.cmpi eq, %4, %9 : vector<8x16xi32>
    %11 = arith.extui %10 : vector<8x16xi1> to vector<8x16xi32>
    %12 = arith.sitofp %11 : vector<8x16xi32> to vector<8x16xf32>
    %13 = arith.addf %5, %12 : vector<8x16xf32>
    %c0_2 = arith.constant 0 : index
    %c1 = arith.constant 1 : index
    %14 = vector.load %arg0[%c0_2, %c1] : memref<8x4xi32, #tpu.memory_space<vmem>>, vector<8x1xi32>
    %c2_i32 = arith.constant 2 : i32
    %15 = vector.broadcast %c2_i32 : i32 to vector<8x1xi32>
    %16 = arith.addi %14, %15 : vector<8x1xi32>
    %17 = vector.broadcast %16 : vector<8x1xi32> to vector<8x16xi32>
    %18 = arith.cmpi eq, %4, %17 : vector<8x16xi32>
    %19 = arith.extui %18 : vector<8x16xi1> to vector<8x16xi32>
    %20 = arith.sitofp %19 : vector<8x16xi32> to vector<8x16xf32>
    %21 = arith.addf %13, %20 : vector<8x16xf32>
    %c0_3 = arith.constant 0 : index
    %c2 = arith.constant 2 : index
    %22 = vector.load %arg0[%c0_3, %c2] : memref<8x4xi32, #tpu.memory_space<vmem>>, vector<8x1xi32>
    %c7_i32 = arith.constant 7 : i32
    %23 = vector.broadcast %c7_i32 : i32 to vector<8x1xi32>
    %24 = arith.addi %22, %23 : vector<8x1xi32>
    %25 = vector.broadcast %24 : vector<8x1xi32> to vector<8x16xi32>
    %26 = arith.cmpi eq, %4, %25 : vector<8x16xi32>
    %27 = arith.extui %26 : vector<8x16xi1> to vector<8x16xi32>
    %28 = arith.sitofp %27 : vector<8x16xi32> to vector<8x16xf32>
    %29 = arith.addf %21, %28 : vector<8x16xf32>
    %c0_4 = arith.constant 0 : index
    %c3 = arith.constant 3 : index
    %30 = vector.load %arg0[%c0_4, %c3] : memref<8x4xi32, #tpu.memory_space<vmem>>, vector<8x1xi32>
    %c9_i32 = arith.constant 9 : i32
    %31 = vector.broadcast %c9_i32 : i32 to vector<8x1xi32>
    %32 = arith.addi %30, %31 : vector<8x1xi32>
    %33 = vector.broadcast %32 : vector<8x1xi32> to vector<8x16xi32>
    %34 = arith.cmpi eq, %4, %33 : vector<8x16xi32>
    %35 = arith.extui %34 : vector<8x16xi1> to vector<8x16xi32>
    %36 = arith.sitofp %35 : vector<8x16xi32> to vector<8x16xf32>
    %37 = arith.addf %29, %36 : vector<8x16xf32>
    %c11_i32 = arith.constant 11 : i32
    %38 = vector.broadcast %c11_i32 : i32 to vector<8x16xi32>
    %39 = arith.cmpi eq, %4, %38 : vector<8x16xi32>
    %c0_5 = arith.constant 0 : index
    %c0_6 = arith.constant 0 : index
    %40 = vector.load %arg1[%c0_5, %c0_6] : memref<8x1xf32, #tpu.memory_space<vmem>>, vector<8x1xf32>
    %cst_7 = arith.constant 0.000000e+00 : f32
    %41 = vector.shape_cast %40 : vector<8x1xf32> to vector<8x1xf32>
    %42 = vector.broadcast %41 : vector<8x1xf32> to vector<8x16xf32>
    %43 = vector.broadcast %cst_7 : f32 to vector<8x16xf32>
    %44 = arith.select %39, %42, %43 : vector<8x16xi1>, vector<8x16xf32>
    %45 = arith.addf %37, %44 : vector<8x16xf32>
    %c0_8 = arith.constant 0 : index
    %c0_9 = arith.constant 0 : index
    %46 = vector.load %arg2[%c0_8, %c0_9] : memref<16x256xbf16, #tpu.memory_space<vmem>>, vector<16x256xbf16>
    %47 = arith.truncf %45 : vector<8x16xf32> to vector<8x16xbf16>
    %cst_10 = arith.constant dense<0.000000e+00> : vector<8x256xf32>
    %48 = tpu.matmul %47, %46, %cst_10 {dimension_numbers = #tpu.dot_dimension_numbers<[1], [0], [0], [1], [0, 0, 1, 1], [], []>} : vector<8x16xbf16>, vector<16x256xbf16>, vector<8x256xf32> -> vector<8x256xf32>
    %c0_11 = arith.constant 0 : index
    %c0_12 = arith.constant 0 : index
    %49 = vector.load %arg9[%c0_11, %c0_12] : memref<1x2688xf32, #tpu.memory_space<vmem>>, vector<1x256xf32>
    %50 = vector.broadcast %49 : vector<1x256xf32> to vector<8x256xf32>
    %51 = arith.addf %48, %50 : vector<8x256xf32>
    %c0_13 = arith.constant 0 : index
    %c0_14 = arith.constant 0 : index
    %52 = vector.load %arg3[%c0_13, %c0_14] : memref<256x256xbf16, #tpu.memory_space<vmem>>, vector<256x256xbf16>
    %53 = arith.truncf %51 : vector<8x256xf32> to vector<8x256xbf16>
    %cst_15 = arith.constant dense<0.000000e+00> : vector<8x256xf32>
    %54 = tpu.matmul %53, %52, %cst_15 {dimension_numbers = #tpu.dot_dimension_numbers<[1], [0], [0], [1], [0, 0, 1, 1], [], []>} : vector<8x256xbf16>, vector<256x256xbf16>, vector<8x256xf32> -> vector<8x256xf32>
    %c0_16 = arith.constant 0 : index
    %c256 = arith.constant 256 : index
    %55 = vector.load %arg9[%c0_16, %c256] : memref<1x2688xf32, #tpu.memory_space<vmem>>, vector<1x256xf32>
    %56 = vector.broadcast %55 : vector<1x256xf32> to vector<8x256xf32>
    %57 = arith.addf %54, %56 : vector<8x256xf32>
    %cst_17 = arith.constant 0.000000e+00 : f32
    %58 = vector.broadcast %cst_17 : f32 to vector<8x256xf32>
    %59 = arith.maximumf %57, %58 : vector<8x256xf32>
    %cst_18 = arith.constant dense<0.000000e+00> : vector<256xf32>
    %60 = vector.multi_reduction <add>, %59, %cst_18 [0] : vector<8x256xf32> to vector<256xf32>
    %61 = vector.shape_cast %60 : vector<256xf32> to vector<1x256xf32>
    %cst_19 = arith.constant 8.000000e+00 : f32
    %62 = vector.broadcast %cst_19 : f32 to vector<1x256xf32>
    %63 = arith.divf %61, %62 : vector<1x256xf32>
    %64 = vector.broadcast %63 : vector<1x256xf32> to vector<8x256xf32>
    %65 = arith.subf %59, %64 : vector<8x256xf32>
    %66 = arith.mulf %65, %65 : vector<8x256xf32>
    %cst_20 = arith.constant dense<0.000000e+00> : vector<256xf32>
    %67 = vector.multi_reduction <add>, %66, %cst_20 [0] : vector<8x256xf32> to vector<256xf32>
    %68 = vector.shape_cast %67 : vector<256xf32> to vector<1x256xf32>
    %cst_21 = arith.constant 8.000000e+00 : f32
    %69 = vector.broadcast %cst_21 : f32 to vector<1x256xf32>
    %70 = arith.divf %68, %69 : vector<1x256xf32>
    %c0_22 = arith.constant 0 : index
    %c0_23 = arith.constant 0 : index
    %71 = vector.load %arg10[%c0_22, %c0_23] : memref<1x2304xf32, #tpu.memory_space<vmem>>, vector<1x256xf32>
    %cst_24 = arith.constant 9.99999974E-6 : f32
    %72 = vector.broadcast %cst_24 : f32 to vector<1x256xf32>
    %73 = arith.addf %70, %72 : vector<1x256xf32>
    %74 = math.rsqrt %73 : vector<1x256xf32>
    %75 = arith.mulf %71, %74 : vector<1x256xf32>
    %c0_25 = arith.constant 0 : index
    %c0_26 = arith.constant 0 : index
    %76 = vector.load %arg11[%c0_25, %c0_26] : memref<1x2304xf32, #tpu.memory_space<vmem>>, vector<1x256xf32>
    %77 = arith.mulf %63, %75 : vector<1x256xf32>
    %78 = arith.subf %76, %77 : vector<1x256xf32>
    %79 = vector.broadcast %75 : vector<1x256xf32> to vector<8x256xf32>
    %80 = arith.mulf %59, %79 : vector<8x256xf32>
    %81 = vector.broadcast %78 : vector<1x256xf32> to vector<8x256xf32>
    %82 = arith.addf %80, %81 : vector<8x256xf32>
    %c0_27 = arith.constant 0 : index
    %c0_28 = arith.constant 0 : index
    %83 = vector.load %arg13[%c0_27, %c0_28] : memref<8x256xf32, #tpu.memory_space<vmem>>, vector<8x256xf32>
    tpu.vector_store %arg13[%c0_27, %c0_28], %82 {strides = array<i32>} : memref<8x256xf32, #tpu.memory_space<vmem>>, vector<8x256xf32>,
    %c0_i32_29 = arith.constant 0 : i32
    %84 = tpu.memref_slice %arg16[%c0_i32_29] : memref<2x!tpu.dma_semaphore, #tpu.memory_space<semaphore_mem>> -> memref<1x!tpu.dma_semaphore, #tpu.memory_space<semaphore_mem>>
    %85 = tpu.memref_squeeze %84 : memref<1x!tpu.dma_semaphore, #tpu.memory_space<semaphore_mem>> -> memref<!tpu.dma_semaphore, #tpu.memory_space<semaphore_mem>>
    tpu.wait_dma2 semaphore(%85 : memref<!tpu.dma_semaphore, #tpu.memory_space<semaphore_mem>>) src(%arg4 : memref<256x1024xbf16, #tpu.memory_space<any>>) dst(%arg14 : memref<256x1024xbf16, #tpu.memory_space<vmem>>)
    %c0_30 = arith.constant 0 : index
    %c0_31 = arith.constant 0 : index
    %86 = vector.load %arg14[%c0_30, %c0_31] : memref<256x1024xbf16, #tpu.memory_space<vmem>>, vector<256x1024xbf16>
    %87 = arith.truncf %82 : vector<8x256xf32> to vector<8x256xbf16>
    %cst_32 = arith.constant dense<0.000000e+00> : vector<8x1024xf32>
    %88 = tpu.matmul %87, %86, %cst_32 {dimension_numbers = #tpu.dot_dimension_numbers<[1], [0], [0], [1], [0, 0, 1, 1], [], []>} : vector<8x256xbf16>, vector<256x1024xbf16>, vector<8x1024xf32> -> vector<8x1024xf32>
    %c0_33 = arith.constant 0 : index
    %c512 = arith.constant 512 : index
    %89 = vector.load %arg9[%c0_33, %c512] : memref<1x2688xf32, #tpu.memory_space<vmem>>, vector<1x1024xf32>
    %90 = vector.broadcast %89 : vector<1x1024xf32> to vector<8x1024xf32>
    %91 = arith.addf %88, %90 : vector<8x1024xf32>
    %cst_34 = arith.constant 0.000000e+00 : f32
    %92 = vector.broadcast %cst_34 : f32 to vector<8x1024xf32>
    %93 = arith.maximumf %91, %92 : vector<8x1024xf32>
    %cst_35 = arith.constant dense<0.000000e+00> : vector<1024xf32>
    %94 = vector.multi_reduction <add>, %93, %cst_35 [0] : vector<8x1024xf32> to vector<1024xf32>
    %95 = vector.shape_cast %94 : vector<1024xf32> to vector<1x1024xf32>
    %cst_36 = arith.constant 8.000000e+00 : f32
    %96 = vector.broadcast %cst_36 : f32 to vector<1x1024xf32>
    %97 = arith.divf %95, %96 : vector<1x1024xf32>
    %98 = vector.broadcast %97 : vector<1x1024xf32> to vector<8x1024xf32>
    %99 = arith.subf %93, %98 : vector<8x1024xf32>
    %100 = arith.mulf %99, %99 : vector<8x1024xf32>
    %cst_37 = arith.constant dense<0.000000e+00> : vector<1024xf32>
    %101 = vector.multi_reduction <add>, %100, %cst_37 [0] : vector<8x1024xf32> to vector<1024xf32>
    %102 = vector.shape_cast %101 : vector<1024xf32> to vector<1x1024xf32>
    %cst_38 = arith.constant 8.000000e+00 : f32
    %103 = vector.broadcast %cst_38 : f32 to vector<1x1024xf32>
    %104 = arith.divf %102, %103 : vector<1x1024xf32>
    %c0_39 = arith.constant 0 : index
    %c256_40 = arith.constant 256 : index
    %105 = vector.load %arg10[%c0_39, %c256_40] : memref<1x2304xf32, #tpu.memory_space<vmem>>, vector<1x1024xf32>
    %cst_41 = arith.constant 9.99999974E-6 : f32
    %106 = vector.broadcast %cst_41 : f32 to vector<1x1024xf32>
    %107 = arith.addf %104, %106 : vector<1x1024xf32>
    %108 = math.rsqrt %107 : vector<1x1024xf32>
    %109 = arith.mulf %105, %108 : vector<1x1024xf32>
    %c0_42 = arith.constant 0 : index
    %c256_43 = arith.constant 256 : index
    %110 = vector.load %arg11[%c0_42, %c256_43] : memref<1x2304xf32, #tpu.memory_space<vmem>>, vector<1x1024xf32>
    %111 = arith.mulf %97, %109 : vector<1x1024xf32>
    %112 = arith.subf %110, %111 : vector<1x1024xf32>
    %113 = vector.broadcast %109 : vector<1x1024xf32> to vector<8x1024xf32>
    %114 = arith.mulf %93, %113 : vector<8x1024xf32>
    %115 = vector.broadcast %112 : vector<1x1024xf32> to vector<8x1024xf32>
    %116 = arith.addf %114, %115 : vector<8x1024xf32>
    %c1_i32_44 = arith.constant 1 : i32
    %117 = tpu.memref_slice %arg16[%c1_i32_44] : memref<2x!tpu.dma_semaphore, #tpu.memory_space<semaphore_mem>> -> memref<1x!tpu.dma_semaphore, #tpu.memory_space<semaphore_mem>>
    %118 = tpu.memref_squeeze %117 : memref<1x!tpu.dma_semaphore, #tpu.memory_space<semaphore_mem>> -> memref<!tpu.dma_semaphore, #tpu.memory_space<semaphore_mem>>
    tpu.wait_dma2 semaphore(%118 : memref<!tpu.dma_semaphore, #tpu.memory_space<semaphore_mem>>) src(%arg5 : memref<1024x512xbf16, #tpu.memory_space<any>>) dst(%arg15 : memref<1024x512xbf16, #tpu.memory_space<vmem>>)
    %c0_45 = arith.constant 0 : index
    %c0_46 = arith.constant 0 : index
    %119 = vector.load %arg15[%c0_45, %c0_46] : memref<1024x512xbf16, #tpu.memory_space<vmem>>, vector<1024x512xbf16>
    %120 = arith.truncf %116 : vector<8x1024xf32> to vector<8x1024xbf16>
    %cst_47 = arith.constant dense<0.000000e+00> : vector<8x512xf32>
    %121 = tpu.matmul %120, %119, %cst_47 {dimension_numbers = #tpu.dot_dimension_numbers<[1], [0], [0], [1], [0, 0, 1, 1], [], []>} : vector<8x1024xbf16>, vector<1024x512xbf16>, vector<8x512xf32> -> vector<8x512xf32>
    %c0_48 = arith.constant 0 : index
    %c1536 = arith.constant 1536 : index
    %122 = vector.load %arg9[%c0_48, %c1536] : memref<1x2688xf32, #tpu.memory_space<vmem>>, vector<1x512xf32>
    %123 = vector.broadcast %122 : vector<1x512xf32> to vector<8x512xf32>
    %124 = arith.addf %121, %123 : vector<8x512xf32>
    %cst_49 = arith.constant 0.000000e+00 : f32
    %125 = vector.broadcast %cst_49 : f32 to vector<8x512xf32>
    %126 = arith.maximumf %124, %125 : vector<8x512xf32>
    %cst_50 = arith.constant dense<0.000000e+00> : vector<512xf32>
    %127 = vector.multi_reduction <add>, %126, %cst_50 [0] : vector<8x512xf32> to vector<512xf32>
    %128 = vector.shape_cast %127 : vector<512xf32> to vector<1x512xf32>
    %cst_51 = arith.constant 8.000000e+00 : f32
    %129 = vector.broadcast %cst_51 : f32 to vector<1x512xf32>
    %130 = arith.divf %128, %129 : vector<1x512xf32>
    %131 = vector.broadcast %130 : vector<1x512xf32> to vector<8x512xf32>
    %132 = arith.subf %126, %131 : vector<8x512xf32>
    %133 = arith.mulf %132, %132 : vector<8x512xf32>
    %cst_52 = arith.constant dense<0.000000e+00> : vector<512xf32>
    %134 = vector.multi_reduction <add>, %133, %cst_52 [0] : vector<8x512xf32> to vector<512xf32>
    %135 = vector.shape_cast %134 : vector<512xf32> to vector<1x512xf32>
    %cst_53 = arith.constant 8.000000e+00 : f32
    %136 = vector.broadcast %cst_53 : f32 to vector<1x512xf32>
    %137 = arith.divf %135, %136 : vector<1x512xf32>
    %c0_54 = arith.constant 0 : index
    %c1280 = arith.constant 1280 : index
    %138 = vector.load %arg10[%c0_54, %c1280] : memref<1x2304xf32, #tpu.memory_space<vmem>>, vector<1x512xf32>
    %cst_55 = arith.constant 9.99999974E-6 : f32
    %139 = vector.broadcast %cst_55 : f32 to vector<1x512xf32>
    %140 = arith.addf %137, %139 : vector<1x512xf32>
    %141 = math.rsqrt %140 : vector<1x512xf32>
    %142 = arith.mulf %138, %141 : vector<1x512xf32>
    %c0_56 = arith.constant 0 : index
    %c1280_57 = arith.constant 1280 : index
    %143 = vector.load %arg11[%c0_56, %c1280_57] : memref<1x2304xf32, #tpu.memory_space<vmem>>, vector<1x512xf32>
    %144 = arith.mulf %130, %142 : vector<1x512xf32>
    %145 = arith.subf %143, %144 : vector<1x512xf32>
    %146 = vector.broadcast %142 : vector<1x512xf32> to vector<8x512xf32>
    %147 = arith.mulf %126, %146 : vector<8x512xf32>
    %148 = vector.broadcast %145 : vector<1x512xf32> to vector<8x512xf32>
    %149 = arith.addf %147, %148 : vector<8x512xf32>
    %c0_58 = arith.constant 0 : index
    %c0_59 = arith.constant 0 : index
    %150 = vector.load %arg6[%c0_58, %c0_59] : memref<512x256xbf16, #tpu.memory_space<vmem>>, vector<512x256xbf16>
    %151 = arith.truncf %149 : vector<8x512xf32> to vector<8x512xbf16>
    %cst_60 = arith.constant dense<0.000000e+00> : vector<8x256xf32>
    %152 = tpu.matmul %151, %150, %cst_60 {dimension_numbers = #tpu.dot_dimension_numbers<[1], [0], [0], [1], [0, 0, 1, 1], [], []>} : vector<8x512xbf16>, vector<512x256xbf16>, vector<8x256xf32> -> vector<8x256xf32>
    %c0_61 = arith.constant 0 : index
    %c2048 = arith.constant 2048 : index
    %153 = vector.load %arg9[%c0_61, %c2048] : memref<1x2688xf32, #tpu.memory_space<vmem>>, vector<1x256xf32>
    %154 = vector.broadcast %153 : vector<1x256xf32> to vector<8x256xf32>
    %155 = arith.addf %152, %154 : vector<8x256xf32>
    %cst_62 = arith.constant 0.000000e+00 : f32
    %156 = vector.broadcast %cst_62 : f32 to vector<8x256xf32>
    %157 = arith.maximumf %155, %156 : vector<8x256xf32>
    %cst_63 = arith.constant dense<0.000000e+00> : vector<256xf32>
    %158 = vector.multi_reduction <add>, %157, %cst_63 [0] : vector<8x256xf32> to vector<256xf32>
    %159 = vector.shape_cast %158 : vector<256xf32> to vector<1x256xf32>
    %cst_64 = arith.constant 8.000000e+00 : f32
    %160 = vector.broadcast %cst_64 : f32 to vector<1x256xf32>
    %161 = arith.divf %159, %160 : vector<1x256xf32>
    %162 = vector.broadcast %161 : vector<1x256xf32> to vector<8x256xf32>
    %163 = arith.subf %157, %162 : vector<8x256xf32>
    %164 = arith.mulf %163, %163 : vector<8x256xf32>
    %cst_65 = arith.constant dense<0.000000e+00> : vector<256xf32>
    %165 = vector.multi_reduction <add>, %164, %cst_65 [0] : vector<8x256xf32> to vector<256xf32>
    %166 = vector.shape_cast %165 : vector<256xf32> to vector<1x256xf32>
    %cst_66 = arith.constant 8.000000e+00 : f32
    %167 = vector.broadcast %cst_66 : f32 to vector<1x256xf32>
    %168 = arith.divf %166, %167 : vector<1x256xf32>
    %c0_67 = arith.constant 0 : index
    %c1792 = arith.constant 1792 : index
    %169 = vector.load %arg10[%c0_67, %c1792] : memref<1x2304xf32, #tpu.memory_space<vmem>>, vector<1x256xf32>
    %cst_68 = arith.constant 9.99999974E-6 : f32
    %170 = vector.broadcast %cst_68 : f32 to vector<1x256xf32>
    %171 = arith.addf %168, %170 : vector<1x256xf32>
    %172 = math.rsqrt %171 : vector<1x256xf32>
    %173 = arith.mulf %169, %172 : vector<1x256xf32>
    %c0_69 = arith.constant 0 : index
    %c1792_70 = arith.constant 1792 : index
    %174 = vector.load %arg11[%c0_69, %c1792_70] : memref<1x2304xf32, #tpu.memory_space<vmem>>, vector<1x256xf32>
    %175 = arith.mulf %161, %173 : vector<1x256xf32>
    %176 = arith.subf %174, %175 : vector<1x256xf32>
    %177 = vector.broadcast %173 : vector<1x256xf32> to vector<8x256xf32>
    %178 = arith.mulf %157, %177 : vector<8x256xf32>
    %179 = vector.broadcast %176 : vector<1x256xf32> to vector<8x256xf32>
    %180 = arith.addf %178, %179 : vector<8x256xf32>
    %c0_71 = arith.constant 0 : index
    %c0_72 = arith.constant 0 : index
    %181 = vector.load %arg7[%c0_71, %c0_72] : memref<256x256xbf16, #tpu.memory_space<vmem>>, vector<256x256xbf16>
    %182 = arith.truncf %180 : vector<8x256xf32> to vector<8x256xbf16>
    %cst_73 = arith.constant dense<0.000000e+00> : vector<8x256xf32>
    %183 = tpu.matmul %182, %181, %cst_73 {dimension_numbers = #tpu.dot_dimension_numbers<[1], [0], [0], [1], [0, 0, 1, 1], [], []>} : vector<8x256xbf16>, vector<256x256xbf16>, vector<8x256xf32> -> vector<8x256xf32>
    %c0_74 = arith.constant 0 : index
    %c2304 = arith.constant 2304 : index
    %184 = vector.load %arg9[%c0_74, %c2304] : memref<1x2688xf32, #tpu.memory_space<vmem>>, vector<1x256xf32>
    %185 = vector.broadcast %184 : vector<1x256xf32> to vector<8x256xf32>
    %186 = arith.addf %183, %185 : vector<8x256xf32>
    %cst_75 = arith.constant 0.000000e+00 : f32
    %187 = vector.broadcast %cst_75 : f32 to vector<8x256xf32>
    %188 = arith.maximumf %186, %187 : vector<8x256xf32>
    %cst_76 = arith.constant dense<0.000000e+00> : vector<256xf32>
    %189 = vector.multi_reduction <add>, %188, %cst_76 [0] : vector<8x256xf32> to vector<256xf32>
    %190 = vector.shape_cast %189 : vector<256xf32> to vector<1x256xf32>
    %cst_77 = arith.constant 8.000000e+00 : f32
    %191 = vector.broadcast %cst_77 : f32 to vector<1x256xf32>
    %192 = arith.divf %190, %191 : vector<1x256xf32>
    %193 = vector.broadcast %192 : vector<1x256xf32> to vector<8x256xf32>
    %194 = arith.subf %188, %193 : vector<8x256xf32>
    %195 = arith.mulf %194, %194 : vector<8x256xf32>
    %cst_78 = arith.constant dense<0.000000e+00> : vector<256xf32>
    %196 = vector.multi_reduction <add>, %195, %cst_78 [0] : vector<8x256xf32> to vector<256xf32>
    %197 = vector.shape_cast %196 : vector<256xf32> to vector<1x256xf32>
    %cst_79 = arith.constant 8.000000e+00 : f32
    %198 = vector.broadcast %cst_79 : f32 to vector<1x256xf32>
    %199 = arith.divf %197, %198 : vector<1x256xf32>
    %c0_80 = arith.constant 0 : index
    %c2048_81 = arith.constant 2048 : index
    %200 = vector.load %arg10[%c0_80, %c2048_81] : memref<1x2304xf32, #tpu.memory_space<vmem>>, vector<1x256xf32>
    %cst_82 = arith.constant 9.99999974E-6 : f32
    %201 = vector.broadcast %cst_82 : f32 to vector<1x256xf32>
    %202 = arith.addf %199, %201 : vector<1x256xf32>
    %203 = math.rsqrt %202 : vector<1x256xf32>
    %204 = arith.mulf %200, %203 : vector<1x256xf32>
    %c0_83 = arith.constant 0 : index
    %c2048_84 = arith.constant 2048 : index
    %205 = vector.load %arg11[%c0_83, %c2048_84] : memref<1x2304xf32, #tpu.memory_space<vmem>>, vector<1x256xf32>
    %206 = arith.mulf %192, %204 : vector<1x256xf32>
    %207 = arith.subf %205, %206 : vector<1x256xf32>
    %208 = vector.broadcast %204 : vector<1x256xf32> to vector<8x256xf32>
    %209 = arith.mulf %188, %208 : vector<8x256xf32>
    %210 = vector.broadcast %207 : vector<1x256xf32> to vector<8x256xf32>
    %211 = arith.addf %209, %210 : vector<8x256xf32>
    %c0_85 = arith.constant 0 : index
    %c0_86 = arith.constant 0 : index
    %212 = vector.load %arg8[%c0_85, %c0_86] : memref<256x128xbf16, #tpu.memory_space<vmem>>, vector<256x128xbf16>
    %213 = arith.truncf %211 : vector<8x256xf32> to vector<8x256xbf16>
    %cst_87 = arith.constant dense<0.000000e+00> : vector<8x128xf32>
    %214 = tpu.matmul %213, %212, %cst_87 {dimension_numbers = #tpu.dot_dimension_numbers<[1], [0], [0], [1], [0, 0, 1, 1], [], []>} : vector<8x256xbf16>, vector<256x128xbf16>, vector<8x128xf32> -> vector<8x128xf32>
    %c0_88 = arith.constant 0 : index
    %c2560 = arith.constant 2560 : index
    %215 = vector.load %arg9[%c0_88, %c2560] : memref<1x2688xf32, #tpu.memory_space<vmem>>, vector<1x128xf32>
    %216 = vector.broadcast %215 : vector<1x128xf32> to vector<8x128xf32>
    %217 = arith.addf %214, %216 : vector<8x128xf32>
    %c0_89 = arith.constant 0 : index
    %c0_90 = arith.constant 0 : index
    %218 = vector.load %arg12[%c0_89, %c0_90] : memref<8x128xf32, #tpu.memory_space<vmem>>, vector<8x128xf32>
    tpu.vector_store %arg12[%c0_89, %c0_90], %217 {strides = array<i32>} : memref<8x128xf32, #tpu.memory_space<vmem>>, vector<8x128xf32>,
    return
  }
}

</mosaic_0001>

<bundles_post_ra>
// kernel: clinical_net_forward.1
= control target key start
LH: loop header
LB: loop body
LE: loop exit
PB: predicated region body
PF: predicated region fallthrough
CT: control target
= control target key end

     0   :  { %19 = vsyncpa [#allocation6], 0  ;;  %s8942_s0 = inlined_call_operand.vmem [shape: s32[8,4], index: 0, kind: input, shape index: {}]   ;;  %s8943_s1 = inlined_call_operand.vmem [shape: f32[8,1], index: 1, kind: input, shape index: {}]   ;;  %s8944_s2 = inlined_call_operand.hbm [shape: bf16[16,256], index: 2, kind: input, shape index: {}]   ;;  %s8945_s3 = inlined_call_operand.hbm [shape: bf16[256,256], index: 3, kind: input, shape index: {}]   ;;  %s8946_s4 = inlined_call_operand.hbm [shape: bf16[256,1024], index: 4, kind: input, shape index: {}]   ;;  %s8947_s5 = inlined_call_operand.hbm [shape: bf16[1024,512], index: 5, kind: input, shape index: {}]   ;;  %s8948_s6 = inlined_call_operand.hbm [shape: bf16[512,256], index: 6, kind: input, shape index: {}]   ;;  %s8949_s7 = inlined_call_operand.hbm [shape: bf16[256,256], index: 7, kind: input, shape index: {}]   ;;  %s8950_s8 = inlined_call_operand.hbm [shape: bf16[256,128], index: 8, kind: input, shape index: {}]   ;;  %s8951_s9 = inlined_call_operand.vmem [shape: f32[1,2688], index: 9, kind: input, shape index: {}]   ;;  %s8952_s10 = inlined_call_operand.hbm [shape: f32[1,2304], index: 10, kind: input, shape index: {}]   ;;  %s8953_s11 = inlined_call_operand.hbm [shape: f32[1,2304], index: 11, kind: input, shape index: {}]   ;;  %s8954_s12 = inlined_call_operand.vmem [shape: f32[8,128], index: 12, kind: output, shape index: {0}]   ;;  %s8955_s13 = inlined_call_operand.hbm [shape: f32[8,256], index: 13, kind: output, shape index: {1}]  }
   0x1   :  { %20 = vsyncpa [#allocation9], 0 }
   0x2   :  { %21 = vsyncpa [#allocation12], 0 }
   0x3   :  { %22 = vsyncpa [#allocation15], 0 }
   0x4   :  { %23 = vsyncpa [#allocation7], 0  ;;  %s45_s27 = sshll.u32 %s8945_s3, 4  ;;  %s8190_s28 = smov [#allocation8]   ;;  %s46_s27 = int_to_ptr.hbm [resolvable:$true] %s45_s27 }
   0x5   :  { %s47_s29 = sshll.u32 %s8190_s28, 4  ;;  %s71_s15 = sshll.u32 %s8949_s7, 4  ;;  %s48_s29 = int_to_ptr.vmem [resolvable:$true] %s47_s29  ;;  %s72_s15 = int_to_ptr.hbm [resolvable:$true] %s71_s15 }
   0x6   :  { %s8191_s16 = smov 128   ;;  %s8192_s17 = smov 8  }
   0x7   :  { %53 = dma.hbm_to_vmem [thread:$0]  %s46_s27, 4096, %s48_s29, [#allocation9], %s8191_s16, %s8191_s16, %s8192_s17  }
   0x8   :  { %s8193_s18 = smov [#allocation11]   ;;  %s100_s3 = sshll.u32 %s8952_s10, 4  ;;  %s101_s3 = int_to_ptr.hbm [resolvable:$true] %s100_s3 }
   0x9   :  { %s73_s19 = sshll.u32 %s8193_s18, 4  ;;  %s32_s23 = sshll.u32 %s8944_s2, 4  ;;  %s74_s19 = int_to_ptr.vmem [resolvable:$true] %s73_s19  ;;  %s33_s23 = int_to_ptr.hbm [resolvable:$true] %s32_s23 }
   0xa   :  { %79 = dma.hbm_to_vmem [thread:$0]  %s72_s15, 4096, %s74_s19, [#allocation12], %s8191_s16, %s8191_s16, %s8192_s17  }
   0xb   :  { %s8194_s24 = smov [#allocation14]   ;;  %s8195_s26 = smov [#allocation5]  }
   0xc   :  { %s102_s25 = sshll.u32 %s8194_s24, 4  ;;  %s34_s27 = sshll.u32 %s8195_s26, 4  ;;  %s103_s25 = int_to_ptr.vmem [resolvable:$true] %s102_s25  ;;  %s35_s27 = int_to_ptr.vmem [resolvable:$true] %s34_s27 }
   0xd   :  { %105 = dma.hbm_to_vmem [thread:$0]  %s101_s3, 288, %s103_s25, [#allocation15]  }
   0xe   :  { %s58_s10 = sshll.u32 %s8948_s6, 4  ;;  %s84_s2 = sshll.u32 %s8950_s8, 4  ;;  %s59_s10 = int_to_ptr.hbm [resolvable:$true] %s58_s10  ;;  %s85_s2 = int_to_ptr.hbm [resolvable:$true] %s84_s2 }
   0xf   :  { %40 = dma.hbm_to_vmem [thread:$0]  %s33_s23, 256, %s35_s27, [#allocation6], %s8191_s16, %s8191_s16, %s8192_s17  }
  0x10   :  { %s8196_s15 = smov [#allocation10]   ;;  %s8197_s19 = smov [#allocation13]  }
  0x11   :  { %s60_s18 = sshll.u32 %s8196_s15, 4  ;;  %s86_s6 = sshll.u32 %s8197_s19, 4  ;;  %s61_s18 = int_to_ptr.vmem [resolvable:$true] %s60_s18  ;;  %s87_s6 = int_to_ptr.vmem [resolvable:$true] %s86_s6 }
  0x12   :  { %66 = dma.hbm_to_vmem [thread:$0]  %s59_s10, 8192, %s61_s18, [#allocation9], %s8191_s16, %s8191_s16, %s8192_s17  }
  0x13   :  { %s8198_s20 = smov 64   ;;  %s8199_s21 = smov 4  }
  0x14   :  { %92 = dma.hbm_to_vmem [thread:$0]  %s85_s2, 2048, %s87_s6, [#allocation12], %s8198_s20, %s8198_s20, %s8199_s21  }
  0x15   :  { %s111_s22 = sshll.u32 %s8953_s11, 4  ;;  %s8200_s8 = smov [#allocation16]   ;;  %s112_s22 = int_to_ptr.hbm [resolvable:$true] %s111_s22 }
  0x16   :  { %s113_s23 = sshll.u32 %s8200_s8, 4  ;;  %s114_s23 = int_to_ptr.vmem [resolvable:$true] %s113_s23 }
  0x17   :  { %116 = dma.hbm_to_vmem [thread:$0]  %s112_s22, 288, %s114_s23, [#allocation15]  }
  0x18   :  { %8176 = dma.done.wait [#allocation6], 256  }
  0x19   :  { %8177 = vsyncadd [#allocation6], 4294967040 }
  0x1a   :  { %8178 = dma.done.wait [#allocation9], 12288  }
  0x1b   :  { %8179 = vsyncadd [#allocation9], 4294955008 }
  0x1c   :  { %8180 = dma.done.wait [#allocation12], 6144  }
  0x1d   :  { %8181 = vsyncadd [#allocation12], 4294961152 }
  0x1e   :  { %8182 = dma.done.wait [#allocation15], 576  }
  0x1f   :  { %8183 = vsyncadd [#allocation15], 4294966720  ;;  %v8201_v0 = vmov 0   ;;  %v8202_v1 = vmov 2   ;;  %v175_v2 = vld [vmem:[%s8942_s0] sm:$0xff]  ;;  %v8203_v7 = vmov 1   ;;  %v173_v57 = vlaneseq }
  0x20   :  { %7891 = vset.pattern.permute.xlu0 %v8201_v0  ;;  %7893 = vset.pattern.permute.xlu1 %v8202_v1  ;;  %v208_v3 = vld [vmem:[%s8943_s1] sm:$0xff]  ;;  %v191_v4 = vadd.s32 7, %v175_v2  ;;  %v183_v5 = vadd.s32 2, %v175_v2  ;;  %v199_v6 = vadd.s32 9, %v175_v2  ;;  %v8204_v8 = vmov 3   ;;  %s153_s27 = sshll.u32 %s8946_s4, 4  ;;  %s154_s27 = int_to_ptr.hbm [resolvable:$true] %s153_s27 }
  0x21   :  { %7895 = vset.pattern.permute.xlu2 %v8201_v0  ;;  %177 = vperm.xlu0 %7891, %v175_v2   ;;  %v5219_v9 = vld [vmem:[#allocation5] sm:$0xf]  ;;  %v7342_v10 = vld [vmem:[#allocation5 + $0x4] sm:$0xf0]  ;;  %v7341_v12 = vld [vmem:[#allocation5 + $0x4] sm:$0xf] }
  0x22   :  { %211 = vperm.xlu2 %7895, %v208_v3   ;;  %193 = vperm.xlu1 %7893, %v191_v4   ;;  %v5220_v11 = vor.u32 %v7342_v10, %v5219_v9  ;;  %v5221_v13 = vld [vmem:[#allocation5 + $0x8] sm:$0xf0]  ;;  %v5285_v15 = vld [vmem:[#allocation8 + $0x70] sm:$0xf]  ;;  %v7358_v16 = vld [vmem:[#allocation8 + $0x74] sm:$0xf0] }
  0x23   :  { %v5224_v14 = vor.u32 %v7341_v12, %v5221_v13  ;;  %v5349_v17 = vld [vmem:[#allocation8 + $0xf0] sm:$0xf]  ;;  %v5286_v18 = vor.u32 %v7358_v16, %v5285_v15  ;;  %v7374_v19 = vld [vmem:[#allocation8 + $0xf4] sm:$0xf0]  ;;  %v7357_v20 = vld [vmem:[#allocation8 + $0x74] sm:$0xf] }
  0x24   :  { %246 = vmatpush.bf16.msra.mxu0 %v5220_v11  ;;  %v5287_v21 = vld [vmem:[#allocation8 + $0x78] sm:$0xf0]  ;;  %v5350_v22 = vor.u32 %v7374_v19, %v5349_v17  ;;  %v7373_v24 = vld [vmem:[#allocation8 + $0xf4] sm:$0xf]  ;;  %v5277_v26 = vld [vmem:[#allocation8 + $0x60] sm:$0xf] }
  0x25   :  { %259 = vmatpush.bf16.msra.mxu1 %v5224_v14  ;;  %v5290_v23 = vor.u32 %v7357_v20, %v5287_v21  ;;  %v5351_v25 = vld [vmem:[#allocation8 + $0xf8] sm:$0xf0]  ;;  %465 = vmatpush.bf16.msra.mxu2 %v5286_v18  ;;  %v7356_v28 = vld [vmem:[#allocation8 + $0x64] sm:$0xf0]  ;;  %v5341_v29 = vld [vmem:[#allocation8 + $0xe0] sm:$0xf] }
  0x26   :  { %v5354_v27 = vor.u32 %v7373_v24, %v5351_v25  ;;  %v7372_v30 = vld [vmem:[#allocation8 + $0xe4] sm:$0xf0]  ;;  %478 = vmatpush.bf16.msra.mxu3 %v5350_v22  ;;  %v5278_v31 = vor.u32 %v7356_v28, %v5277_v26  ;;  %v7355_v33 = vld [vmem:[#allocation8 + $0x64] sm:$0xf]  ;;  %v5279_v34 = vld [vmem:[#allocation8 + $0x68] sm:$0xf0] }
  0x27   :  { %v5342_v32 = vor.u32 %v7372_v30, %v5341_v29  ;;  %v7371_v35 = vld [vmem:[#allocation8 + $0xe4] sm:$0xf]  ;;  %v5282_v36 = vor.u32 %v7355_v33, %v5279_v34  ;;  %v5343_v37 = vld [vmem:[#allocation8 + $0xe8] sm:$0xf0]  ;;  %v5269_v38 = vld [vmem:[#allocation8 + $0x50] sm:$0xf] }
  0x28   :  { %491 = vmatpush.bf16.msrb.mxu0 %v5290_v23  ;;  %v7354_v39 = vld [vmem:[#allocation8 + $0x54] sm:$0xf0]  ;;  %v5346_v40 = vor.u32 %v7371_v35, %v5343_v37  ;;  %v5333_v41 = vld [vmem:[#allocation8 + $0xd0] sm:$0xf]  ;;  %v7353_v43 = vld [vmem:[#allocation8 + $0x54] sm:$0xf] }
  0x29   :  { %7892 = vset.pattern.permute.xlu0 %v8203_v7  ;;  %504 = vmatpush.bf16.msrb.mxu1 %v5354_v27  ;;  %v7370_v42 = vld [vmem:[#allocation8 + $0xd4] sm:$0xf0]  ;;  %v5270_v44 = vor.u32 %v7354_v39, %v5269_v38  ;;  %v5271_v45 = vld [vmem:[#allocation8 + $0x58] sm:$0xf0]  ;;  %v7369_v46 = vld [vmem:[#allocation8 + $0xd4] sm:$0xf] }
  0x2a   :  { %185 = vperm.xlu0 %7892, %v183_v5   ;;  %7894 = vset.pattern.permute.xlu1 %v8204_v8  ;;  %v5335_v47 = vld [vmem:[#allocation8 + $0xd8] sm:$0xf0]  ;;  %v5334_v48 = vor.u32 %v7370_v42, %v5333_v41  ;;  %v5274_v49 = vor.u32 %v7353_v43, %v5271_v45  ;;  %v5261_v50 = vld [vmem:[#allocation8 + $0x40] sm:$0xf]  ;;  %v7352_v51 = vld [vmem:[#allocation8 + $0x44] sm:$0xf0] }
  0x2b   :  { %201 = vperm.xlu1 %7894, %v199_v6   ;;  %466 = vmatpush.bf16.msra.mxu2 %v5278_v31  ;;  %v5325_v52 = vld [vmem:[#allocation8 + $0xc0] sm:$0xf]  ;;  %v5338_v53 = vor.u32 %v7369_v46, %v5335_v47  ;;  %v7368_v54 = vld [vmem:[#allocation8 + $0xc4] sm:$0xf0]  ;;  %v7351_v55 = vld [vmem:[#allocation8 + $0x44] sm:$0xf]  ;;  %v5262_v61 = vor.u32 %v7352_v51, %v5261_v50 }
  0x2c   :  { %479 = vmatpush.bf16.msra.mxu3 %v5342_v32  ;;  %492 = vmatpush.bf16.msrb.mxu0 %v5282_v36  ;;  %v5263_v56 = vld [vmem:[#allocation8 + $0x48] sm:$0xf0]  ;;  %v7367_v59 = vld [vmem:[#allocation8 + $0xc4] sm:$0xf]  ;;  %v5326_v63 = vor.u32 %v7368_v54, %v5325_v52  ;;  %v5253_v1 = vld [vmem:[#allocation8 + $0x30] sm:$0xf] }
  0x2d   :  { %505 = vmatpush.bf16.msrb.mxu1 %v5346_v40  ;;  %v5327_v60 = vld [vmem:[#allocation8 + $0xc8] sm:$0xf0]  ;;  %v7350_v2 = vld [vmem:[#allocation8 + $0x34] sm:$0xf0]  ;;  %v5317_v3 = vld [vmem:[#allocation8 + $0xb0] sm:$0xf] }
  0x2e   :  { %v5330_v4 = vor.u32 %v7367_v59, %v5327_v60  ;;  %v7366_v5 = vld [vmem:[#allocation8 + $0xb4] sm:$0xf0]  ;;  %v7349_v6 = vld [vmem:[#allocation8 + $0x34] sm:$0xf]  ;;  %v5255_v7 = vld [vmem:[#allocation8 + $0x38] sm:$0xf0]  ;;  %v5254_v11 = vor.u32 %v7350_v2, %v5253_v1 }
  0x2f   :  { %467 = vmatpush.bf16.msra.mxu2 %v5270_v44  ;;  %v174_v8 = vand.u32 127, %v173_v57  ;;  %v7365_v9 = vld [vmem:[#allocation8 + $0xb4] sm:$0xf]  ;;  %v5319_v10 = vld [vmem:[#allocation8 + $0xb8] sm:$0xf0]  ;;  %v5318_v12 = vor.u32 %v7366_v5, %v5317_v3  ;;  %v5258_v13 = vor.u32 %v7349_v6, %v5255_v7  ;;  %v8205_v31 = vmov 0.0  }
  0x30   :  { %480 = vmatpush.bf16.msra.mxu3 %v5334_v48  ;;  %493 = vmatpush.bf16.msrb.mxu0 %v5274_v49  ;;  %v5245_v14 = vld [vmem:[#allocation8 + $0x20] sm:$0xf]  ;;  %v7348_v15 = vld [vmem:[#allocation8 + $0x24] sm:$0xf0]  ;;  %v5322_v17 = vor.u32 %v7365_v9, %v5319_v10  ;;  %v7347_v19 = vld [vmem:[#allocation8 + $0x24] sm:$0xf] }
  0x31   :  { %506 = vmatpush.bf16.msrb.mxu1 %v5338_v53  ;;  %v5309_v16 = vld [vmem:[#allocation8 + $0xa0] sm:$0xf]  ;;  %v7364_v18 = vld [vmem:[#allocation8 + $0xa4] sm:$0xf0]  ;;  %v5247_v20 = vld [vmem:[#allocation8 + $0x28] sm:$0xf0]  ;;  %v5246_v24 = vor.u32 %v7348_v15, %v5245_v14 }
  0x32   :  { %7896 = vset.pattern.permute.xlu0 %v8201_v0  ;;  %v5266_v0 = vor.u32 %v7351_v55, %v5263_v56  ;;  %v7363_v21 = vld [vmem:[#allocation8 + $0xa4] sm:$0xf]  ;;  %v5311_v22 = vld [vmem:[#allocation8 + $0xa8] sm:$0xf0]  ;;  %v5237_v25 = vld [vmem:[#allocation8 + $0x10] sm:$0xf]  ;;  %v5310_v26 = vor.u32 %v7364_v18, %v5309_v16  ;;  %v5250_v27 = vor.u32 %v7347_v19, %v5247_v20 }
  0x33   :  { %468 = vmatpush.bf16.msra.mxu2 %v5262_v61  ;;  %v7346_v28 = vld [vmem:[#allocation8 + $0x14] sm:$0xf0]  ;;  %v5301_v29 = vld [vmem:[#allocation8 + $0x90] sm:$0xf]  ;;  %v5314_v35 = vor.u32 %v7363_v21, %v5311_v22  ;;  %v7345_v36 = vld [vmem:[#allocation8 + $0x14] sm:$0xf] }
  0x34   :  { %481 = vmatpush.bf16.msra.mxu3 %v5326_v63  ;;  %494 = vmatpush.bf16.msrb.mxu0 %v5266_v0  ;;  %v7362_v30 = vld [vmem:[#allocation8 + $0x94] sm:$0xf0]  ;;  %v5239_v37 = vld [vmem:[#allocation8 + $0x18] sm:$0xf0]  ;;  %vm207_vm4 = vcmp.eq.s32.totalorder %v174_v8, 11  ;;  %v5238_v44 = vor.u32 %v7346_v28, %v5237_v25  ;;  %vm235_vm5 = vcmask 130048  }
  0x35   :  { %507 = vmatpush.bf16.msrb.mxu1 %v5330_v4  ;;  %v7361_v40 = vld [vmem:[#allocation8 + $0x94] sm:$0xf]  ;;  %v5303_v41 = vld [vmem:[#allocation8 + $0x98] sm:$0xf0]  ;;  %v5302_v46 = vor.u32 %v7362_v30, %v5301_v29  ;;  %v5242_v47 = vor.u32 %v7345_v36, %v5239_v37  ;;  %v5229_v53 = vld [vmem:[#allocation8] sm:$0xf] }
  0x36   :  { %v5306_v49 = vor.u32 %v7361_v40, %v5303_v41  ;;  %v7344_v54 = vld [vmem:[#allocation8 + $0x4] sm:$0xf0]  ;;  %v5293_v56 = vld [vmem:[#allocation8 + $0x80] sm:$0xf]  ;;  %v5231_v60 = vld [vmem:[#allocation8 + $0x8] sm:$0xf0] }
  0x37   :  { %469 = vmatpush.bf16.msra.mxu2 %v5254_v11  ;;  %v5230_v55 = vor.u32 %v7344_v54, %v5229_v53  ;;  %v7360_v57 = vld [vmem:[#allocation8 + $0x84] sm:$0xf0]  ;;  %v7359_v61 = vld [vmem:[#allocation8 + $0x84] sm:$0xf]  ;;  %v219_v1 = vld [vmem:[%s8951_s9] sm:$0x3] }
  0x38   :  { %482 = vmatpush.bf16.msra.mxu3 %v5318_v12  ;;  %495 = vmatpush.bf16.msrb.mxu0 %v5258_v13  ;;  %v5294_v59 = vor.u32 %v7360_v57, %v5293_v56  ;;  %v221_v2 = vperm.slane %v219_v1, 0  ;;  %v222_v3 = vperm.slane %v219_v1, 1  ;;  %s8206_s28 = smov [#allocation2]   ;;  %s167_s14 = sshll.u32 %s8947_s5, 4  ;;  %v8208_v12 = vmov 8.0   ;;  %s168_s14 = int_to_ptr.hbm [resolvable:$true] %s167_s14 }
  0x39   :  { %508 = vmatpush.bf16.msrb.mxu1 %v5322_v17  ;;  %s155_s29 = sshll.u32 %s8206_s28, 4  ;;  %s8207_s2 = smov [#allocation3]   ;;  %7897 = vrcp.f32 %v8208_v12  ;;  %v299_v13 = vld [vmem:[%s8951_s9 + $0x2] sm:$0x3]  ;;  %vm584_vm12 = vcmask 1040384   ;;  %s156_s29 = int_to_ptr.vmem [resolvable:$true] %s155_s29 }
  0x3a   :  { %158 = dma.hbm_to_vmem [thread:$0]  %s154_s27, 16384, %s156_s29, [#allocation4]  ;;  %v302_v15 = vperm.slane %v299_v13, 1  ;;  %v301_v20 = vperm.slane %v299_v13, 0 }
  0x3b   :  { %470 = vmatpush.bf16.msra.mxu2 %v5246_v24  ;;  %s169_s15 = sshll.u32 %s8207_s2, 4  ;;  %s170_s15 = int_to_ptr.vmem [resolvable:$true] %s169_s15 }
  0x3c   :  { %483 = vmatpush.bf16.msra.mxu3 %v5310_v26  ;;  %496 = vmatpush.bf16.msrb.mxu0 %v5250_v27  ;;  %172 = dma.hbm_to_vmem [thread:$0]  %s168_s14, 32768, %s170_s15, [#allocation4 + $0x1] }
  0x3d   :  { %509 = vmatpush.bf16.msrb.mxu1 %v5314_v35 }
  0x3f   :  { %471 = vmatpush.bf16.msra.mxu2 %v5238_v44  ;;  %v7898_v14 = vpop.eup %7897 }
  0x40   :  { %484 = vmatpush.bf16.msra.mxu3 %v5302_v46  ;;  %497 = vmatpush.bf16.msrb.mxu0 %v5242_v47  ;;  %v532_v18 = vmul.f32 8.0, %v7898_v14  ;;  %vm536_vm6 = vweird.f32 %v7898_v14 }
  0x41   :  { %510 = vmatpush.bf16.msrb.mxu1 %v5306_v49 }
  0x42   :  { %v533_v22 = vsub.f32 1.0, %v532_v18 }
  0x43   :  { %472 = vmatpush.bf16.msra.mxu2 %v5230_v55 }
  0x44   :  { %485 = vmatpush.bf16.msra.mxu3 %v5294_v59  ;;  %v534_v28 = vmul.f32 %v7898_v14, %v533_v22 }
  0x46   :  { %v535_v35 = vadd.f32 %v7898_v14, %v534_v28  ;;  %v588_v28 = vld [vmem:[#allocation16] sm:$0x3] }
  0x7c   :  { %v212_v39 = vpop.permute.xlu2 %211 }
  0x7d   :  { %v214_v48 = vsel %vm207_vm4, %v212_v39, 0.0 }
  0x93   :  { %v178_v58 = vpop.permute.xlu0 %177 }
  0x94   :  { %v194_v62 = vpop.permute.xlu1 %193  ;;  %vm179_vm0 = vcmp.eq.s32.totalorder %v174_v8, %v178_v58  ;;  %v7343_v58 = vld [vmem:[#allocation8 + $0x4] sm:$0xf] }
  0x95   :  { %vm195_vm1 = vcmp.eq.s32.totalorder %v174_v8, %v194_v62  ;;  %v5213_v32 = vsel %vm179_vm0, 1.0, %v8205_v31  ;;  %v5295_v62 = vld [vmem:[#allocation8 + $0x88] sm:$0xf0]  ;;  %v5234_v63 = vor.u32 %v7343_v58, %v5231_v60 }
  0x96   :  { %v5215_v42 = vsel %vm195_vm1, 1.0, %v8205_v31  ;;  %v5298_v0 = vor.u32 %v7359_v61, %v5295_v62 }
  0x97   :  { %498 = vmatpush.bf16.msrb.mxu0 %v5234_v63 }
  0x98   :  { %511 = vmatpush.bf16.msrb.mxu1 %v5298_v0 }
  0x9c   :  { %v186_v23 = vpop.permute.xlu0 %185 }
  0x9d   :  { %vm187_vm2 = vcmp.eq.s32.totalorder %v174_v8, %v186_v23  ;;  %v202_v34 = vpop.permute.xlu1 %201 }
  0x9e   :  { %v5214_v33 = vsel %vm187_vm2, 1.0, %v8205_v31  ;;  %vm203_vm3 = vcmp.eq.s32.totalorder %v174_v8, %v202_v34 }
  0x9f   :  { %v190_v38 = vadd.f32 %v5214_v33, %v5213_v32  ;;  %v5216_v43 = vsel %vm203_vm3, 1.0, %v8205_v31 }
  0xa1   :  { %v198_v45 = vadd.f32 %v5215_v42, %v190_v38  ;;  %v8341_v42 = vsel %vm536_vm6, %v7898_v14, %v535_v35 }
  0xa3   :  { %v206_v50 = vadd.f32 %v5216_v43, %v198_v45 }
  0xa5   :  { %v215_v51 = vadd.f32 %v214_v48, %v206_v50 }
  0xa7   :  { %v218_v52 = vpack.c.bf16 %v215_v51, %v215_v51 }
  0xa9   :  { %5225 = vmatmul.msk.bf16.vlgmr.msra.gmra.mxu0 %vm235_vm5, %v218_v52  ;;  %5226 = vmatmul.msk.bf16.vlgmr.msra.gmra.mxu1 %vm235_vm5, %v218_v52 }
 0x126   :  { %v248_v4 = vpop.f32.mrf.mxu0  ;;  %v261_v5 = vpop.f32.mrf.mxu1 }
 0x127   :  { %v249_v6 = vadd.f32 %v248_v4, %v221_v2  ;;  %v262_v7 = vadd.f32 %v261_v5, %v222_v3 }
 0x129   :  { %v297_v8 = vpack.c.bf16 %v249_v6, %v249_v6  ;;  %v298_v9 = vpack.c.bf16 %v262_v7, %v262_v7 }
 0x12b   :  { %473 = vmatmul.bf16.vlgmr.msra.gmra.mxu2 %v297_v8  ;;  %486 = vmatmul.bf16.vlgmr.msra.gmra.mxu3 %v298_v9 }
 0x12c   :  { %499 = vmatmul.bf16.vlgmr.msrb.gmra.mxu0 %v297_v8  ;;  %512 = vmatmul.bf16.vlgmr.msrb.gmra.mxu1 %v298_v9 }
 0x12e   :  { %v250_v10 = vpop.f32.mrf.mxu0  ;;  %v263_v11 = vpop.f32.mrf.mxu1 }
 0x1a9   :  { %v500_v16 = vpop.f32.mrf.mxu0  ;;  %v513_v17 = vpop.f32.mrf.mxu1 }
 0x1aa   :  { %v501_v19 = vadd.f32 %v500_v16, %v302_v15 }
 0x1ac   :  { %v514_v21 = vadd.f32 %v513_v17, %v501_v19  ;;  %v558_v19 = vld [vmem:[#allocation14] sm:$0x3] }
 0x1ae   :  { %v8333_v23 = vmax.f32 %v514_v21, 0.0  ;;  %v474_v24 = vpop.f32.mrf.mxu2  ;;  %v487_v25 = vpop.f32.mrf.mxu3 }
 0x1af   :  { %v475_v26 = vadd.f32 %v474_v24, %v301_v20 }
 0x1b0   :  { %v525_v27 = vrot.slane %v8333_v23, 4 }
 0x1b1   :  { %v488_v29 = vadd.f32 %v487_v25, %v475_v26  ;;  %v502_v30 = vpop.f32.mrf.mxu0  ;;  %v515_v31 = vpop.f32.mrf.mxu1 }
 0x1b2   :  { %v526_v32 = vadd.f32 %v525_v27, %v8333_v23 }
 0x1b3   :  { %v8337_v33 = vmax.f32 %v488_v29, 0.0 }
 0x1b4   :  { %v527_v34 = vrot.slane %v526_v32, 2 }
 0x1b5   :  { %v519_v36 = vrot.slane %v8337_v33, 4 }
 0x1b6   :  { %v528_v37 = vadd.f32 %v527_v34, %v526_v32  ;;  %v476_v38 = vpop.f32.mrf.mxu2  ;;  %v489_v39 = vpop.f32.mrf.mxu3 }
 0x1b7   :  { %v520_v40 = vadd.f32 %v519_v36, %v8337_v33 }
 0x1b8   :  { %v529_v41 = vrot.slane %v528_v37, 1 }
 0x1b9   :  { %v521_v43 = vrot.slane %v520_v40, 2 }
 0x1ba   :  { %v530_v44 = vadd.f32 %v529_v41, %v528_v37 }
 0x1bb   :  { %v522_v45 = vadd.f32 %v521_v43, %v520_v40 }
 0x1bc   :  { %v539_v46 = vmul.f32 %v8341_v42, %v530_v44 }
 0x1bd   :  { %v523_v47 = vrot.slane %v522_v45, 1 }
 0x1be   :  { %v541_v48 = vsub.f32 %v8333_v23, %v539_v46 }
 0x1bf   :  { %v524_v49 = vadd.f32 %v523_v47, %v522_v45 }
 0x1c0   :  { %v543_v50 = vmul.f32 %v541_v48, %v541_v48 }
 0x1c1   :  { %v538_v51 = vmul.f32 %v8341_v42, %v524_v49 }
 0x1c2   :  { %v550_v52 = vrot.slane %v543_v50, 4 }
 0x1c3   :  { %v540_v53 = vsub.f32 %v8337_v33, %v538_v51 }
 0x1c4   :  { %v551_v54 = vadd.f32 %v550_v52, %v543_v50 }
 0x1c5   :  { %v542_v55 = vmul.f32 %v540_v53, %v540_v53 }
 0x1c6   :  { %v552_v56 = vrot.slane %v551_v54, 2 }
 0x1c7   :  { %v544_v57 = vrot.slane %v542_v55, 4 }
 0x1c8   :  { %v553_v58 = vadd.f32 %v552_v56, %v551_v54 }
 0x1c9   :  { %v545_v59 = vadd.f32 %v544_v57, %v542_v55 }
 0x1ca   :  { %v554_v60 = vrot.slane %v553_v58, 1 }
 0x1cb   :  { %v546_v61 = vrot.slane %v545_v59, 2 }
 0x1cc   :  { %v555_v62 = vadd.f32 %v554_v60, %v553_v58 }
 0x1cd   :  { %v547_v63 = vadd.f32 %v546_v61, %v545_v59 }
 0x1ce   :  { %v557_v0 = vmul.f32 %v555_v62, %v8341_v42 }
 0x1cf   :  { %v548_v1 = vrot.slane %v547_v63, 1 }
 0x1d0   :  { %v560_v2 = vadd.f32 1e-05, %v557_v0 }
 0x1d1   :  { %v549_v3 = vadd.f32 %v548_v1, %v547_v63 }
 0x1d2   :  { %7899 = vrsqrt.f32 %v560_v2  ;;  %vm577_vm8 = vweird.f32 %v560_v2 }
 0x1d3   :  { %v556_v4 = vmul.f32 %v549_v3, %v8341_v42 }
 0x1d5   :  { %v559_v5 = vadd.f32 1e-05, %v556_v4 }
 0x1d7   :  { %7901 = vrsqrt.f32 %v559_v5  ;;  %vm567_vm11 = vweird.f32 %v559_v5 }
 0x1d8   :  { %v7900_v6 = vpop.eup %7899 }
 0x1d9   :  { %v572_v7 = vmul.f32 %v7900_v6, %v560_v2  ;;  %vm578_vm7 = vweird.f32 %v7900_v6 }
 0x1da   :  { %vm579_vm9 = vmor %vm577_vm8, %vm578_vm7 }
 0x1db   :  { %v573_v8 = vmul.f32 %v7900_v6, %v572_v7 }
 0x1dd   :  { %v7902_v9 = vpop.eup %7901  ;;  %v574_v10 = vmul.f32 0.5, %v573_v8 }
 0x1de   :  { %v562_v11 = vmul.f32 %v7902_v9, %v559_v5  ;;  %vm568_vm10 = vweird.f32 %v7902_v9 }
 0x1df   :  { %v575_v12 = vsub.f32 1.5, %v574_v10  ;;  %vm569_vm13 = vmor %vm567_vm11, %vm568_vm10 }
 0x1e0   :  { %v563_v13 = vmul.f32 %v7902_v9, %v562_v11 }
 0x1e1   :  { %v576_v14 = vmul.f32 %v7900_v6, %v575_v12 }
 0x1e2   :  { %v564_v15 = vmul.f32 0.5, %v563_v13 }
 0x1e3   :  { %v580_v17 = vsel %vm579_vm9, %v7900_v6, %v576_v14 }
 0x1e4   :  { %v565_v16 = vsub.f32 1.5, %v564_v15  ;;  %v583_v20 = vrot.slane %v580_v17, 7 }
 0x1e6   :  { %v566_v18 = vmul.f32 %v7902_v9, %v565_v16 }
 0x1e8   :  { %v570_v21 = vsel %vm569_vm13, %v7902_v9, %v566_v18 }
 0x1e9   :  { %v585_v22 = vsel %vm584_vm12, %v570_v21, %v583_v20 }
 0x1ea   :  { %v587_v24 = vmul.f32 %v585_v22, %v558_v19 }
 0x1ec   :  { %v590_v25 = vperm.slane %v587_v24, 0  ;;  %v591_v26 = vperm.slane %v587_v24, 1 }
 0x1ee   :  { %v595_v27 = vmul.f32 %v591_v26, %v539_v46  ;;  %v594_v29 = vmul.f32 %v590_v25, %v538_v51  ;;  %v602_v34 = vmul.f32 %v590_v25, %v8337_v33  ;;  %v603_v35 = vmul.f32 %v591_v26, %v8333_v23 }
 0x1f0   :  { %v598_v30 = vrot.slane %v595_v27, 7 }
 0x1f2   :  { %v599_v31 = vsel %vm584_vm12, %v594_v29, %v598_v30 }
 0x1f3   :  { %v601_v32 = vsub.f32 %v588_v28, %v599_v31 }
 0x1f5   :  { %v605_v36 = vperm.slane %v601_v32, 0  ;;  %v606_v37 = vperm.slane %v601_v32, 1 }
 0x1f7   :  { %v8353_v38 = vadd.f32 %v605_v36, %v602_v34  ;;  %v8355_v39 = vadd.f32 %v606_v37, %v603_v35 }
 0x1f9   :  { %611 = vst [vmem:[#allocation17] sm:$0xff] %v8353_v38 }
 0x1fa   :  { %612 = vst [vmem:[#allocation17 + $0x8] sm:$0xff] %v8355_v39 }
 0x1fb   :  { %8184 = dma.done.wait [#allocation4], 16384 }
 0x1fc   :  { %8185 = vsyncadd [#allocation4], 4294950912  ;;  %v5581_v40 = vld [vmem:[#allocation2 + $0x1c0] sm:$0xf]  ;;  %v7431_v33 = vld [vmem:[#allocation2 + $0x1c4] sm:$0xf] }
 0x1fd   :  { %v7435_v41 = vld [vmem:[#allocation2 + $0x1dc] sm:$0xf0]  ;;  %v5583_v46 = vld [vmem:[#allocation2 + $0x1e0] sm:$0xf0] }
 0x1fe   :  { %v5837_v43 = vld [vmem:[#allocation2 + $0x3c0] sm:$0xf]  ;;  %v5582_v44 = vor.u32 %v7435_v41, %v5581_v40  ;;  %v5586_v47 = vor.u32 %v7431_v33, %v5583_v46  ;;  %v7495_v48 = vld [vmem:[#allocation2 + $0x3c4] sm:$0xf] }
 0x1ff   :  { %v7499_v45 = vld [vmem:[#allocation2 + $0x3dc] sm:$0xf0]  ;;  %v5839_v49 = vld [vmem:[#allocation2 + $0x3e0] sm:$0xf0] }
 0x200   :  { %v5838_v23 = vor.u32 %v7499_v45, %v5837_v43  ;;  %v5549_v50 = vld [vmem:[#allocation2 + $0x180] sm:$0xf]  ;;  %1405 = vmatpush.bf16.msrb.mxu2 %v5582_v44  ;;  %v5842_v51 = vor.u32 %v7495_v48, %v5839_v49  ;;  %1431 = vmatpush.bf16.msra.mxu0 %v5586_v47  ;;  %v7423_v57 = vld [vmem:[#allocation2 + $0x184] sm:$0xf] }
 0x201   :  { %v7427_v52 = vld [vmem:[#allocation2 + $0x19c] sm:$0xf0]  ;;  %v5551_v58 = vld [vmem:[#allocation2 + $0x1a0] sm:$0xf0] }
 0x202   :  { %v5805_v53 = vld [vmem:[#allocation2 + $0x380] sm:$0xf]  ;;  %1418 = vmatpush.bf16.msrb.mxu3 %v5838_v23  ;;  %v5550_v55 = vor.u32 %v7427_v52, %v5549_v50  ;;  %v7487_v59 = vld [vmem:[#allocation2 + $0x384] sm:$0xf]  ;;  %1444 = vmatpush.bf16.msra.mxu1 %v5842_v51  ;;  %v5554_v60 = vor.u32 %v7423_v57, %v5551_v58 }
 0x203   :  { %v7491_v54 = vld [vmem:[#allocation2 + $0x39c] sm:$0xf0]  ;;  %v5807_v61 = vld [vmem:[#allocation2 + $0x3a0] sm:$0xf0] }
 0x204   :  { %v5806_v56 = vor.u32 %v7491_v54, %v5805_v53  ;;  %v5517_v62 = vld [vmem:[#allocation2 + $0x140] sm:$0xf]  ;;  %v5810_v0 = vor.u32 %v7487_v59, %v5807_v61  ;;  %v7415_v3 = vld [vmem:[#allocation2 + $0x144] sm:$0xf]  ;;  %1406 = vmatpush.bf16.msrb.mxu2 %v5550_v55  ;;  %1432 = vmatpush.bf16.msra.mxu0 %v5554_v60 }
 0x205   :  { %v7419_v63 = vld [vmem:[#allocation2 + $0x15c] sm:$0xf0]  ;;  %v5519_v5 = vld [vmem:[#allocation2 + $0x160] sm:$0xf0] }
 0x206   :  { %v5773_v1 = vld [vmem:[#allocation2 + $0x340] sm:$0xf]  ;;  %v5518_v4 = vor.u32 %v7419_v63, %v5517_v62  ;;  %v7479_v6 = vld [vmem:[#allocation2 + $0x344] sm:$0xf]  ;;  %1419 = vmatpush.bf16.msrb.mxu3 %v5806_v56  ;;  %v5522_v9 = vor.u32 %v7415_v3, %v5519_v5  ;;  %1445 = vmatpush.bf16.msra.mxu1 %v5810_v0 }
 0x207   :  { %v7483_v2 = vld [vmem:[#allocation2 + $0x35c] sm:$0xf0]  ;;  %v5775_v7 = vld [vmem:[#allocation2 + $0x360] sm:$0xf0] }
 0x208   :  { %v5774_v8 = vor.u32 %v7483_v2, %v5773_v1  ;;  %v5485_v10 = vld [vmem:[#allocation2 + $0x100] sm:$0xf]  ;;  %v5778_v13 = vor.u32 %v7479_v6, %v5775_v7  ;;  %v7407_v15 = vld [vmem:[#allocation2 + $0x104] sm:$0xf]  ;;  %1407 = vmatpush.bf16.msrb.mxu2 %v5518_v4  ;;  %1433 = vmatpush.bf16.msra.mxu0 %v5522_v9  ;;  %v5589_v6 = vld [vmem:[#allocation2 + $0x1c8] sm:$0xf] }
 0x209   :  { %v7411_v11 = vld [vmem:[#allocation2 + $0x11c] sm:$0xf0]  ;;  %v5487_v16 = vld [vmem:[#allocation2 + $0x120] sm:$0xf0]  ;;  %v7436_v7 = vld [vmem:[#allocation2 + $0x1e4] sm:$0xf0] }
 0x20a   :  { %v5741_v12 = vld [vmem:[#allocation2 + $0x300] sm:$0xf]  ;;  %v7471_v17 = vld [vmem:[#allocation2 + $0x304] sm:$0xf]  ;;  %v5486_v19 = vor.u32 %v7411_v11, %v5485_v10  ;;  %1420 = vmatpush.bf16.msrb.mxu3 %v5774_v8  ;;  %v5490_v21 = vor.u32 %v7407_v15, %v5487_v16  ;;  %1446 = vmatpush.bf16.msra.mxu1 %v5778_v13  ;;  %v5845_v8 = vld [vmem:[#allocation2 + $0x3c8] sm:$0xf] }
 0x20b   :  { %v7475_v14 = vld [vmem:[#allocation2 + $0x31c] sm:$0xf0]  ;;  %v5743_v18 = vld [vmem:[#allocation2 + $0x320] sm:$0xf0]  ;;  %v7500_v10 = vld [vmem:[#allocation2 + $0x3e4] sm:$0xf0] }
 0x20c   :  { %v5742_v20 = vor.u32 %v7475_v14, %v5741_v12  ;;  %v5453_v22 = vld [vmem:[#allocation2 + $0xc0] sm:$0xf]  ;;  %v5746_v26 = vor.u32 %v7471_v17, %v5743_v18  ;;  %v7399_v28 = vld [vmem:[#allocation2 + $0xc4] sm:$0xf]  ;;  %1408 = vmatpush.bf16.msrb.mxu2 %v5486_v19  ;;  %1434 = vmatpush.bf16.msra.mxu0 %v5490_v21  ;;  %v7432_v11 = vld [vmem:[#allocation2 + $0x1cc] sm:$0xf]  ;;  %v5590_v18 = vor.u32 %v7436_v7, %v5589_v6 }
 0x20d   :  { %v7403_v24 = vld [vmem:[#allocation2 + $0xdc] sm:$0xf0]  ;;  %v5455_v29 = vld [vmem:[#allocation2 + $0xe0] sm:$0xf0]  ;;  %v5591_v12 = vld [vmem:[#allocation2 + $0x1e8] sm:$0xf0]  ;;  %v5846_v19 = vor.u32 %v7500_v10, %v5845_v8 }
 0x20e   :  { %v5709_v25 = vld [vmem:[#allocation2 + $0x2c0] sm:$0xf]  ;;  %v7463_v30 = vld [vmem:[#allocation2 + $0x2c4] sm:$0xf]  ;;  %v5454_v32 = vor.u32 %v7403_v24, %v5453_v22  ;;  %1421 = vmatpush.bf16.msrb.mxu3 %v5742_v20  ;;  %v5458_v35 = vor.u32 %v7399_v28, %v5455_v29  ;;  %1447 = vmatpush.bf16.msra.mxu1 %v5746_v26  ;;  %v7496_v15 = vld [vmem:[#allocation2 + $0x3cc] sm:$0xf]  ;;  %v5594_v20 = vor.u32 %v7432_v11, %v5591_v12 }
 0x20f   :  { %v7467_v27 = vld [vmem:[#allocation2 + $0x2dc] sm:$0xf0]  ;;  %v5711_v31 = vld [vmem:[#allocation2 + $0x2e0] sm:$0xf0]  ;;  %v5847_v16 = vld [vmem:[#allocation2 + $0x3e8] sm:$0xf0]  ;;  %v8361_v26 = vpack.c.bf16 %v8353_v38, %v8353_v38 }
 0x210   :  { %v5710_v34 = vor.u32 %v7467_v27, %v5709_v25  ;;  %v5421_v36 = vld [vmem:[#allocation2 + $0x80] sm:$0xf]  ;;  %v5714_v41 = vor.u32 %v7463_v30, %v5711_v31  ;;  %v7391_v44 = vld [vmem:[#allocation2 + $0x84] sm:$0xf]  ;;  %1409 = vmatpush.bf16.msrb.mxu2 %v5454_v32  ;;  %1435 = vmatpush.bf16.msra.mxu0 %v5458_v35  ;;  %v5557_v21 = vld [vmem:[#allocation2 + $0x188] sm:$0xf]  ;;  %v5850_v25 = vor.u32 %v7496_v15, %v5847_v16 }
 0x211   :  { %v7395_v37 = vld [vmem:[#allocation2 + $0x9c] sm:$0xf0]  ;;  %v5423_v45 = vld [vmem:[#allocation2 + $0xa0] sm:$0xf0]  ;;  %v7428_v22 = vld [vmem:[#allocation2 + $0x1a4] sm:$0xf0]  ;;  %v8365_v30 = vpack.c.bf16 %v8355_v39, %v8355_v39 }
 0x212   :  { %v5677_v40 = vld [vmem:[#allocation2 + $0x280] sm:$0xf]  ;;  %v7455_v33 = vld [vmem:[#allocation2 + $0x284] sm:$0xf]  ;;  %v5422_v23 = vor.u32 %v7395_v37, %v5421_v36  ;;  %1422 = vmatpush.bf16.msrb.mxu3 %v5710_v34  ;;  %v5426_v48 = vor.u32 %v7391_v44, %v5423_v45  ;;  %1448 = vmatpush.bf16.msra.mxu1 %v5714_v41  ;;  %v5813_v24 = vld [vmem:[#allocation2 + $0x388] sm:$0xf]  ;;  %v5558_v34 = vor.u32 %v7428_v22, %v5557_v21 }
 0x213   :  { %v7459_v43 = vld [vmem:[#allocation2 + $0x29c] sm:$0xf0]  ;;  %v5679_v46 = vld [vmem:[#allocation2 + $0x2a0] sm:$0xf0]  ;;  %v7492_v27 = vld [vmem:[#allocation2 + $0x3a4] sm:$0xf0] }
 0x214   :  { %v5678_v47 = vor.u32 %v7459_v43, %v5677_v40  ;;  %v5389_v49 = vld [vmem:[#allocation2 + $0x40] sm:$0xf]  ;;  %v5682_v52 = vor.u32 %v7455_v33, %v5679_v46  ;;  %v7383_v54 = vld [vmem:[#allocation2 + $0x44] sm:$0xf]  ;;  %1410 = vmatpush.bf16.msrb.mxu2 %v5422_v23  ;;  %1436 = vmatpush.bf16.msra.mxu0 %v5426_v48  ;;  %v7424_v28 = vld [vmem:[#allocation2 + $0x18c] sm:$0xf]  ;;  %v5814_v35 = vor.u32 %v7492_v27, %v5813_v24 }
 0x215   :  { %v7387_v50 = vld [vmem:[#allocation2 + $0x5c] sm:$0xf0]  ;;  %v5391_v55 = vld [vmem:[#allocation2 + $0x60] sm:$0xf0]  ;;  %v5559_v29 = vld [vmem:[#allocation2 + $0x1a8] sm:$0xf0] }
 0x216   :  { %v5645_v51 = vld [vmem:[#allocation2 + $0x240] sm:$0xf]  ;;  %v7447_v56 = vld [vmem:[#allocation2 + $0x244] sm:$0xf]  ;;  %v5390_v58 = vor.u32 %v7387_v50, %v5389_v49  ;;  %1423 = vmatpush.bf16.msrb.mxu3 %v5678_v47  ;;  %v5394_v62 = vor.u32 %v7383_v54, %v5391_v55  ;;  %1449 = vmatpush.bf16.msra.mxu1 %v5682_v52  ;;  %v7488_v31 = vld [vmem:[#allocation2 + $0x38c] sm:$0xf]  ;;  %v5562_v36 = vor.u32 %v7424_v28, %v5559_v29 }
 0x217   :  { %v7451_v53 = vld [vmem:[#allocation2 + $0x25c] sm:$0xf0]  ;;  %v5647_v57 = vld [vmem:[#allocation2 + $0x260] sm:$0xf0]  ;;  %v5815_v32 = vld [vmem:[#allocation2 + $0x3a8] sm:$0xf0] }
 0x218   :  { %v5357_v59 = vld [vmem:[#allocation2] sm:$0xf]  ;;  %v5646_v61 = vor.u32 %v7451_v53, %v5645_v51  ;;  %v7375_v1 = vld [vmem:[#allocation2 + $0x4] sm:$0xf]  ;;  %v5650_v2 = vor.u32 %v7447_v56, %v5647_v57  ;;  %1411 = vmatpush.bf16.msrb.mxu2 %v5390_v58  ;;  %1437 = vmatpush.bf16.msra.mxu0 %v5394_v62  ;;  %v5525_v38 = vld [vmem:[#allocation2 + $0x148] sm:$0xf]  ;;  %v5818_v41 = vor.u32 %v7488_v31, %v5815_v32 }
 0x219   :  { %v7379_v60 = vld [vmem:[#allocation2 + $0x1c] sm:$0xf0]  ;;  %v5359_v3 = vld [vmem:[#allocation2 + $0x20] sm:$0xf0]  ;;  %v7420_v37 = vld [vmem:[#allocation2 + $0x164] sm:$0xf0] }
 0x21a   :  { %v5613_v63 = vld [vmem:[#allocation2 + $0x200] sm:$0xf]  ;;  %v7439_v4 = vld [vmem:[#allocation2 + $0x204] sm:$0xf]  ;;  %v5358_v9 = vor.u32 %v7379_v60, %v5357_v59  ;;  %1424 = vmatpush.bf16.msrb.mxu3 %v5646_v61  ;;  %v5362_v14 = vor.u32 %v7375_v1, %v5359_v3  ;;  %1450 = vmatpush.bf16.msra.mxu1 %v5650_v2  ;;  %v5781_v40 = vld [vmem:[#allocation2 + $0x348] sm:$0xf]  ;;  %v5526_v46 = vor.u32 %v7420_v37, %v5525_v38 }
 0x21b   :  { %v7443_v0 = vld [vmem:[#allocation2 + $0x21c] sm:$0xf0]  ;;  %v5615_v5 = vld [vmem:[#allocation2 + $0x220] sm:$0xf0]  ;;  %v7484_v43 = vld [vmem:[#allocation2 + $0x364] sm:$0xf0] }
 0x21c   :  { %v5614_v13 = vor.u32 %v7443_v0, %v5613_v63  ;;  %v5618_v17 = vor.u32 %v7439_v4, %v5615_v5  ;;  %1412 = vmatpush.bf16.msrb.mxu2 %v5358_v9  ;;  %1438 = vmatpush.bf16.msra.mxu0 %v5362_v14  ;;  %v7416_v44 = vld [vmem:[#allocation2 + $0x14c] sm:$0xf]  ;;  %v5782_v23 = vor.u32 %v7484_v43, %v5781_v40  ;;  %v5493_v48 = vld [vmem:[#allocation2 + $0x108] sm:$0xf] }
 0x21d   :  { %v5527_v39 = vld [vmem:[#allocation2 + $0x168] sm:$0xf0]  ;;  %v7412_v49 = vld [vmem:[#allocation2 + $0x124] sm:$0xf0] }
 0x21e   :  { %1425 = vmatpush.bf16.msrb.mxu3 %v5614_v13  ;;  %1451 = vmatpush.bf16.msra.mxu1 %v5618_v17  ;;  %v7480_v45 = vld [vmem:[#allocation2 + $0x34c] sm:$0xf]  ;;  %v5530_v47 = vor.u32 %v7416_v44, %v5527_v39  ;;  %v5749_v50 = vld [vmem:[#allocation2 + $0x308] sm:$0xf]  ;;  %v5494_v57 = vor.u32 %v7412_v49, %v5493_v48  ;;  %v7501_v48 = vld [vmem:[#allocation2 + $0x3ec] sm:$0xf0] }
 0x21f   :  { %1413 = vmatmul.bf16.vlgmr.msrb.gmra.mxu2 %v8361_v26  ;;  %1439 = vmatmul.bf16.vlgmr.msra.gmra.mxu0 %v8361_v26  ;;  %v5783_v33 = vld [vmem:[#allocation2 + $0x368] sm:$0xf0]  ;;  %v7476_v52 = vld [vmem:[#allocation2 + $0x324] sm:$0xf0]  ;;  %v7433_v49 = vld [vmem:[#allocation2 + $0x1d4] sm:$0xf] }
 0x220   :  { %1457 = vmatpush.bf16.msra.mxu2 %v5590_v18  ;;  %1483 = vmatpush.bf16.msrb.mxu0 %v5594_v20  ;;  %v5786_v51 = vor.u32 %v7480_v45, %v5783_v33  ;;  %v7408_v53 = vld [vmem:[#allocation2 + $0x10c] sm:$0xf]  ;;  %v5750_v58 = vor.u32 %v7476_v52, %v5749_v50  ;;  %v5461_v60 = vld [vmem:[#allocation2 + $0xc8] sm:$0xf]  ;;  %v5597_v33 = vld [vmem:[#allocation2 + $0x1d0] sm:$0xf] }
 0x221   :  { %1426 = vmatmul.bf16.vlgmr.msrb.gmra.mxu3 %v8365_v30  ;;  %1452 = vmatmul.bf16.vlgmr.msra.gmra.mxu1 %v8365_v30  ;;  %v5495_v54 = vld [vmem:[#allocation2 + $0x128] sm:$0xf0]  ;;  %v7404_v61 = vld [vmem:[#allocation2 + $0xe4] sm:$0xf0]  ;;  %v5599_v50 = vld [vmem:[#allocation2 + $0x1f0] sm:$0xf0] }
 0x222   :  { %1470 = vmatpush.bf16.msra.mxu3 %v5846_v19  ;;  %1496 = vmatpush.bf16.msrb.mxu1 %v5850_v25  ;;  %v7472_v55 = vld [vmem:[#allocation2 + $0x30c] sm:$0xf]  ;;  %v5498_v59 = vor.u32 %v7408_v53, %v5495_v54  ;;  %v5717_v62 = vld [vmem:[#allocation2 + $0x2c8] sm:$0xf]  ;;  %v5462_v5 = vor.u32 %v7404_v61, %v5461_v60  ;;  %v7497_v53 = vld [vmem:[#allocation2 + $0x3d4] sm:$0xf] }
 0x223   :  { %v5751_v56 = vld [vmem:[#allocation2 + $0x328] sm:$0xf0]  ;;  %v7468_v0 = vld [vmem:[#allocation2 + $0x2e4] sm:$0xf0]  ;;  %v5855_v54 = vld [vmem:[#allocation2 + $0x3f0] sm:$0xf0] }
 0x224   :  { %1458 = vmatpush.bf16.msra.mxu2 %v5558_v34  ;;  %1484 = vmatpush.bf16.msrb.mxu0 %v5562_v36  ;;  %v5754_v63 = vor.u32 %v7472_v55, %v5751_v56  ;;  %v7400_v1 = vld [vmem:[#allocation2 + $0xcc] sm:$0xf]  ;;  %v5718_v6 = vor.u32 %v7468_v0, %v5717_v62  ;;  %v5429_v8 = vld [vmem:[#allocation2 + $0x88] sm:$0xf]  ;;  %v7429_v60 = vld [vmem:[#allocation2 + $0x1ac] sm:$0xf0]  ;;  %v5858_v62 = vor.u32 %v7497_v53, %v5855_v54 }
 0x225   :  { %v5463_v2 = vld [vmem:[#allocation2 + $0xe8] sm:$0xf0]  ;;  %v7396_v9 = vld [vmem:[#allocation2 + $0xa4] sm:$0xf0]  ;;  %v5821_v61 = vld [vmem:[#allocation2 + $0x390] sm:$0xf] }
 0x226   :  { %1471 = vmatpush.bf16.msra.mxu3 %v5814_v35  ;;  %1497 = vmatpush.bf16.msrb.mxu1 %v5818_v41  ;;  %v7464_v3 = vld [vmem:[#allocation2 + $0x2cc] sm:$0xf]  ;;  %v5466_v7 = vor.u32 %v7400_v1, %v5463_v2  ;;  %v5685_v10 = vld [vmem:[#allocation2 + $0x288] sm:$0xf]  ;;  %v5430_v17 = vor.u32 %v7396_v9, %v5429_v8  ;;  %v7425_v0 = vld [vmem:[#allocation2 + $0x194] sm:$0xf] }
 0x227   :  { %v5719_v4 = vld [vmem:[#allocation2 + $0x2e8] sm:$0xf0]  ;;  %v7460_v12 = vld [vmem:[#allocation2 + $0x2a4] sm:$0xf0]  ;;  %v5567_v1 = vld [vmem:[#allocation2 + $0x1b0] sm:$0xf0] }
 0x228   :  { %1459 = vmatpush.bf16.msra.mxu2 %v5526_v46  ;;  %1485 = vmatpush.bf16.msrb.mxu0 %v5530_v47  ;;  %v5722_v11 = vor.u32 %v7464_v3, %v5719_v4  ;;  %v7392_v13 = vld [vmem:[#allocation2 + $0x8c] sm:$0xf]  ;;  %v5686_v18 = vor.u32 %v7460_v12, %v5685_v10  ;;  %v5397_v20 = vld [vmem:[#allocation2 + $0x48] sm:$0xf]  ;;  %v7437_v46 = vld [vmem:[#allocation2 + $0x1ec] sm:$0xf0] }
 0x229   :  { %v5431_v14 = vld [vmem:[#allocation2 + $0xa8] sm:$0xf0]  ;;  %v7388_v21 = vld [vmem:[#allocation2 + $0x64] sm:$0xf0]  ;;  %v5598_v56 = vor.u32 %v7437_v46, %v5597_v33  ;;  %v7489_v2 = vld [vmem:[#allocation2 + $0x394] sm:$0xf] }
 0x22a   :  { %1472 = vmatpush.bf16.msra.mxu3 %v5782_v23  ;;  %1498 = vmatpush.bf16.msrb.mxu1 %v5786_v51  ;;  %v7456_v15 = vld [vmem:[#allocation2 + $0x28c] sm:$0xf]  ;;  %v5434_v19 = vor.u32 %v7392_v13, %v5431_v14  ;;  %v5653_v22 = vld [vmem:[#allocation2 + $0x248] sm:$0xf]  ;;  %v5398_v32 = vor.u32 %v7388_v21, %v5397_v20  ;;  %v5853_v23 = vld [vmem:[#allocation2 + $0x3d0] sm:$0xf] }
 0x22b   :  { %v5687_v16 = vld [vmem:[#allocation2 + $0x2a8] sm:$0xf0]  ;;  %v7452_v25 = vld [vmem:[#allocation2 + $0x264] sm:$0xf0]  ;;  %v5823_v3 = vld [vmem:[#allocation2 + $0x3b0] sm:$0xf0] }
 0x22c   :  { %1460 = vmatpush.bf16.msra.mxu2 %v5494_v57  ;;  %1486 = vmatpush.bf16.msrb.mxu0 %v5498_v59  ;;  %v5690_v24 = vor.u32 %v7456_v15, %v5687_v16  ;;  %v7384_v27 = vld [vmem:[#allocation2 + $0x4c] sm:$0xf]  ;;  %v5365_v34 = vld [vmem:[#allocation2 + $0x8] sm:$0xf]  ;;  %v5654_v36 = vor.u32 %v7452_v25, %v5653_v22  ;;  %v5854_v57 = vor.u32 %v7501_v48, %v5853_v23  ;;  %v5565_v59 = vld [vmem:[#allocation2 + $0x190] sm:$0xf] }
 0x22d   :  { %v5399_v28 = vld [vmem:[#allocation2 + $0x68] sm:$0xf0]  ;;  %v7380_v35 = vld [vmem:[#allocation2 + $0x24] sm:$0xf0]  ;;  %v5566_v4 = vor.u32 %v7429_v60, %v5565_v59  ;;  %v7421_v8 = vld [vmem:[#allocation2 + $0x16c] sm:$0xf0]  ;;  %v5826_v10 = vor.u32 %v7489_v2, %v5823_v3 }
 0x22e   :  { %1473 = vmatpush.bf16.msra.mxu3 %v5750_v58  ;;  %1499 = vmatpush.bf16.msrb.mxu1 %v5754_v63  ;;  %v7448_v29 = vld [vmem:[#allocation2 + $0x24c] sm:$0xf]  ;;  %v5402_v38 = vor.u32 %v7384_v27, %v5399_v28  ;;  %v5621_v37 = vld [vmem:[#allocation2 + $0x208] sm:$0xf]  ;;  %v5366_v47 = vor.u32 %v7380_v35, %v5365_v34  ;;  %v5602_v58 = vor.u32 %v7433_v49, %v5599_v50  ;;  %v7493_v63 = vld [vmem:[#allocation2 + $0x3ac] sm:$0xf0] }
 0x22f   :  { %v5655_v31 = vld [vmem:[#allocation2 + $0x268] sm:$0xf0]  ;;  %v7444_v40 = vld [vmem:[#allocation2 + $0x224] sm:$0xf0]  ;;  %v5789_v9 = vld [vmem:[#allocation2 + $0x350] sm:$0xf] }
 0x230   :  { %1461 = vmatpush.bf16.msra.mxu2 %v5462_v5  ;;  %1487 = vmatpush.bf16.msrb.mxu0 %v5466_v7  ;;  %v7376_v41 = vld [vmem:[#allocation2 + $0xc] sm:$0xf]  ;;  %v5658_v43 = vor.u32 %v7448_v29, %v5655_v31  ;;  %v5622_v51 = vor.u32 %v7444_v40, %v5621_v37  ;;  %v5822_v5 = vor.u32 %v7493_v63, %v5821_v61  ;;  %v5533_v7 = vld [vmem:[#allocation2 + $0x150] sm:$0xf]  ;;  %v7417_v12 = vld [vmem:[#allocation2 + $0x154] sm:$0xf] }
 0x231   :  { %v5367_v44 = vld [vmem:[#allocation2 + $0x28] sm:$0xf0]  ;;  %v5535_v13 = vld [vmem:[#allocation2 + $0x170] sm:$0xf0]  ;;  %v5534_v16 = vor.u32 %v7421_v8, %v5533_v7  ;;  %v7413_v20 = vld [vmem:[#allocation2 + $0x12c] sm:$0xf0] }
 0x232   :  { %1474 = vmatpush.bf16.msra.mxu3 %v5718_v6  ;;  %1500 = vmatpush.bf16.msrb.mxu1 %v5722_v11  ;;  %v7440_v39 = vld [vmem:[#allocation2 + $0x20c] sm:$0xf]  ;;  %v5370_v52 = vor.u32 %v7376_v41, %v5367_v44  ;;  %v5570_v6 = vor.u32 %v7425_v0, %v5567_v1  ;;  %v7485_v11 = vld [vmem:[#allocation2 + $0x36c] sm:$0xf0]  ;;  %v7481_v14 = vld [vmem:[#allocation2 + $0x354] sm:$0xf] }
 0x233   :  { %v5623_v45 = vld [vmem:[#allocation2 + $0x228] sm:$0xf0]  ;;  %v5791_v15 = vld [vmem:[#allocation2 + $0x370] sm:$0xf0]  ;;  %v5757_v21 = vld [vmem:[#allocation2 + $0x310] sm:$0xf] }
 0x234   :  { %1462 = vmatpush.bf16.msra.mxu2 %v5430_v17  ;;  %1488 = vmatpush.bf16.msrb.mxu0 %v5434_v19  ;;  %v5626_v55 = vor.u32 %v7440_v39, %v5623_v45  ;;  %v5790_v17 = vor.u32 %v7485_v11, %v5789_v9  ;;  %v5501_v19 = vld [vmem:[#allocation2 + $0x110] sm:$0xf]  ;;  %v5794_v22 = vor.u32 %v7481_v14, %v5791_v15  ;;  %v7409_v25 = vld [vmem:[#allocation2 + $0x114] sm:$0xf]  ;;  %v5605_v15 = vld [vmem:[#allocation2 + $0x1d8] sm:$0xf] }
 0x235   :  { %v5503_v27 = vld [vmem:[#allocation2 + $0x130] sm:$0xf0]  ;;  %v5502_v31 = vor.u32 %v7413_v20, %v5501_v19  ;;  %v5469_v35 = vld [vmem:[#allocation2 + $0xd0] sm:$0xf]  ;;  %v7502_v19 = vld [vmem:[#allocation2 + $0x3f4] sm:$0xf0] }
 0x236   :  { %1475 = vmatpush.bf16.msra.mxu3 %v5686_v18  ;;  %1501 = vmatpush.bf16.msrb.mxu1 %v5690_v24  ;;  %v5538_v18 = vor.u32 %v7417_v12, %v5535_v13  ;;  %v7477_v24 = vld [vmem:[#allocation2 + $0x32c] sm:$0xf0]  ;;  %v7473_v28 = vld [vmem:[#allocation2 + $0x314] sm:$0xf]  ;;  %v5506_v34 = vor.u32 %v7409_v25, %v5503_v27  ;;  %v7434_v20 = vld [vmem:[#allocation2 + $0x1dc] sm:$0xf] }
 0x237   :  { %v5759_v29 = vld [vmem:[#allocation2 + $0x330] sm:$0xf0]  ;;  %v7469_v40 = vld [vmem:[#allocation2 + $0x2ec] sm:$0xf0]  ;;  %v7498_v25 = vld [vmem:[#allocation2 + $0x3dc] sm:$0xf] }
 0x238   :  { %1463 = vmatpush.bf16.msra.mxu2 %v5398_v32  ;;  %1489 = vmatpush.bf16.msrb.mxu0 %v5402_v38  ;;  %v5758_v32 = vor.u32 %v7477_v24, %v5757_v21  ;;  %v5725_v38 = vld [vmem:[#allocation2 + $0x2d0] sm:$0xf]  ;;  %v5762_v37 = vor.u32 %v7473_v28, %v5759_v29  ;;  %v7401_v41 = vld [vmem:[#allocation2 + $0xd4] sm:$0xf]  ;;  %v5607_v21 = vld [vmem:[#allocation2 + $0x1f8] sm:$0xf0] }
 0x239   :  { %v7465_v44 = vld [vmem:[#allocation2 + $0x2d4] sm:$0xf]  ;;  %v5726_v33 = vor.u32 %v7469_v40, %v5725_v38  ;;  %v5437_v23 = vld [vmem:[#allocation2 + $0x90] sm:$0xf]  ;;  %v5863_v27 = vld [vmem:[#allocation2 + $0x3f8] sm:$0xf0] }
 0x23a   :  { %1476 = vmatpush.bf16.msra.mxu3 %v5654_v36  ;;  %1502 = vmatpush.bf16.msrb.mxu1 %v5658_v43  ;;  %v7405_v36 = vld [vmem:[#allocation2 + $0xec] sm:$0xf0]  ;;  %v5471_v43 = vld [vmem:[#allocation2 + $0xf0] sm:$0xf0]  ;;  %v5866_v38 = vor.u32 %v7498_v25, %v5863_v27  ;;  %v7426_v40 = vld [vmem:[#allocation2 + $0x19c] sm:$0xf] }
 0x23b   :  { %v5727_v39 = vld [vmem:[#allocation2 + $0x2f0] sm:$0xf0]  ;;  %v5470_v45 = vor.u32 %v7405_v36, %v5469_v35  ;;  %v5474_v46 = vor.u32 %v7401_v41, %v5471_v43  ;;  %v5693_v48 = vld [vmem:[#allocation2 + $0x290] sm:$0xf]  ;;  %v7430_v35 = vld [vmem:[#allocation2 + $0x1b4] sm:$0xf0] }
 0x23c   :  { %1464 = vmatpush.bf16.msra.mxu2 %v5366_v47  ;;  %1490 = vmatpush.bf16.msrb.mxu0 %v5370_v52  ;;  %v7397_v47 = vld [vmem:[#allocation2 + $0xac] sm:$0xf0]  ;;  %v5730_v49 = vor.u32 %v7465_v44, %v5727_v39  ;;  %v5439_v52 = vld [vmem:[#allocation2 + $0xb0] sm:$0xf0]  ;;  %v5829_v36 = vld [vmem:[#allocation2 + $0x398] sm:$0xf] }
 0x23d   :  { %v7461_v50 = vld [vmem:[#allocation2 + $0x2ac] sm:$0xf0]  ;;  %v7457_v53 = vld [vmem:[#allocation2 + $0x294] sm:$0xf]  ;;  %v5575_v41 = vld [vmem:[#allocation2 + $0x1b8] sm:$0xf0] }
 0x23e   :  { %1477 = vmatpush.bf16.msra.mxu3 %v5622_v51  ;;  %1503 = vmatpush.bf16.msrb.mxu1 %v5626_v55  ;;  %v7393_v51 = vld [vmem:[#allocation2 + $0x94] sm:$0xf]  ;;  %v5438_v55 = vor.u32 %v7397_v47, %v5437_v23  ;;  %v7389_v59 = vld [vmem:[#allocation2 + $0x6c] sm:$0xf0]  ;;  %v7490_v43 = vld [vmem:[#allocation2 + $0x39c] sm:$0xf] }
 0x23f   :  { %1465 = vmatmul.bf16.vlgmr.msra.gmra.mxu2 %v8361_v26  ;;  %1491 = vmatmul.bf16.vlgmr.msrb.gmra.mxu0 %v8361_v26  ;;  %v5695_v54 = vld [vmem:[#allocation2 + $0x2b0] sm:$0xf0]  ;;  %v5661_v60 = vld [vmem:[#allocation2 + $0x250] sm:$0xf]  ;;  %v5831_v44 = vld [vmem:[#allocation2 + $0x3b8] sm:$0xf0] }
 0x240   :  { %1509 = vmatpush.bf16.msrb.mxu2 %v5598_v56  ;;  %1535 = vmatpush.bf16.msra.mxu0 %v5602_v58  ;;  %v5694_v56 = vor.u32 %v7461_v50, %v5693_v48  ;;  %v5405_v58 = vld [vmem:[#allocation2 + $0x50] sm:$0xf]  ;;  %v5698_v61 = vor.u32 %v7457_v53, %v5695_v54  ;;  %v7385_v63 = vld [vmem:[#allocation2 + $0x54] sm:$0xf]  ;;  %v7422_v23 = vld [vmem:[#allocation2 + $0x174] sm:$0xf0]  ;;  %v5834_v48 = vor.u32 %v7490_v43, %v5831_v44 }
 0x241   :  { %1478 = vmatmul.bf16.vlgmr.msra.gmra.mxu3 %v8365_v30  ;;  %1504 = vmatmul.bf16.vlgmr.msrb.gmra.mxu1 %v8365_v30  ;;  %v5407_v0 = vld [vmem:[#allocation2 + $0x70] sm:$0xf0]  ;;  %v5406_v3 = vor.u32 %v7389_v59, %v5405_v58  ;;  %v5629_v8 = vld [vmem:[#allocation2 + $0x210] sm:$0xf]  ;;  %v5797_v47 = vld [vmem:[#allocation2 + $0x358] sm:$0xf] }
 0x242   :  { %1522 = vmatpush.bf16.msrb.mxu3 %v5854_v57  ;;  %1548 = vmatpush.bf16.msra.mxu1 %v5858_v62  ;;  %v5442_v57 = vor.u32 %v7393_v51, %v5439_v52  ;;  %v7453_v62 = vld [vmem:[#allocation2 + $0x26c] sm:$0xf0]  ;;  %v7449_v1 = vld [vmem:[#allocation2 + $0x254] sm:$0xf]  ;;  %v5410_v7 = vor.u32 %v7385_v63, %v5407_v0  ;;  %v7418_v50 = vld [vmem:[#allocation2 + $0x15c] sm:$0xf] }
 0x243   :  { %v5663_v2 = vld [vmem:[#allocation2 + $0x270] sm:$0xf0]  ;;  %v7445_v9 = vld [vmem:[#allocation2 + $0x22c] sm:$0xf0]  ;;  %v5543_v51 = vld [vmem:[#allocation2 + $0x178] sm:$0xf0] }
 0x244   :  { %1510 = vmatpush.bf16.msrb.mxu2 %v5566_v4  ;;  %1536 = vmatpush.bf16.msra.mxu0 %v5570_v6  ;;  %v5373_v4 = vld [vmem:[#allocation2 + $0x10] sm:$0xf]  ;;  %v5662_v6 = vor.u32 %v7453_v62, %v5661_v60  ;;  %v5666_v11 = vor.u32 %v7449_v1, %v5663_v2  ;;  %v5375_v12 = vld [vmem:[#allocation2 + $0x30] sm:$0xf0]  ;;  %v7482_v52 = vld [vmem:[#allocation2 + $0x35c] sm:$0xf] }
 0x245   :  { %v7441_v13 = vld [vmem:[#allocation2 + $0x214] sm:$0xf]  ;;  %v5799_v53 = vld [vmem:[#allocation2 + $0x378] sm:$0xf0]  ;;  %v7414_v58 = vld [vmem:[#allocation2 + $0x134] sm:$0xf0] }
 0x246   :  { %1523 = vmatpush.bf16.msrb.mxu3 %v5822_v5  ;;  %1549 = vmatpush.bf16.msra.mxu1 %v5826_v10  ;;  %v7381_v5 = vld [vmem:[#allocation2 + $0x2c] sm:$0xf0]  ;;  %v7377_v10 = vld [vmem:[#allocation2 + $0x14] sm:$0xf]  ;;  %v5765_v59 = vld [vmem:[#allocation2 + $0x318] sm:$0xf]  ;;  %v5802_v60 = vor.u32 %v7482_v52, %v5799_v53 }
 0x247   :  { %v5631_v14 = vld [vmem:[#allocation2 + $0x230] sm:$0xf0]  ;;  %v5378_v24 = vor.u32 %v7377_v10, %v5375_v12  ;;  %v7410_v62 = vld [vmem:[#allocation2 + $0x11c] sm:$0xf] }
 0x248   :  { %1511 = vmatpush.bf16.msrb.mxu2 %v5534_v16  ;;  %1537 = vmatpush.bf16.msra.mxu0 %v5538_v18  ;;  %v7438_v16 = vld [vmem:[#allocation2 + $0x1f4] sm:$0xf0]  ;;  %v5374_v18 = vor.u32 %v7381_v5, %v5373_v4  ;;  %v5634_v28 = vor.u32 %v7441_v13, %v5631_v14  ;;  %v5511_v63 = vld [vmem:[#allocation2 + $0x138] sm:$0xf0] }
 0x249   :  { %v5606_v29 = vor.u32 %v7438_v16, %v5605_v15  ;;  %v7474_v0 = vld [vmem:[#allocation2 + $0x31c] sm:$0xf]  ;;  %v5514_v4 = vor.u32 %v7410_v62, %v5511_v63  ;;  %v5477_v5 = vld [vmem:[#allocation2 + $0xd8] sm:$0xf] }
 0x24a   :  { %1524 = vmatpush.bf16.msrb.mxu3 %v5790_v17  ;;  %1550 = vmatpush.bf16.msra.mxu1 %v5794_v22  ;;  %v5861_v17 = vld [vmem:[#allocation2 + $0x3d8] sm:$0xf]  ;;  %v5630_v22 = vor.u32 %v7445_v9, %v5629_v8  ;;  %v5767_v1 = vld [vmem:[#allocation2 + $0x338] sm:$0xf0] }
 0x24b   :  { %v5770_v8 = vor.u32 %v7474_v0, %v5767_v1  ;;  %v7470_v9 = vld [vmem:[#allocation2 + $0x2f4] sm:$0xf0]  ;;  %v7402_v10 = vld [vmem:[#allocation2 + $0xdc] sm:$0xf] }
 0x24c   :  { %1512 = vmatpush.bf16.msrb.mxu2 %v5502_v31  ;;  %1538 = vmatpush.bf16.msra.mxu0 %v5506_v34  ;;  %v5862_v31 = vor.u32 %v7502_v19, %v5861_v17  ;;  %v5573_v34 = vld [vmem:[#allocation2 + $0x198] sm:$0xf]  ;;  %v7466_v12 = vld [vmem:[#allocation2 + $0x2dc] sm:$0xf] }
 0x24d   :  { %v5574_v39 = vor.u32 %v7430_v35, %v5573_v34  ;;  %v5735_v13 = vld [vmem:[#allocation2 + $0x2f8] sm:$0xf0]  ;;  %v5445_v17 = vld [vmem:[#allocation2 + $0x98] sm:$0xf] }
 0x24e   :  { %1525 = vmatpush.bf16.msrb.mxu3 %v5758_v32  ;;  %1551 = vmatpush.bf16.msra.mxu1 %v5762_v37  ;;  %v5610_v32 = vor.u32 %v7434_v20, %v5607_v21  ;;  %v7494_v37 = vld [vmem:[#allocation2 + $0x3b4] sm:$0xf0]  ;;  %v5738_v20 = vor.u32 %v7466_v12, %v5735_v13  ;;  %v7458_v25 = vld [vmem:[#allocation2 + $0x29c] sm:$0xf] }
 0x24f   :  { %v5701_v19 = vld [vmem:[#allocation2 + $0x298] sm:$0xf]  ;;  %v5703_v27 = vld [vmem:[#allocation2 + $0x2b8] sm:$0xf0] }
 0x250   :  { %1513 = vmatpush.bf16.msrb.mxu2 %v5470_v45  ;;  %1539 = vmatpush.bf16.msra.mxu0 %v5474_v46  ;;  %v5830_v45 = vor.u32 %v7494_v37, %v5829_v36  ;;  %v5541_v46 = vld [vmem:[#allocation2 + $0x158] sm:$0xf]  ;;  %v5706_v36 = vor.u32 %v7458_v25, %v5703_v27  ;;  %v7386_v37 = vld [vmem:[#allocation2 + $0x5c] sm:$0xf] }
 0x251   :  { %v5542_v54 = vor.u32 %v7422_v23, %v5541_v46  ;;  %v7462_v21 = vld [vmem:[#allocation2 + $0x2b4] sm:$0xf0]  ;;  %v5671_v43 = vld [vmem:[#allocation2 + $0x278] sm:$0xf0] }
 0x252   :  { %1526 = vmatpush.bf16.msrb.mxu3 %v5726_v33  ;;  %1552 = vmatpush.bf16.msra.mxu1 %v5730_v49  ;;  %v5578_v33 = vor.u32 %v7426_v40, %v5575_v41  ;;  %v7486_v49 = vld [vmem:[#allocation2 + $0x374] sm:$0xf0]  ;;  %v5415_v40 = vld [vmem:[#allocation2 + $0x78] sm:$0xf0] }
 0x253   :  { %v7390_v34 = vld [vmem:[#allocation2 + $0x74] sm:$0xf0]  ;;  %v7450_v41 = vld [vmem:[#allocation2 + $0x25c] sm:$0xf] }
 0x254   :  { %1514 = vmatpush.bf16.msrb.mxu2 %v5438_v55  ;;  %1540 = vmatpush.bf16.msra.mxu0 %v5442_v57  ;;  %v5798_v55 = vor.u32 %v7486_v49, %v5797_v47  ;;  %v5509_v57 = vld [vmem:[#allocation2 + $0x118] sm:$0xf]  ;;  %v5674_v47 = vor.u32 %v7450_v41, %v5671_v43  ;;  %v7378_v49 = vld [vmem:[#allocation2 + $0x1c] sm:$0xf] }
 0x255   :  { %v5510_v2 = vor.u32 %v7414_v58, %v5509_v57  ;;  %v5669_v35 = vld [vmem:[#allocation2 + $0x258] sm:$0xf]  ;;  %v5639_v52 = vld [vmem:[#allocation2 + $0x238] sm:$0xf0]  ;;  %v8386_v57 = vld [vmem:[%s8951_s9 + $0x4] sm:$0xff] }
 0x256   :  { %1527 = vmatpush.bf16.msrb.mxu3 %v5694_v56  ;;  %1553 = vmatpush.bf16.msra.mxu1 %v5698_v61  ;;  %v5546_v56 = vor.u32 %v7418_v50, %v5543_v51  ;;  %v7478_v61 = vld [vmem:[#allocation2 + $0x334] sm:$0xf0]  ;;  %v5383_v50 = vld [vmem:[#allocation2 + $0x38] sm:$0xf0]  ;;  %v750_v58 = vperm.slane %v8386_v57, 1  ;;  %v749_v62 = vperm.slane %v8386_v57, 0 }
 0x257   :  { %v7382_v46 = vld [vmem:[#allocation2 + $0x34] sm:$0xf0]  ;;  %v7442_v51 = vld [vmem:[#allocation2 + $0x21c] sm:$0xf] }
 0x258   :  { %1515 = vmatpush.bf16.msrb.mxu2 %v5406_v3  ;;  %1541 = vmatpush.bf16.msra.mxu0 %v5410_v7  ;;  %v5766_v3 = vor.u32 %v7478_v61, %v5765_v59  ;;  %v5733_v7 = vld [vmem:[#allocation2 + $0x2d8] sm:$0xf] }
 0x259   :  { %v5734_v15 = vor.u32 %v7470_v9, %v5733_v7  ;;  %v5637_v23 = vld [vmem:[#allocation2 + $0x218] sm:$0xf] }
 0x25a   :  { %1528 = vmatpush.bf16.msrb.mxu3 %v5662_v6  ;;  %1554 = vmatpush.bf16.msra.mxu1 %v5666_v11  ;;  %v7406_v6 = vld [vmem:[#allocation2 + $0xf4] sm:$0xf0]  ;;  %v5479_v11 = vld [vmem:[#allocation2 + $0xf8] sm:$0xf0] }
 0x25b   :  { %v5478_v14 = vor.u32 %v7406_v6, %v5477_v5  ;;  %v5482_v16 = vor.u32 %v7402_v10, %v5479_v11  ;;  %v752_v6 = vperm.slane %v8386_v57, 3  ;;  %v751_v10 = vperm.slane %v8386_v57, 2 }
 0x25c   :  { %1516 = vmatpush.bf16.msrb.mxu2 %v5374_v18  ;;  %1542 = vmatpush.bf16.msra.mxu0 %v5378_v24  ;;  %v7398_v18 = vld [vmem:[#allocation2 + $0xb4] sm:$0xf0]  ;;  %v5447_v24 = vld [vmem:[#allocation2 + $0xb8] sm:$0xf0] }
 0x25e   :  { %1529 = vmatpush.bf16.msrb.mxu3 %v5630_v22  ;;  %1555 = vmatpush.bf16.msra.mxu1 %v5634_v28  ;;  %v7394_v22 = vld [vmem:[#allocation2 + $0x9c] sm:$0xf]  ;;  %v5446_v28 = vor.u32 %v7398_v18, %v5445_v17 }
 0x25f   :  { %1517 = vmatmul.bf16.vlgmr.msrb.gmra.mxu2 %v8361_v26  ;;  %1543 = vmatmul.bf16.vlgmr.msra.gmra.mxu0 %v8361_v26 }
 0x260   :  { %1561 = vmatpush.bf16.msra.mxu2 %v5606_v29  ;;  %1587 = vmatpush.bf16.msrb.mxu0 %v5610_v32  ;;  %v5702_v29 = vor.u32 %v7462_v21, %v5701_v19  ;;  %v5413_v32 = vld [vmem:[#allocation2 + $0x58] sm:$0xf] }
 0x261   :  { %1530 = vmatmul.bf16.vlgmr.msrb.gmra.mxu3 %v8365_v30  ;;  %1556 = vmatmul.bf16.vlgmr.msra.gmra.mxu1 %v8365_v30  ;;  %v5414_v44 = vor.u32 %v7390_v34, %v5413_v32 }
 0x262   :  { %1574 = vmatpush.bf16.msra.mxu3 %v5862_v31  ;;  %1600 = vmatpush.bf16.msrb.mxu1 %v5866_v38  ;;  %v5450_v31 = vor.u32 %v7394_v22, %v5447_v24  ;;  %v7454_v38 = vld [vmem:[#allocation2 + $0x274] sm:$0xf0] }
 0x264   :  { %1562 = vmatpush.bf16.msra.mxu2 %v5574_v39  ;;  %1588 = vmatpush.bf16.msrb.mxu0 %v5578_v33  ;;  %v5670_v39 = vor.u32 %v7454_v38, %v5669_v35  ;;  %v5381_v33 = vld [vmem:[#allocation2 + $0x18] sm:$0xf]  ;;  %v754_v38 = vperm.slane %v8386_v57, 5 }
 0x265   :  { %v5382_v53 = vor.u32 %v7382_v46, %v5381_v33 }
 0x266   :  { %1575 = vmatpush.bf16.msra.mxu3 %v5830_v45  ;;  %1601 = vmatpush.bf16.msrb.mxu1 %v5834_v48  ;;  %v5418_v45 = vor.u32 %v7386_v37, %v5415_v40  ;;  %v7446_v48 = vld [vmem:[#allocation2 + $0x234] sm:$0xf0] }
 0x268   :  { %1563 = vmatpush.bf16.msra.mxu2 %v5542_v54  ;;  %1589 = vmatpush.bf16.msrb.mxu0 %v5546_v56  ;;  %v5638_v54 = vor.u32 %v7446_v48, %v5637_v23  ;;  %v5642_v56 = vor.u32 %v7442_v51, %v5639_v52  ;;  %v753_v23 = vperm.slane %v8386_v57, 4 }
 0x26a   :  { %1576 = vmatpush.bf16.msra.mxu3 %v5798_v55  ;;  %1602 = vmatpush.bf16.msrb.mxu1 %v5802_v60  ;;  %v5386_v55 = vor.u32 %v7378_v49, %v5383_v50 }
 0x26c   :  { %1564 = vmatpush.bf16.msra.mxu2 %v5510_v2  ;;  %1590 = vmatpush.bf16.msrb.mxu0 %v5514_v4 }
 0x26e   :  { %1577 = vmatpush.bf16.msra.mxu3 %v5766_v3  ;;  %1603 = vmatpush.bf16.msrb.mxu1 %v5770_v8 }
 0x270   :  { %1565 = vmatpush.bf16.msra.mxu2 %v5478_v14  ;;  %1591 = vmatpush.bf16.msrb.mxu0 %v5482_v16 }
 0x272   :  { %1578 = vmatpush.bf16.msra.mxu3 %v5734_v15  ;;  %1604 = vmatpush.bf16.msrb.mxu1 %v5738_v20 }
 0x274   :  { %1566 = vmatpush.bf16.msra.mxu2 %v5446_v28  ;;  %1592 = vmatpush.bf16.msrb.mxu0 %v5450_v31 }
 0x276   :  { %1579 = vmatpush.bf16.msra.mxu3 %v5702_v29  ;;  %1605 = vmatpush.bf16.msrb.mxu1 %v5706_v36 }
 0x278   :  { %1567 = vmatpush.bf16.msra.mxu2 %v5414_v44  ;;  %1593 = vmatpush.bf16.msrb.mxu0 %v5418_v45 }
 0x27a   :  { %1580 = vmatpush.bf16.msra.mxu3 %v5670_v39  ;;  %1606 = vmatpush.bf16.msrb.mxu1 %v5674_v47 }
 0x27c   :  { %1568 = vmatpush.bf16.msra.mxu2 %v5382_v53  ;;  %1594 = vmatpush.bf16.msrb.mxu0 %v5386_v55 }
 0x27e   :  { %1581 = vmatpush.bf16.msra.mxu3 %v5638_v54  ;;  %1607 = vmatpush.bf16.msrb.mxu1 %v5642_v56 }
 0x27f   :  { %1569 = vmatmul.bf16.vlgmr.msra.gmra.mxu2 %v8361_v26  ;;  %1595 = vmatmul.bf16.vlgmr.msrb.gmra.mxu0 %v8361_v26 }
 0x281   :  { %1582 = vmatmul.bf16.vlgmr.msra.gmra.mxu3 %v8365_v30  ;;  %1608 = vmatmul.bf16.vlgmr.msrb.gmra.mxu1 %v8365_v30 }
 0x29c   :  { %v1440_v59 = vpop.f32.mrf.mxu0 }
 0x29d   :  { %v1441_v60 = vadd.f32 %v1440_v59, %v750_v58 }
 0x29e   :  { %v1453_v61 = vpop.f32.mrf.mxu1 }
 0x29f   :  { %v1454_v63 = vadd.f32 %v1453_v61, %v1441_v60 }
 0x2a1   :  { %v8396_v22 = vmax.f32 %v1454_v63, 0.0 }
 0x2a2   :  { %v1414_v0 = vpop.f32.mrf.mxu2 }
 0x2a3   :  { %v1415_v1 = vadd.f32 %v1414_v0, %v749_v62  ;;  %v1627_v27 = vrot.slane %v8396_v22, 4 }
 0x2a4   :  { %v1427_v2 = vpop.f32.mrf.mxu3  ;;  %v1442_v26 = vpop.f32.mrf.mxu0 }
 0x2a5   :  { %v1428_v3 = vadd.f32 %v1427_v2, %v1415_v1  ;;  %v1628_v32 = vadd.f32 %v1627_v27, %v8396_v22 }
 0x2a6   :  { %v1455_v4 = vpop.f32.mrf.mxu1 }
 0x2a7   :  { %v8401_v28 = vmax.f32 %v1428_v3, 0.0  ;;  %v1629_v37 = vrot.slane %v1628_v32, 2 }
 0x2a9   :  { %v1621_v34 = vrot.slane %v8401_v28, 4  ;;  %v1630_v33 = vadd.f32 %v1629_v37, %v1628_v32 }
 0x2aa   :  { %v1416_v30 = vpop.f32.mrf.mxu2 }
 0x2ab   :  { %v1622_v40 = vadd.f32 %v1621_v34, %v8401_v28  ;;  %v1631_v52 = vrot.slane %v1630_v33, 1 }
 0x2ac   :  { %v1429_v5 = vpop.f32.mrf.mxu3 }
 0x2ad   :  { %v1623_v46 = vrot.slane %v1622_v40, 2  ;;  %v1632_v0 = vadd.f32 %v1631_v52, %v1630_v33 }
 0x2af   :  { %v1624_v53 = vadd.f32 %v1623_v46, %v1622_v40 }
 0x2b1   :  { %v1625_v1 = vrot.slane %v1624_v53, 1 }
 0x2bc   :  { %v1492_v7 = vpop.f32.mrf.mxu0 }
 0x2bd   :  { %v1493_v8 = vadd.f32 %v1492_v7, %v752_v6  ;;  %v8424_v7 = vmul.f32 %v1632_v0, %v8341_v42 }
 0x2be   :  { %v1505_v9 = vpop.f32.mrf.mxu1 }
 0x2bf   :  { %v1506_v11 = vadd.f32 %v1505_v9, %v1493_v8  ;;  %v1626_v8 = vadd.f32 %v1625_v1, %v1624_v53 }
 0x2c1   :  { %v8394_v20 = vmax.f32 %v1506_v11, 0.0 }
 0x2c2   :  { %v1466_v12 = vpop.f32.mrf.mxu2 }
 0x2c3   :  { %v1467_v13 = vadd.f32 %v1466_v12, %v751_v10  ;;  %v1639_v25 = vrot.slane %v8394_v20, 4 }
 0x2c4   :  { %v1479_v14 = vpop.f32.mrf.mxu3  ;;  %v1494_v15 = vpop.f32.mrf.mxu0 }
 0x2c5   :  { %v1480_v16 = vadd.f32 %v1479_v14, %v1467_v13  ;;  %v1640_v31 = vadd.f32 %v1639_v25, %v8394_v20 }
 0x2c6   :  { %v1507_v17 = vpop.f32.mrf.mxu1 }
 0x2c7   :  { %v8392_v18 = vmax.f32 %v1480_v16, 0.0  ;;  %v1641_v36 = vrot.slane %v1640_v31, 2  ;;  %v1678_v16 = vsub.f32 %v8396_v22, %v8424_v7  ;;  %v8434_v17 = vmul.f32 %v1626_v8, %v8341_v42 }
 0x2c9   :  { %v1633_v24 = vrot.slane %v8392_v18, 4  ;;  %v1642_v43 = vadd.f32 %v1641_v36, %v1640_v31  ;;  %v1686_v31 = vmul.f32 %v1678_v16, %v1678_v16  ;;  %v1677_v32 = vsub.f32 %v8401_v28, %v8434_v17 }
 0x2ca   :  { %v1468_v19 = vpop.f32.mrf.mxu2 }
 0x2cb   :  { %v1634_v29 = vadd.f32 %v1633_v24, %v8392_v18  ;;  %v1643_v49 = vrot.slane %v1642_v43, 1  ;;  %v1699_v40 = vrot.slane %v1686_v31, 4 }
 0x2cc   :  { %v1481_v21 = vpop.f32.mrf.mxu3 }
 0x2cd   :  { %v1635_v35 = vrot.slane %v1634_v29, 2  ;;  %v1644_v59 = vadd.f32 %v1643_v49, %v1642_v43 }
 0x2cf   :  { %v1636_v41 = vadd.f32 %v1635_v35, %v1634_v29  ;;  %v8420_v4 = vmul.f32 %v1644_v59, %v8341_v42 }
 0x2d1   :  { %v1637_v47 = vrot.slane %v1636_v41, 1  ;;  %v1680_v13 = vsub.f32 %v8394_v20, %v8420_v4 }
 0x2d3   :  { %v1638_v56 = vadd.f32 %v1637_v47, %v1636_v41  ;;  %v1688_v25 = vmul.f32 %v1680_v13, %v1680_v13  ;;  %v1685_v41 = vmul.f32 %v1677_v32, %v1677_v32  ;;  %v1700_v47 = vadd.f32 %v1699_v40, %v1686_v31 }
 0x2d5   :  { %v8417_v3 = vmul.f32 %v1638_v56, %v8341_v42  ;;  %v1711_v36 = vrot.slane %v1688_v25, 4 }
 0x2d7   :  { %v1679_v11 = vsub.f32 %v8392_v18, %v8417_v3 }
 0x2d9   :  { %v1687_v21 = vmul.f32 %v1679_v11, %v1679_v11 }
 0x2db   :  { %v1705_v35 = vrot.slane %v1687_v21, 4 }
 0x2dc   :  { %v1544_v44 = vpop.f32.mrf.mxu0 }
 0x2dd   :  { %v1545_v39 = vadd.f32 %v1544_v44, %v754_v38  ;;  %v756_v44 = vperm.slane %v8386_v57, 7 }
 0x2de   :  { %v1557_v45 = vpop.f32.mrf.mxu1 }
 0x2df   :  { %v1558_v48 = vadd.f32 %v1557_v45, %v1545_v39  ;;  %v1706_v39 = vadd.f32 %v1705_v35, %v1687_v21  ;;  %v1712_v45 = vadd.f32 %v1711_v36, %v1688_v25 }
 0x2e1   :  { %v8410_v50 = vmax.f32 %v1558_v48, 0.0  ;;  %v1693_v48 = vrot.slane %v1685_v41, 4  ;;  %v1707_v53 = vrot.slane %v1706_v39, 2 }
 0x2e2   :  { %v1518_v51 = vpop.f32.mrf.mxu2 }
 0x2e3   :  { %v1519_v54 = vadd.f32 %v1518_v51, %v753_v23  ;;  %v1651_v58 = vrot.slane %v8410_v50, 4  ;;  %v1708_v0 = vadd.f32 %v1707_v53, %v1706_v39 }
 0x2e4   :  { %v1531_v55 = vpop.f32.mrf.mxu3  ;;  %v1546_v61 = vpop.f32.mrf.mxu0 }
 0x2e5   :  { %v1532_v60 = vadd.f32 %v1531_v55, %v1519_v54  ;;  %v1652_v62 = vadd.f32 %v1651_v58, %v8410_v50  ;;  %v755_v54 = vperm.slane %v8386_v57, 6  ;;  %v1713_v55 = vrot.slane %v1712_v45, 2 }
 0x2e6   :  { %v1559_v63 = vpop.f32.mrf.mxu1  ;;  %v1694_v61 = vadd.f32 %v1693_v48, %v1685_v41 }
 0x2e7   :  { %v8414_v2 = vmax.f32 %v1532_v60, 0.0  ;;  %v1653_v26 = vrot.slane %v1652_v62, 2  ;;  %v1701_v60 = vrot.slane %v1700_v47, 2 }
 0x2e8   :  { %v1695_v11 = vrot.slane %v1694_v61, 2 }
 0x2e9   :  { %v1645_v30 = vrot.slane %v8414_v2, 4  ;;  %v1654_v5 = vadd.f32 %v1653_v26, %v1652_v62  ;;  %v1702_v57 = vadd.f32 %v1701_v60, %v1700_v47 }
 0x2ea   :  { %v1520_v6 = vpop.f32.mrf.mxu2  ;;  %v1696_v31 = vadd.f32 %v1695_v11, %v1694_v61 }
 0x2eb   :  { %v1646_v9 = vadd.f32 %v1645_v30, %v8414_v2  ;;  %v1655_v12 = vrot.slane %v1654_v5, 1 }
 0x2ec   :  { %v1533_v10 = vpop.f32.mrf.mxu3 }
 0x2ed   :  { %v1647_v14 = vrot.slane %v1646_v9, 2  ;;  %v1656_v15 = vadd.f32 %v1655_v12, %v1654_v5  ;;  %v1714_v5 = vadd.f32 %v1713_v55, %v1712_v45 }
 0x2ef   :  { %v1648_v19 = vadd.f32 %v1647_v14, %v1646_v9  ;;  %v8437_v24 = vmul.f32 %v1656_v15, %v8341_v42  ;;  %v1709_v14 = vrot.slane %v1708_v0, 1 }
 0x2f1   :  { %v1649_v27 = vrot.slane %v1648_v19, 1  ;;  %v1682_v29 = vsub.f32 %v8410_v50, %v8437_v24  ;;  %v1710_v35 = vadd.f32 %v1709_v14, %v1708_v0 }
 0x2f3   :  { %v1650_v34 = vadd.f32 %v1649_v27, %v1648_v19  ;;  %v1690_v37 = vmul.f32 %v1682_v29, %v1682_v29  ;;  %v1715_v19 = vrot.slane %v1714_v5, 1  ;;  %v1703_v29 = vrot.slane %v1702_v57, 1 }
 0x2f5   :  { %v8444_v38 = vmul.f32 %v1650_v34, %v8341_v42  ;;  %v1723_v46 = vrot.slane %v1690_v37, 4  ;;  %v1716_v41 = vadd.f32 %v1715_v19, %v1714_v5  ;;  %v1704_v45 = vadd.f32 %v1703_v29, %v1702_v57 }
 0x2f7   :  { %v1681_v43 = vsub.f32 %v8414_v2, %v8444_v38  ;;  %v1724_v59 = vadd.f32 %v1723_v46, %v1690_v37 }
 0x2f9   :  { %v1689_v33 = vmul.f32 %v1681_v43, %v1681_v43  ;;  %v1725_v8 = vrot.slane %v1724_v59, 2 }
 0x2fb   :  { %v1717_v49 = vrot.slane %v1689_v33, 4  ;;  %v1726_v25 = vadd.f32 %v1725_v8, %v1724_v59 }
 0x2fc   :  { %v1596_v23 = vpop.f32.mrf.mxu0 }
 0x2fd   :  { %v1597_v51 = vadd.f32 %v1596_v23, %v756_v44  ;;  %v1718_v56 = vadd.f32 %v1717_v49, %v1689_v33  ;;  %v1727_v44 = vrot.slane %v1726_v25, 1  ;;  %v1697_v33 = vrot.slane %v1696_v31, 1 }
 0x2fe   :  { %v1609_v52 = vpop.f32.mrf.mxu1  ;;  %v1743_v23 = vmul.f32 %v1710_v35, %v8341_v42  ;;  %v1744_v49 = vmul.f32 %v1716_v41, %v8341_v42 }
 0x2ff   :  { %v1610_v58 = vadd.f32 %v1609_v52, %v1597_v51  ;;  %v1719_v1 = vrot.slane %v1718_v56, 2  ;;  %v1728_v52 = vadd.f32 %v1727_v44, %v1726_v25  ;;  %v1698_v55 = vadd.f32 %v1697_v33, %v1696_v31 }
 0x300   :  { %v8469_v61 = vadd.f32 1e-05, %v1744_v49 }
 0x301   :  { %v8450_v62 = vmax.f32 %v1610_v58, 0.0  ;;  %v1720_v15 = vadd.f32 %v1719_v1, %v1718_v56  ;;  %v8466_v58 = vadd.f32 1e-05, %v1743_v23  ;;  %v1746_v0 = vmul.f32 %v1728_v52, %v8341_v42 }
 0x302   :  { %v1570_v63 = vpop.f32.mrf.mxu2  ;;  %vm1794_vm0 = vweird.f32 %v8469_v61 }
 0x303   :  { %v1571_v26 = vadd.f32 %v1570_v63, %v755_v54  ;;  %v1663_v6 = vrot.slane %v8450_v62, 4  ;;  %v1721_v36 = vrot.slane %v1720_v15, 1  ;;  %v1742_v54 = vmul.f32 %v1704_v45, %v8341_v42 }
 0x304   :  { %v1583_v30 = vpop.f32.mrf.mxu3  ;;  %v1598_v10 = vpop.f32.mrf.mxu0  ;;  %7903 = vrsqrt.f32 %v8466_v58  ;;  %vm1784_vm14 = vweird.f32 %v8466_v58 }
 0x305   :  { %v1584_v9 = vadd.f32 %v1583_v30, %v1571_v26  ;;  %v1664_v12 = vadd.f32 %v1663_v6, %v8450_v62  ;;  %v1722_v47 = vadd.f32 %v1721_v36, %v1720_v15  ;;  %v8475_v26 = vadd.f32 1e-05, %v1742_v54 }
 0x306   :  { %v1611_v13 = vpop.f32.mrf.mxu1  ;;  %v1741_v30 = vmul.f32 %v1698_v55, %v8341_v42  ;;  %7905 = vrsqrt.f32 %v8469_v61  ;;  %v8484_v10 = vadd.f32 1e-05, %v1746_v0 }
 0x307   :  { %v8454_v16 = vmax.f32 %v1584_v9, 0.0  ;;  %v1665_v21 = vrot.slane %v1664_v12, 2  ;;  %v1745_v59 = vmul.f32 %v1722_v47, %v8341_v42  ;;  %7907 = vrsqrt.f32 %v8475_v26 }
 0x308   :  { %v8487_v11 = vadd.f32 1e-05, %v1741_v30  ;;  %vm1774_vm2 = vweird.f32 %v8475_v26 }
 0x309   :  { %v1657_v27 = vrot.slane %v8454_v16, 4  ;;  %v1666_v32 = vadd.f32 %v1665_v21, %v1664_v12  ;;  %v8479_v6 = vadd.f32 1e-05, %v1745_v59 }
 0x30a   :  { %v1572_v34 = vpop.f32.mrf.mxu2  ;;  %v8490_v15 = vpop.eup %7903  ;;  %vm1764_vm3 = vweird.f32 %v8487_v11 }
 0x30b   :  { %v1658_v37 = vadd.f32 %v1657_v27, %v8454_v16  ;;  %v1667_v43 = vrot.slane %v1666_v32, 1  ;;  %7909 = vrsqrt.f32 %v8479_v6  ;;  %v1779_v31 = vmul.f32 %v8490_v15, %v8466_v58 }
 0x30c   :  { %v1585_v40 = vpop.f32.mrf.mxu3  ;;  %7911 = vrsqrt.f32 %v8484_v10  ;;  %v8493_v21 = vpop.eup %7905  ;;  %vm1785_vm15 = vweird.f32 %v8490_v15  ;;  %vm1804_vm10 = vweird.f32 %v8479_v6 }
 0x30d   :  { %v1659_v39 = vrot.slane %v1658_v37, 2  ;;  %v1668_v46 = vadd.f32 %v1667_v43, %v1666_v32  ;;  %7913 = vrsqrt.f32 %v8487_v11  ;;  %v8496_v29 = vpop.eup %7907  ;;  %v1789_v35 = vmul.f32 %v8493_v21, %v8469_v61  ;;  %vm8548_vm5 = vmor %vm1784_vm14, %vm1785_vm15 }
 0x30e   :  { %v1769_v41 = vmul.f32 %v8496_v29, %v8475_v26  ;;  %vm1795_vm1 = vweird.f32 %v8493_v21  ;;  %vm1775_vm4 = vweird.f32 %v8496_v29  ;;  %vm1814_vm14 = vweird.f32 %v8484_v10 }
 0x30f   :  { %v1660_v48 = vadd.f32 %v1659_v39, %v1658_v37  ;;  %v8461_v51 = vmul.f32 %v1668_v46, %v8341_v42  ;;  %v1780_v39 = vmul.f32 %v8490_v15, %v1779_v31  ;;  %v1790_v46 = vmul.f32 %v8493_v21, %v1789_v35  ;;  %vm8552_vm6 = vmor %vm1794_vm0, %vm1795_vm1 }
 0x310   :  { %vm8569_vm11 = vmor %vm1774_vm2, %vm1775_vm4  ;;  %vm1854_vm4 = vcmask 1042434  }
 0x311   :  { %v1661_v53 = vrot.slane %v1660_v48, 1  ;;  %v1684_v56 = vsub.f32 %v8450_v62, %v8461_v51  ;;  %v8500_v34 = vpop.eup %7909  ;;  %v1791_v55 = vmul.f32 0.5, %v1790_v46 }
 0x312   :  { %v8505_v40 = vpop.eup %7911  ;;  %v1799_v45 = vmul.f32 %v8500_v34, %v8479_v6  ;;  %vm1805_vm7 = vweird.f32 %v8500_v34 }
 0x313   :  { %v1662_v60 = vadd.f32 %v1661_v53, %v1660_v48  ;;  %v1692_v63 = vmul.f32 %v1684_v56, %v1684_v56  ;;  %v8509_v44 = vpop.eup %7913  ;;  %v1809_v47 = vmul.f32 %v8505_v40, %v8484_v10  ;;  %v1770_v48 = vmul.f32 %v8496_v29, %v1769_v41  ;;  %vm8583_vm15 = vmor %vm1804_vm10, %vm1805_vm7 }
 0x314   :  { %v1759_v49 = vmul.f32 %v8509_v44, %v8487_v11  ;;  %v1781_v53 = vmul.f32 0.5, %v1780_v39  ;;  %v1800_v54 = vmul.f32 %v8500_v34, %v1799_v45  ;;  %vm1765_vm8 = vweird.f32 %v8509_v44 }
 0x315   :  { %v8473_v1 = vmul.f32 %v1662_v60, %v8341_v42  ;;  %v1735_v5 = vrot.slane %v1692_v63, 4  ;;  %v1810_v59 = vmul.f32 %v8505_v40, %v1809_v47  ;;  %v1771_v60 = vmul.f32 0.5, %v1770_v48 }
 0x316   :  { %v1782_v30 = vsub.f32 1.5, %v1781_v53  ;;  %vm1815_vm9 = vweird.f32 %v8505_v40  ;;  %vm1860_vm10 = vcmask 1046534  }
 0x317   :  { %v1683_v8 = vsub.f32 %v8454_v16, %v8473_v1  ;;  %v1736_v9 = vadd.f32 %v1735_v5, %v1692_v63  ;;  %v1760_v63 = vmul.f32 %v8509_v44, %v1759_v49  ;;  %v1801_v5 = vmul.f32 0.5, %v1800_v54  ;;  %vm8587_vm0 = vmor %vm1814_vm14, %vm1815_vm9 }
 0x318   :  { %vm1858_vm9 = vcmask 1044484  }
 0x319   :  { %v1691_v57 = vmul.f32 %v1683_v8, %v1683_v8  ;;  %v1737_v12 = vrot.slane %v1736_v9, 2  ;;  %v1792_v8 = vsub.f32 1.5, %v1791_v55 }
 0x31b   :  { %v1729_v13 = vrot.slane %v1691_v57, 4  ;;  %v1738_v14 = vadd.f32 %v1737_v12, %v1736_v9  ;;  %v1772_v12 = vsub.f32 1.5, %v1771_v60  ;;  %v1793_v31 = vmul.f32 %v8493_v21, %v1792_v8 }
 0x31d   :  { %v1730_v19 = vadd.f32 %v1729_v13, %v1691_v57  ;;  %v1739_v25 = vrot.slane %v1738_v14, 1  ;;  %v1811_v57 = vmul.f32 0.5, %v1810_v59  ;;  %v1761_v13 = vmul.f32 0.5, %v1760_v63 }
 0x31e   :  { %v1797_v58 = vsel %vm8552_vm6, %v8493_v21, %v1793_v31  ;;  %vm8603_vm6 = vmor %vm1764_vm3, %vm1765_vm8  ;;  %vm1856_vm8 = vcmask 1041408  }
 0x31f   :  { %v1731_v27 = vrot.slane %v1730_v19, 2  ;;  %v1740_v32 = vadd.f32 %v1739_v25, %v1738_v14  ;;  %v1802_v25 = vsub.f32 1.5, %v1801_v5  ;;  %v1812_v35 = vsub.f32 1.5, %v1811_v57 }
 0x320   :  { %v1762_v41 = vsub.f32 1.5, %v1761_v13  ;;  %v1848_v55 = vrot.slane %v1797_v58, 5 }
 0x321   :  { %v1732_v36 = vadd.f32 %v1731_v27, %v1730_v19  ;;  %v1748_v37 = vmul.f32 %v1740_v32, %v8341_v42  ;;  %v1783_v19 = vmul.f32 %v8490_v15, %v1782_v30  ;;  %v1803_v46 = vmul.f32 %v8500_v34, %v1802_v25 }
 0x323   :  { %v1733_v43 = vrot.slane %v1732_v36, 1  ;;  %v8514_v33 = vadd.f32 1e-05, %v1748_v37  ;;  %v1773_v37 = vmul.f32 %v8496_v29, %v1772_v12  ;;  %v1787_v45 = vsel %vm8548_vm5, %v8490_v15, %v1783_v19 }
 0x324   :  { %v1813_v15 = vmul.f32 %v8505_v40, %v1812_v35  ;;  %v1847_v6 = vrot.slane %v1787_v45, 6  ;;  %v1807_v54 = vsel %vm8583_vm15, %v8500_v34, %v1803_v46 }
 0x325   :  { %v1734_v23 = vadd.f32 %v1733_v43, %v1732_v36  ;;  %7915 = vrsqrt.f32 %v8514_v33  ;;  %v1777_v21 = vsel %vm8569_vm11, %v8496_v29, %v1773_v37  ;;  %vm1834_vm1 = vweird.f32 %v8514_v33 }
 0x326   :  { %v1817_v34 = vsel %vm8587_vm0, %v8505_v40, %v1813_v15  ;;  %v1846_v63 = vrot.slane %v1777_v21, 7  ;;  %v1849_v30 = vrot.slane %v1807_v54, 4  ;;  %v1855_v5 = vsel %vm1854_vm4, %v1847_v6, %v1848_v55 }
 0x327   :  { %v1747_v52 = vmul.f32 %v1734_v23, %v8341_v42  ;;  %v1850_v40 = vrot.slane %v1817_v34, 3  ;;  %vm1862_vm11 = vcmask 1045508  }
 0x329   :  { %v8525_v56 = vadd.f32 1e-05, %v1747_v52  ;;  %v1763_v52 = vmul.f32 %v8509_v44, %v1762_v41  ;;  %v1859_v12 = vsel %vm1858_vm9, %v1849_v30, %v1850_v40 }
 0x32b   :  { %7917 = vrsqrt.f32 %v8525_v56  ;;  %v8530_v0 = vpop.eup %7915  ;;  %vm1824_vm7 = vweird.f32 %v8525_v56  ;;  %v1767_v11 = vsel %vm8603_vm6, %v8509_v44, %v1763_v52 }
 0x32c   :  { %v1829_v9 = vmul.f32 %v8530_v0, %v8514_v33  ;;  %vm1835_vm13 = vweird.f32 %v8530_v0 }
 0x32d   :  { %vm8595_vm5 = vmor %vm1834_vm1, %vm1835_vm13  ;;  %vm1864_vm13 = vcmask 1043456  }
 0x32e   :  { %v1830_v14 = vmul.f32 %v8530_v0, %v1829_v9 }
 0x330   :  { %v1831_v32 = vmul.f32 0.5, %v1830_v14 }
 0x331   :  { %v7918_v27 = vpop.eup %7917 }
 0x332   :  { %v1819_v36 = vmul.f32 %v7918_v27, %v8525_v56  ;;  %v1832_v61 = vsub.f32 1.5, %v1831_v32  ;;  %vm1825_vm2 = vweird.f32 %v7918_v27  ;;  %v1853_v56 = vsel %vm584_vm12, %v1767_v11, %v1846_v63 }
 0x333   :  { %vm1826_vm3 = vmor %vm1824_vm7, %vm1825_vm2  ;;  %v1857_v13 = vsel %vm1856_vm8, %v1853_v56, %v1855_v5 }
 0x334   :  { %v1820_v23 = vmul.f32 %v7918_v27, %v1819_v36  ;;  %v1833_v48 = vmul.f32 %v8530_v0, %v1832_v61 }
 0x336   :  { %v1821_v49 = vmul.f32 0.5, %v1820_v23  ;;  %v1837_v33 = vsel %vm8595_vm5, %v8530_v0, %v1833_v48  ;;  %v1749_v0 = vld [vmem:[#allocation14 + $0x2] sm:$0xff] }
 0x337   :  { %v1852_v9 = vrot.slane %v1837_v33, 1 }
 0x338   :  { %v1822_v29 = vsub.f32 1.5, %v1821_v49 }
 0x33a   :  { %v1823_v60 = vmul.f32 %v7918_v27, %v1822_v29 }
 0x33c   :  { %v1827_v8 = vsel %vm1826_vm3, %v7918_v27, %v1823_v60 }
 0x33d   :  { %v1851_v57 = vrot.slane %v1827_v8, 2 }
 0x33f   :  { %v1861_v44 = vsel %vm1860_vm10, %v1851_v57, %v1852_v9 }
 0x340   :  { %v1863_v14 = vsel %vm1862_vm11, %v1859_v12, %v1861_v44 }
 0x341   :  { %v1865_v19 = vsel %vm1864_vm13, %v1857_v13, %v1863_v14 }
 0x342   :  { %v1867_v25 = vmul.f32 %v1865_v19, %v1749_v0 }
 0x344   :  { %v1870_v27 = vperm.slane %v1867_v25, 0  ;;  %v1871_v31 = vperm.slane %v1867_v25, 1  ;;  %v1872_v32 = vperm.slane %v1867_v25, 2  ;;  %v1873_v35 = vperm.slane %v1867_v25, 3 }
 0x345   :  { %v1874_v36 = vperm.slane %v1867_v25, 4  ;;  %v1875_v37 = vperm.slane %v1867_v25, 5  ;;  %v1876_v41 = vperm.slane %v1867_v25, 6  ;;  %v1877_v43 = vperm.slane %v1867_v25, 7 }
 0x346   :  { %v1887_v61 = vmul.f32 %v1871_v31, %v8424_v7  ;;  %v1888_v39 = vmul.f32 %v1872_v32, %v8417_v3  ;;  %v1889_v45 = vmul.f32 %v1873_v35, %v8420_v4  ;;  %v1886_v15 = vmul.f32 %v1870_v27, %v8434_v17 }
 0x347   :  { %v1890_v46 = vmul.f32 %v1874_v36, %v8444_v38  ;;  %v1891_v23 = vmul.f32 %v1875_v37, %v8437_v24  ;;  %v1892_v58 = vmul.f32 %v1876_v41, %v8473_v1  ;;  %v1893_v47 = vmul.f32 %v1877_v43, %v8461_v51  ;;  %v1868_v38 = vld [vmem:[#allocation16 + $0x2] sm:$0xff] }
 0x348   :  { %v1902_v48 = vrot.slane %v1887_v61, 7  ;;  %v1903_v49 = vrot.slane %v1888_v39, 6  ;;  %v1904_v21 = vrot.slane %v1889_v45, 5  ;;  %v1918_v54 = vmul.f32 %v1870_v27, %v8401_v28 }
 0x349   :  { %v1905_v52 = vrot.slane %v1890_v46, 4  ;;  %v1906_v6 = vrot.slane %v1891_v23, 3  ;;  %v1907_v7 = vrot.slane %v1892_v58, 2  ;;  %v1908_v26 = vrot.slane %v1893_v47, 1 }
 0x34a   :  { %v1909_v3 = vsel %vm584_vm12, %v1886_v15, %v1902_v48  ;;  %v1910_v4 = vsel %vm1854_vm4, %v1903_v49, %v1904_v21  ;;  %v1919_v55 = vmul.f32 %v1871_v31, %v8396_v22  ;;  %v1920_v10 = vmul.f32 %v1872_v32, %v8392_v18 }
 0x34b   :  { %v1911_v24 = vsel %vm1856_vm8, %v1909_v3, %v1910_v4  ;;  %v1912_v1 = vsel %vm1858_vm9, %v1905_v52, %v1906_v6  ;;  %v1913_v51 = vsel %vm1860_vm10, %v1907_v7, %v1908_v26  ;;  %v1921_v59 = vmul.f32 %v1873_v35, %v8394_v20 }
 0x34c   :  { %v1914_v17 = vsel %vm1862_vm11, %v1912_v1, %v1913_v51  ;;  %v1922_v34 = vmul.f32 %v1874_v36, %v8414_v2  ;;  %v1923_v33 = vmul.f32 %v1875_v37, %v8410_v50  ;;  %v1924_v60 = vmul.f32 %v1876_v41, %v8454_v16 }
 0x34d   :  { %v1915_v53 = vsel %vm1864_vm13, %v1911_v24, %v1914_v17  ;;  %v1925_v63 = vmul.f32 %v1877_v43, %v8450_v62 }
 0x34e   :  { %v1917_v29 = vsub.f32 %v1868_v38, %v1915_v53 }
 0x350   :  { %v1927_v11 = vperm.slane %v1917_v29, 0  ;;  %v1928_v30 = vperm.slane %v1917_v29, 1  ;;  %v1929_v5 = vperm.slane %v1917_v29, 2  ;;  %v1930_v8 = vperm.slane %v1917_v29, 3 }
 0x351   :  { %v1931_v28 = vperm.slane %v1917_v29, 4  ;;  %v1932_v40 = vperm.slane %v1917_v29, 5  ;;  %v1933_v9 = vperm.slane %v1917_v29, 6  ;;  %v1934_v22 = vperm.slane %v1917_v29, 7 }
 0x352   :  { %v8647_v57 = vadd.f32 %v1927_v11, %v1918_v54  ;;  %v8649_v18 = vadd.f32 %v1928_v30, %v1919_v55  ;;  %v8651_v20 = vadd.f32 %v1929_v5, %v1920_v10  ;;  %v8653_v2 = vadd.f32 %v1930_v8, %v1921_v59 }
 0x353   :  { %v8655_v50 = vadd.f32 %v1931_v28, %v1922_v34  ;;  %v8657_v16 = vadd.f32 %v1932_v40, %v1923_v33  ;;  %v8659_v62 = vadd.f32 %v1933_v9, %v1924_v60  ;;  %v8661_v56 = vadd.f32 %v1934_v22, %v1925_v63 }
 0x354   :  { %8186 = dma.done.wait [#allocation4 + $0x1], 32768 }
 0x355   :  { %8187 = vsyncadd [#allocation4 + $0x1], 4294934528  ;;  %v5981_v0 = vld [vmem:[#allocation3 + $0xe0] sm:$0xf]  ;;  %v7533_v12 = vld [vmem:[#allocation3 + $0xec] sm:$0xf0] }
 0x356   :  { %v6109_v44 = vld [vmem:[#allocation3 + $0x1e0] sm:$0xf]  ;;  %v5982_v13 = vor.u32 %v7533_v12, %v5981_v0  ;;  %v7565_v14 = vld [vmem:[#allocation3 + $0x1ec] sm:$0xf0]  ;;  %s8209_s8 = smov [#allocation17]   ;;  %s5185_s17 = sshll.u32 %s8955_s13, 4  ;;  %s5186_s17 = int_to_ptr.hbm [resolvable:$true] %s5185_s17 }
 0x357   :  { %v6237_v19 = vld [vmem:[#allocation3 + $0x2e0] sm:$0xf]  ;;  %v7597_v25 = vld [vmem:[#allocation3 + $0x2ec] sm:$0xf0]  ;;  %v6110_v27 = vor.u32 %v7565_v14, %v6109_v44  ;;  %s5183_s23 = sshll.u32 %s8209_s8, 4  ;;  %s5184_s23 = int_to_ptr.vmem [resolvable:$true] %s5183_s23 }
 0x358   :  { %v6238_v31 = vor.u32 %v7597_v25, %v6237_v19  ;;  %v5965_v32 = vld [vmem:[#allocation3 + $0xc0] sm:$0xf]  ;;  %v7529_v35 = vld [vmem:[#allocation3 + $0xcc] sm:$0xf0]  ;;  %3509 = vmatpush.bf16.msrb.mxu2 %v5982_v13  ;;  %5188 = dma.vmem_to_hbm [thread:$0]  %s5184_s23, 256, %s5186_s17, [#allocation7]  }
 0x359   :  { %v6093_v36 = vld [vmem:[#allocation3 + $0x1c0] sm:$0xf]  ;;  %v5966_v37 = vor.u32 %v7529_v35, %v5965_v32  ;;  %v7561_v41 = vld [vmem:[#allocation3 + $0x1cc] sm:$0xf0]  ;;  %3522 = vmatpush.bf16.msrb.mxu3 %v6110_v27 }
 0x35a   :  { %v6365_v43 = vld [vmem:[#allocation3 + $0x3e0] sm:$0xf]  ;;  %v7629_v61 = vld [vmem:[#allocation3 + $0x3ec] sm:$0xf0]  ;;  %3535 = vmatpush.bf16.msra.mxu0 %v6238_v31  ;;  %v6094_v39 = vor.u32 %v7561_v41, %v6093_v36 }
 0x35b   :  { %v6366_v45 = vor.u32 %v7629_v61, %v6365_v43  ;;  %v6221_v46 = vld [vmem:[#allocation3 + $0x2c0] sm:$0xf]  ;;  %v7593_v23 = vld [vmem:[#allocation3 + $0x2cc] sm:$0xf0] }
 0x35c   :  { %v5949_v58 = vld [vmem:[#allocation3 + $0xa0] sm:$0xf]  ;;  %v6222_v47 = vor.u32 %v7593_v23, %v6221_v46  ;;  %v7525_v15 = vld [vmem:[#allocation3 + $0xac] sm:$0xf0]  ;;  %3510 = vmatpush.bf16.msrb.mxu2 %v5966_v37 }
 0x35d   :  { %v6077_v48 = vld [vmem:[#allocation3 + $0x1a0] sm:$0xf]  ;;  %v7557_v49 = vld [vmem:[#allocation3 + $0x1ac] sm:$0xf0]  ;;  %3548 = vmatpush.bf16.msra.mxu1 %v6366_v45  ;;  %v5950_v7 = vor.u32 %v7525_v15, %v5949_v58  ;;  %3523 = vmatpush.bf16.msrb.mxu3 %v6094_v39 }
 0x35e   :  { %v6349_v21 = vld [vmem:[#allocation3 + $0x3c0] sm:$0xf]  ;;  %v7625_v52 = vld [vmem:[#allocation3 + $0x3cc] sm:$0xf0]  ;;  %3536 = vmatpush.bf16.msra.mxu0 %v6222_v47  ;;  %v6078_v24 = vor.u32 %v7557_v49, %v6077_v48 }
 0x35f   :  { %v6205_v6 = vld [vmem:[#allocation3 + $0x2a0] sm:$0xf]  ;;  %v6350_v26 = vor.u32 %v7625_v52, %v6349_v21  ;;  %v7589_v3 = vld [vmem:[#allocation3 + $0x2ac] sm:$0xf0] }
 0x360   :  { %v5933_v4 = vld [vmem:[#allocation3 + $0x80] sm:$0xf]  ;;  %v7521_v38 = vld [vmem:[#allocation3 + $0x8c] sm:$0xf0]  ;;  %v6206_v1 = vor.u32 %v7589_v3, %v6205_v6  ;;  %3511 = vmatpush.bf16.msrb.mxu2 %v5950_v7 }
 0x361   :  { %v6061_v51 = vld [vmem:[#allocation3 + $0x180] sm:$0xf]  ;;  %v7553_v17 = vld [vmem:[#allocation3 + $0x18c] sm:$0xf0]  ;;  %3549 = vmatpush.bf16.msra.mxu1 %v6350_v26  ;;  %v5934_v59 = vor.u32 %v7521_v38, %v5933_v4  ;;  %3524 = vmatpush.bf16.msrb.mxu3 %v6078_v24 }
 0x362   :  { %v6333_v53 = vld [vmem:[#allocation3 + $0x3a0] sm:$0xf]  ;;  %v7621_v54 = vld [vmem:[#allocation3 + $0x3ac] sm:$0xf0]  ;;  %3537 = vmatpush.bf16.msra.mxu0 %v6206_v1  ;;  %v6062_v60 = vor.u32 %v7553_v17, %v6061_v51 }
 0x363   :  { %v6189_v29 = vld [vmem:[#allocation3 + $0x280] sm:$0xf]  ;;  %v7585_v55 = vld [vmem:[#allocation3 + $0x28c] sm:$0xf0]  ;;  %v6334_v10 = vor.u32 %v7621_v54, %v6333_v53 }
 0x364   :  { %v6317_v34 = vld [vmem:[#allocation3 + $0x380] sm:$0xf]  ;;  %v7617_v33 = vld [vmem:[#allocation3 + $0x38c] sm:$0xf0]  ;;  %v6190_v63 = vor.u32 %v7585_v55, %v6189_v29  ;;  %3512 = vmatpush.bf16.msrb.mxu2 %v5934_v59 }
 0x365   :  { %v5917_v11 = vld [vmem:[#allocation3 + $0x60] sm:$0xf]  ;;  %v7517_v30 = vld [vmem:[#allocation3 + $0x6c] sm:$0xf0]  ;;  %3550 = vmatpush.bf16.msra.mxu1 %v6334_v10  ;;  %v6318_v9 = vor.u32 %v7617_v33, %v6317_v34  ;;  %3525 = vmatpush.bf16.msrb.mxu3 %v6062_v60 }
 0x366   :  { %v6045_v5 = vld [vmem:[#allocation3 + $0x160] sm:$0xf]  ;;  %v7549_v8 = vld [vmem:[#allocation3 + $0x16c] sm:$0xf0]  ;;  %v5918_v22 = vor.u32 %v7517_v30, %v5917_v11  ;;  %3538 = vmatpush.bf16.msra.mxu0 %v6190_v63 }
 0x367   :  { %v6173_v28 = vld [vmem:[#allocation3 + $0x260] sm:$0xf]  ;;  %v7581_v40 = vld [vmem:[#allocation3 + $0x26c] sm:$0xf0]  ;;  %v6046_v44 = vor.u32 %v7549_v8, %v6045_v5 }
 0x368   :  { %v6301_v0 = vld [vmem:[#allocation3 + $0x360] sm:$0xf]  ;;  %v7613_v12 = vld [vmem:[#allocation3 + $0x36c] sm:$0xf0]  ;;  %v6174_v13 = vor.u32 %v7581_v40, %v6173_v28  ;;  %3513 = vmatpush.bf16.msrb.mxu2 %v5918_v22 }
 0x369   :  { %v5901_v14 = vld [vmem:[#allocation3 + $0x40] sm:$0xf]  ;;  %v7513_v19 = vld [vmem:[#allocation3 + $0x4c] sm:$0xf0]  ;;  %3551 = vmatpush.bf16.msra.mxu1 %v6318_v9  ;;  %v6302_v35 = vor.u32 %v7613_v12, %v6301_v0  ;;  %3526 = vmatpush.bf16.msrb.mxu3 %v6046_v44 }
 0x36a   :  { %v6029_v25 = vld [vmem:[#allocation3 + $0x140] sm:$0xf]  ;;  %v7545_v27 = vld [vmem:[#allocation3 + $0x14c] sm:$0xf0]  ;;  %v5902_v36 = vor.u32 %v7513_v19, %v5901_v14  ;;  %3539 = vmatpush.bf16.msra.mxu0 %v6174_v13  ;;  %v8665_v14 = vpack.c.bf16 %v8647_v57, %v8647_v57 }
 0x36b   :  { %v6157_v31 = vld [vmem:[#allocation3 + $0x240] sm:$0xf]  ;;  %v7577_v32 = vld [vmem:[#allocation3 + $0x24c] sm:$0xf0]  ;;  %v6030_v43 = vor.u32 %v7545_v27, %v6029_v25 }
 0x36c   :  { %v6285_v37 = vld [vmem:[#allocation3 + $0x340] sm:$0xf]  ;;  %v7609_v41 = vld [vmem:[#allocation3 + $0x34c] sm:$0xf0]  ;;  %v6158_v61 = vor.u32 %v7577_v32, %v6157_v31  ;;  %3514 = vmatpush.bf16.msrb.mxu2 %v5902_v36  ;;  %v8669_v31 = vpack.c.bf16 %v8649_v18, %v8649_v18 }
 0x36d   :  { %v5885_v39 = vld [vmem:[#allocation3 + $0x20] sm:$0xf]  ;;  %v7509_v45 = vld [vmem:[#allocation3 + $0x2c] sm:$0xf0]  ;;  %3552 = vmatpush.bf16.msra.mxu1 %v6302_v35  ;;  %v6286_v15 = vor.u32 %v7609_v41, %v6285_v37  ;;  %3527 = vmatpush.bf16.msrb.mxu3 %v6030_v43  ;;  %v8673_v37 = vpack.c.bf16 %v8651_v20, %v8651_v20 }
 0x36e   :  { %v6013_v46 = vld [vmem:[#allocation3 + $0x120] sm:$0xf]  ;;  %v7541_v23 = vld [vmem:[#allocation3 + $0x12c] sm:$0xf0]  ;;  %v5886_v49 = vor.u32 %v7509_v45, %v5885_v39  ;;  %3540 = vmatpush.bf16.msra.mxu0 %v6158_v61  ;;  %v8677_v61 = vpack.c.bf16 %v8653_v2, %v8653_v2 }
 0x36f   :  { %v6141_v58 = vld [vmem:[#allocation3 + $0x220] sm:$0xf]  ;;  %v7573_v47 = vld [vmem:[#allocation3 + $0x22c] sm:$0xf0]  ;;  %v6014_v7 = vor.u32 %v7541_v23, %v6013_v46 }
 0x370   :  { %v5869_v48 = vld [vmem:[#allocation3] sm:$0xf]  ;;  %v7505_v21 = vld [vmem:[#allocation3 + $0xc] sm:$0xf0]  ;;  %v6142_v26 = vor.u32 %v7573_v47, %v6141_v58  ;;  %3515 = vmatpush.bf16.msrb.mxu2 %v5886_v49 }
 0x371   :  { %v6269_v52 = vld [vmem:[#allocation3 + $0x320] sm:$0xf]  ;;  %v7605_v6 = vld [vmem:[#allocation3 + $0x32c] sm:$0xf0]  ;;  %3553 = vmatpush.bf16.msra.mxu1 %v6286_v15  ;;  %v5870_v55 = vor.u32 %v7505_v21, %v5869_v48  ;;  %3528 = vmatpush.bf16.msrb.mxu3 %v6014_v7 }
 0x372   :  { %v5997_v3 = vld [vmem:[#allocation3 + $0x100] sm:$0xf]  ;;  %v7537_v4 = vld [vmem:[#allocation3 + $0x10c] sm:$0xf0]  ;;  %v6270_v17 = vor.u32 %v7605_v6, %v6269_v52  ;;  %3541 = vmatpush.bf16.msra.mxu0 %v6142_v26 }
 0x373   :  { %v6493_v38 = vld [vmem:[#allocation3 + $0x4e0] sm:$0xf]  ;;  %v7661_v24 = vld [vmem:[#allocation3 + $0x4ec] sm:$0xf0]  ;;  %v5998_v33 = vor.u32 %v7537_v4, %v5997_v3 }
 0x374   :  { %v6621_v1 = vld [vmem:[#allocation3 + $0x5e0] sm:$0xf]  ;;  %v7693_v51 = vld [vmem:[#allocation3 + $0x5ec] sm:$0xf0]  ;;  %v6494_v60 = vor.u32 %v7661_v24, %v6493_v38  ;;  %3516 = vmatpush.bf16.msrb.mxu2 %v5870_v55 }
 0x375   :  { %v6125_v53 = vld [vmem:[#allocation3 + $0x200] sm:$0xf]  ;;  %v7569_v54 = vld [vmem:[#allocation3 + $0x20c] sm:$0xf0]  ;;  %v6622_v30 = vor.u32 %v7693_v51, %v6621_v1  ;;  %3554 = vmatpush.bf16.msra.mxu1 %v6270_v17  ;;  %3529 = vmatpush.bf16.msrb.mxu3 %v5998_v33 }
 0x376   :  { %v6749_v29 = vld [vmem:[#allocation3 + $0x6e0] sm:$0xf]  ;;  %v7725_v10 = vld [vmem:[#allocation3 + $0x6ec] sm:$0xf0]  ;;  %v6126_v5 = vor.u32 %v7569_v54, %v6125_v53 }
 0x377   :  { %v6253_v59 = vld [vmem:[#allocation3 + $0x300] sm:$0xf]  ;;  %v7601_v34 = vld [vmem:[#allocation3 + $0x30c] sm:$0xf0]  ;;  %v6750_v40 = vor.u32 %v7725_v10, %v6749_v29  ;;  %3517 = vmatmul.bf16.vlgmr.msrb.gmra.mxu2 %v8665_v14 }
 0x378   :  { %v6877_v63 = vld [vmem:[#allocation3 + $0x7e0] sm:$0xf]  ;;  %v7757_v11 = vld [vmem:[#allocation3 + $0x7ec] sm:$0xf0]  ;;  %v6254_v9 = vor.u32 %v7601_v34, %v6253_v59  ;;  %3561 = vmatpush.bf16.msra.mxu2 %v6494_v60  ;;  %3542 = vmatpush.bf16.msra.mxu0 %v6126_v5 }
 0x379   :  { %v6477_v8 = vld [vmem:[#allocation3 + $0x4c0] sm:$0xf]  ;;  %v7657_v28 = vld [vmem:[#allocation3 + $0x4cc] sm:$0xf0]  ;;  %v6878_v12 = vor.u32 %v7757_v11, %v6877_v63  ;;  %3574 = vmatpush.bf16.msra.mxu3 %v6622_v30 }
 0x37a   :  { %v6605_v22 = vld [vmem:[#allocation3 + $0x5c0] sm:$0xf]  ;;  %v7689_v0 = vld [vmem:[#allocation3 + $0x5cc] sm:$0xf0]  ;;  %v6478_v19 = vor.u32 %v7657_v28, %v6477_v8  ;;  %3555 = vmatpush.bf16.msra.mxu1 %v6254_v9  ;;  %3530 = vmatmul.bf16.vlgmr.msrb.gmra.mxu3 %v8669_v31 }
 0x37b   :  { %v6733_v44 = vld [vmem:[#allocation3 + $0x6c0] sm:$0xf]  ;;  %v7721_v13 = vld [vmem:[#allocation3 + $0x6cc] sm:$0xf0]  ;;  %v6606_v32 = vor.u32 %v7689_v0, %v6605_v22  ;;  %3543 = vmatmul.bf16.vlgmr.msra.gmra.mxu0 %v8673_v37 }
 0x37c   :  { %v6861_v25 = vld [vmem:[#allocation3 + $0x7c0] sm:$0xf]  ;;  %v7753_v27 = vld [vmem:[#allocation3 + $0x7cc] sm:$0xf0]  ;;  %3587 = vmatpush.bf16.msrb.mxu0 %v6750_v40  ;;  %v6734_v57 = vor.u32 %v7721_v13, %v6733_v44  ;;  %3562 = vmatpush.bf16.msra.mxu2 %v6478_v19 }
 0x37d   :  { %v6461_v35 = vld [vmem:[#allocation3 + $0x4a0] sm:$0xf]  ;;  %v7653_v36 = vld [vmem:[#allocation3 + $0x4ac] sm:$0xf0]  ;;  %v6862_v18 = vor.u32 %v7753_v27, %v6861_v25  ;;  %3575 = vmatpush.bf16.msra.mxu3 %v6606_v32  ;;  %3556 = vmatmul.bf16.vlgmr.msra.gmra.mxu1 %v8677_v61 }
 0x37e   :  { %v6589_v41 = vld [vmem:[#allocation3 + $0x5a0] sm:$0xf]  ;;  %v7685_v43 = vld [vmem:[#allocation3 + $0x5ac] sm:$0xf0]  ;;  %3600 = vmatpush.bf16.msrb.mxu1 %v6878_v12  ;;  %v6462_v46 = vor.u32 %v7653_v36, %v6461_v35 }
 0x37f   :  { %v6717_v39 = vld [vmem:[#allocation3 + $0x6a0] sm:$0xf]  ;;  %v7717_v45 = vld [vmem:[#allocation3 + $0x6ac] sm:$0xf0]  ;;  %v6590_v58 = vor.u32 %v7685_v43, %v6589_v41 }
 0x380   :  { %v6845_v23 = vld [vmem:[#allocation3 + $0x7a0] sm:$0xf]  ;;  %v7749_v20 = vld [vmem:[#allocation3 + $0x7ac] sm:$0xf0]  ;;  %3588 = vmatpush.bf16.msrb.mxu0 %v6734_v57  ;;  %v6718_v2 = vor.u32 %v7717_v45, %v6717_v39  ;;  %3563 = vmatpush.bf16.msra.mxu2 %v6462_v46 }
 0x381   :  { %v6445_v47 = vld [vmem:[#allocation3 + $0x480] sm:$0xf]  ;;  %v7649_v15 = vld [vmem:[#allocation3 + $0x48c] sm:$0xf0]  ;;  %v6846_v21 = vor.u32 %v7749_v20, %v6845_v23  ;;  %3576 = vmatpush.bf16.msra.mxu3 %v6590_v58  ;;  %v7531_v20 = vld [vmem:[#allocation3 + $0xe4] sm:$0xf] }
 0x382   :  { %v6573_v48 = vld [vmem:[#allocation3 + $0x580] sm:$0xf]  ;;  %v7681_v49 = vld [vmem:[#allocation3 + $0x58c] sm:$0xf0]  ;;  %3601 = vmatpush.bf16.msrb.mxu1 %v6862_v18  ;;  %v6446_v7 = vor.u32 %v7649_v15, %v6445_v47  ;;  %v5983_v58 = vld [vmem:[#allocation3 + $0xf0] sm:$0xf0] }
 0x383   :  { %v6701_v52 = vld [vmem:[#allocation3 + $0x680] sm:$0xf]  ;;  %v7713_v6 = vld [vmem:[#allocation3 + $0x68c] sm:$0xf0]  ;;  %v6574_v4 = vor.u32 %v7681_v49, %v6573_v48  ;;  %v7563_v47 = vld [vmem:[#allocation3 + $0x1e4] sm:$0xf] }
 0x384   :  { %v6829_v26 = vld [vmem:[#allocation3 + $0x780] sm:$0xf]  ;;  %v7745_v3 = vld [vmem:[#allocation3 + $0x78c] sm:$0xf0]  ;;  %3589 = vmatpush.bf16.msrb.mxu0 %v6718_v2  ;;  %v6702_v1 = vor.u32 %v7713_v6, %v6701_v52  ;;  %3564 = vmatpush.bf16.msra.mxu2 %v6446_v7  ;;  %v6111_v2 = vld [vmem:[#allocation3 + $0x1f0] sm:$0xf0] }
 0x385   :  { %v6429_v38 = vld [vmem:[#allocation3 + $0x460] sm:$0xf]  ;;  %v7645_v24 = vld [vmem:[#allocation3 + $0x46c] sm:$0xf0]  ;;  %v6830_v53 = vor.u32 %v7745_v3, %v6829_v26  ;;  %3577 = vmatpush.bf16.msra.mxu3 %v6574_v4  ;;  %v7595_v52 = vld [vmem:[#allocation3 + $0x2e4] sm:$0xf]  ;;  %v5986_v26 = vor.u32 %v7531_v20, %v5983_v58 }
 0x386   :  { %v6557_v51 = vld [vmem:[#allocation3 + $0x560] sm:$0xf]  ;;  %v7677_v17 = vld [vmem:[#allocation3 + $0x56c] sm:$0xf0]  ;;  %3602 = vmatpush.bf16.msrb.mxu1 %v6846_v21  ;;  %v6430_v55 = vor.u32 %v7645_v24, %v6429_v38  ;;  %v6239_v6 = vld [vmem:[#allocation3 + $0x2f0] sm:$0xf0]  ;;  %v6114_v24 = vor.u32 %v7563_v47, %v6111_v2 }
 0x387   :  { %v6685_v54 = vld [vmem:[#allocation3 + $0x660] sm:$0xf]  ;;  %v7709_v29 = vld [vmem:[#allocation3 + $0x66c] sm:$0xf0]  ;;  %v6558_v34 = vor.u32 %v7677_v17, %v6557_v51  ;;  %v7527_v38 = vld [vmem:[#allocation3 + $0xc4] sm:$0xf] }
 0x388   :  { %v6813_v10 = vld [vmem:[#allocation3 + $0x760] sm:$0xf]  ;;  %v7741_v59 = vld [vmem:[#allocation3 + $0x76c] sm:$0xf0]  ;;  %3590 = vmatpush.bf16.msrb.mxu0 %v6702_v1  ;;  %v6686_v63 = vor.u32 %v7709_v29, %v6685_v54  ;;  %3565 = vmatpush.bf16.msra.mxu2 %v6430_v55  ;;  %v5967_v51 = vld [vmem:[#allocation3 + $0xd0] sm:$0xf0]  ;;  %v8685_v54 = vpack.c.bf16 %v8655_v50, %v8655_v50  ;;  %v6242_v29 = vor.u32 %v7595_v52, %v6239_v6 }
 0x389   :  { %v6413_v33 = vld [vmem:[#allocation3 + $0x440] sm:$0xf]  ;;  %v7641_v60 = vld [vmem:[#allocation3 + $0x44c] sm:$0xf0]  ;;  %v6814_v5 = vor.u32 %v7741_v59, %v6813_v10  ;;  %3578 = vmatpush.bf16.msra.mxu3 %v6558_v34  ;;  %v7627_v17 = vld [vmem:[#allocation3 + $0x3e4] sm:$0xf]  ;;  %v8689_v34 = vpack.c.bf16 %v8657_v16, %v8657_v16 }
 0x38a   :  { %v6541_v11 = vld [vmem:[#allocation3 + $0x540] sm:$0xf]  ;;  %v7673_v30 = vld [vmem:[#allocation3 + $0x54c] sm:$0xf0]  ;;  %3603 = vmatpush.bf16.msrb.mxu1 %v6830_v53  ;;  %v6414_v40 = vor.u32 %v7641_v60, %v6413_v33  ;;  %v6367_v53 = vld [vmem:[#allocation3 + $0x3f0] sm:$0xf0] }
 0x38b   :  { %v6669_v8 = vld [vmem:[#allocation3 + $0x640] sm:$0xf]  ;;  %v7705_v28 = vld [vmem:[#allocation3 + $0x64c] sm:$0xf0]  ;;  %v6542_v0 = vor.u32 %v7673_v30, %v6541_v11  ;;  %v7559_v55 = vld [vmem:[#allocation3 + $0x1c4] sm:$0xf]  ;;  %v6370_v11 = vor.u32 %v7627_v17, %v6367_v53 }
 0x38c   :  { %v6797_v9 = vld [vmem:[#allocation3 + $0x740] sm:$0xf]  ;;  %v7737_v22 = vld [vmem:[#allocation3 + $0x74c] sm:$0xf0]  ;;  %3591 = vmatpush.bf16.msrb.mxu0 %v6686_v63  ;;  %v6670_v13 = vor.u32 %v7705_v28, %v6669_v8  ;;  %3566 = vmatpush.bf16.msra.mxu2 %v6414_v40  ;;  %v6095_v10 = vld [vmem:[#allocation3 + $0x1d0] sm:$0xf0]  ;;  %v5970_v63 = vor.u32 %v7527_v38, %v5967_v51  ;;  %v8693_v40 = vpack.c.bf16 %v8659_v62, %v8659_v62 }
 0x38d   :  { %v6397_v12 = vld [vmem:[#allocation3 + $0x420] sm:$0xf]  ;;  %v7637_v44 = vld [vmem:[#allocation3 + $0x42c] sm:$0xf0]  ;;  %v6798_v27 = vor.u32 %v7737_v22, %v6797_v9  ;;  %3579 = vmatpush.bf16.msra.mxu3 %v6542_v0  ;;  %v7591_v33 = vld [vmem:[#allocation3 + $0x2c4] sm:$0xf]  ;;  %v6098_v50 = vor.u32 %v7559_v55, %v6095_v10  ;;  %v8698_v0 = vpack.c.bf16 %v8661_v56, %v8661_v56 }
 0x38e   :  { %v6525_v19 = vld [vmem:[#allocation3 + $0x520] sm:$0xf]  ;;  %v7669_v25 = vld [vmem:[#allocation3 + $0x52c] sm:$0xf0]  ;;  %3604 = vmatpush.bf16.msrb.mxu1 %v6814_v5  ;;  %v6398_v36 = vor.u32 %v7637_v44, %v6397_v12  ;;  %v6223_v60 = vld [vmem:[#allocation3 + $0x2d0] sm:$0xf0] }
 0x38f   :  { %v6653_v32 = vld [vmem:[#allocation3 + $0x620] sm:$0xf]  ;;  %v7701_v35 = vld [vmem:[#allocation3 + $0x62c] sm:$0xf0]  ;;  %v6526_v18 = vor.u32 %v7669_v25, %v6525_v19  ;;  %v7523_v30 = vld [vmem:[#allocation3 + $0xa4] sm:$0xf]  ;;  %v6226_v16 = vor.u32 %v7591_v33, %v6223_v60 }
 0x390   :  { %v6381_v57 = vld [vmem:[#allocation3 + $0x400] sm:$0xf]  ;;  %v7733_v43 = vld [vmem:[#allocation3 + $0x72c] sm:$0xf0]  ;;  %3592 = vmatpush.bf16.msrb.mxu0 %v6670_v13  ;;  %v6654_v23 = vor.u32 %v7701_v35, %v6653_v32  ;;  %3567 = vmatpush.bf16.msra.mxu2 %v6398_v36  ;;  %v5951_v5 = vld [vmem:[#allocation3 + $0xb0] sm:$0xf0] }
 0x391   :  { %v6781_v41 = vld [vmem:[#allocation3 + $0x720] sm:$0xf]  ;;  %v7633_v39 = vld [vmem:[#allocation3 + $0x40c] sm:$0xf0]  ;;  %3580 = vmatpush.bf16.msra.mxu3 %v6526_v18  ;;  %v7623_v8 = vld [vmem:[#allocation3 + $0x3c4] sm:$0xf]  ;;  %v5954_v13 = vor.u32 %v7523_v30, %v5951_v5 }
 0x392   :  { %v6509_v45 = vld [vmem:[#allocation3 + $0x500] sm:$0xf]  ;;  %v7665_v46 = vld [vmem:[#allocation3 + $0x50c] sm:$0xf0]  ;;  %3605 = vmatpush.bf16.msrb.mxu1 %v6798_v27  ;;  %v6782_v15 = vor.u32 %v7733_v43, %v6781_v41  ;;  %v6382_v21 = vor.u32 %v7633_v39, %v6381_v57  ;;  %v6351_v28 = vld [vmem:[#allocation3 + $0x3d0] sm:$0xf0] }
 0x393   :  { %v6637_v48 = vld [vmem:[#allocation3 + $0x600] sm:$0xf]  ;;  %v7697_v49 = vld [vmem:[#allocation3 + $0x60c] sm:$0xf0]  ;;  %v6510_v7 = vor.u32 %v7665_v46, %v6509_v45  ;;  %v7555_v9 = vld [vmem:[#allocation3 + $0x1a4] sm:$0xf]  ;;  %v6354_v62 = vor.u32 %v7623_v8, %v6351_v28 }
 0x394   :  { %v6765_v3 = vld [vmem:[#allocation3 + $0x700] sm:$0xf]  ;;  %v7729_v4 = vld [vmem:[#allocation3 + $0x70c] sm:$0xf0]  ;;  %3593 = vmatpush.bf16.msrb.mxu0 %v6654_v23  ;;  %v6638_v1 = vor.u32 %v7697_v49, %v6637_v48  ;;  %3568 = vmatpush.bf16.msra.mxu2 %v6382_v21  ;;  %v6079_v22 = vld [vmem:[#allocation3 + $0x1b0] sm:$0xf0] }
 0x395   :  { %v6766_v59 = vor.u32 %v7729_v4, %v6765_v3  ;;  %3581 = vmatpush.bf16.msra.mxu3 %v6510_v7  ;;  %v7587_v12 = vld [vmem:[#allocation3 + $0x2a4] sm:$0xf]  ;;  %v6207_v44 = vld [vmem:[#allocation3 + $0x2b0] sm:$0xf0]  ;;  %v6082_v25 = vor.u32 %v7555_v9, %v6079_v22 }
 0x396   :  { %3606 = vmatpush.bf16.msrb.mxu1 %v6782_v15  ;;  %v7519_v19 = vld [vmem:[#allocation3 + $0x84] sm:$0xf]  ;;  %v5935_v27 = vld [vmem:[#allocation3 + $0x90] sm:$0xf0]  ;;  %v6210_v56 = vor.u32 %v7587_v12, %v6207_v44 }
 0x397   :  { %3569 = vmatmul.bf16.vlgmr.msra.gmra.mxu2 %v8685_v54  ;;  %v7619_v32 = vld [vmem:[#allocation3 + $0x3a4] sm:$0xf]  ;;  %v6335_v35 = vld [vmem:[#allocation3 + $0x3b0] sm:$0xf0]  ;;  %v5938_v18 = vor.u32 %v7519_v19, %v5935_v27 }
 0x398   :  { %3613 = vmatpush.bf16.msrb.mxu2 %v5986_v26  ;;  %3594 = vmatpush.bf16.msrb.mxu0 %v6638_v1  ;;  %v7551_v36 = vld [vmem:[#allocation3 + $0x184] sm:$0xf]  ;;  %v6063_v57 = vld [vmem:[#allocation3 + $0x190] sm:$0xf0]  ;;  %v6338_v39 = vor.u32 %v7619_v32, %v6335_v35 }
 0x399   :  { %3626 = vmatpush.bf16.msrb.mxu3 %v6114_v24  ;;  %v7583_v41 = vld [vmem:[#allocation3 + $0x284] sm:$0xf]  ;;  %v6191_v43 = vld [vmem:[#allocation3 + $0x290] sm:$0xf0]  ;;  %v6066_v46 = vor.u32 %v7551_v36, %v6063_v57 }
 0x39a   :  { %3607 = vmatpush.bf16.msrb.mxu1 %v6766_v59  ;;  %3582 = vmatmul.bf16.vlgmr.msra.gmra.mxu3 %v8689_v34  ;;  %v7515_v45 = vld [vmem:[#allocation3 + $0x64] sm:$0xf]  ;;  %v5919_v23 = vld [vmem:[#allocation3 + $0x70] sm:$0xf0]  ;;  %v6194_v47 = vor.u32 %v7583_v41, %v6191_v43 }
 0x39b   :  { %3595 = vmatmul.bf16.vlgmr.msrb.gmra.mxu0 %v8693_v40  ;;  %v7615_v20 = vld [vmem:[#allocation3 + $0x384] sm:$0xf]  ;;  %v6319_v58 = vld [vmem:[#allocation3 + $0x390] sm:$0xf0]  ;;  %v5922_v21 = vor.u32 %v7515_v45, %v5919_v23 }
 0x39c   :  { %3639 = vmatpush.bf16.msra.mxu0 %v6242_v29  ;;  %3614 = vmatpush.bf16.msrb.mxu2 %v5970_v63  ;;  %v7547_v15 = vld [vmem:[#allocation3 + $0x164] sm:$0xf]  ;;  %v6047_v2 = vld [vmem:[#allocation3 + $0x170] sm:$0xf0]  ;;  %v6322_v52 = vor.u32 %v7615_v20, %v6319_v58 }
 0x39d   :  { %3627 = vmatpush.bf16.msrb.mxu3 %v6098_v50  ;;  %3608 = vmatmul.bf16.vlgmr.msrb.gmra.mxu1 %v8698_v0  ;;  %v7579_v48 = vld [vmem:[#allocation3 + $0x264] sm:$0xf]  ;;  %v6175_v49 = vld [vmem:[#allocation3 + $0x270] sm:$0xf0]  ;;  %v6050_v7 = vor.u32 %v7547_v15, %v6047_v2 }
 0x39e   :  { %3652 = vmatpush.bf16.msra.mxu1 %v6370_v11  ;;  %v7511_v6 = vld [vmem:[#allocation3 + $0x44] sm:$0xf]  ;;  %v5903_v26 = vld [vmem:[#allocation3 + $0x50] sm:$0xf0]  ;;  %v6178_v38 = vor.u32 %v7579_v48, %v6175_v49 }
 0x39f   :  { %v7611_v3 = vld [vmem:[#allocation3 + $0x364] sm:$0xf]  ;;  %v6303_v4 = vld [vmem:[#allocation3 + $0x370] sm:$0xf0]  ;;  %v5906_v53 = vor.u32 %v7511_v6, %v5903_v26 }
 0x3a0   :  { %3640 = vmatpush.bf16.msra.mxu0 %v6226_v16  ;;  %3615 = vmatpush.bf16.msrb.mxu2 %v5954_v13  ;;  %v7543_v24 = vld [vmem:[#allocation3 + $0x144] sm:$0xf]  ;;  %v6031_v1 = vld [vmem:[#allocation3 + $0x150] sm:$0xf0]  ;;  %v6306_v29 = vor.u32 %v7611_v3, %v6303_v4 }
 0x3a1   :  { %3628 = vmatpush.bf16.msrb.mxu3 %v6082_v25  ;;  %v7575_v51 = vld [vmem:[#allocation3 + $0x244] sm:$0xf]  ;;  %v6159_v17 = vld [vmem:[#allocation3 + $0x250] sm:$0xf0]  ;;  %v6034_v10 = vor.u32 %v7543_v24, %v6031_v1 }
 0x3a2   :  { %3653 = vmatpush.bf16.msra.mxu1 %v6354_v62  ;;  %v7507_v55 = vld [vmem:[#allocation3 + $0x24] sm:$0xf]  ;;  %v5887_v59 = vld [vmem:[#allocation3 + $0x30] sm:$0xf0]  ;;  %v6162_v63 = vor.u32 %v7575_v51, %v6159_v17 }
 0x3a3   :  { %v7607_v33 = vld [vmem:[#allocation3 + $0x344] sm:$0xf]  ;;  %v6287_v60 = vld [vmem:[#allocation3 + $0x350] sm:$0xf0]  ;;  %v5890_v8 = vor.u32 %v7507_v55, %v5887_v59 }
 0x3a4   :  { %3641 = vmatpush.bf16.msra.mxu0 %v6210_v56  ;;  %3616 = vmatpush.bf16.msrb.mxu2 %v5938_v18  ;;  %v7539_v11 = vld [vmem:[#allocation3 + $0x124] sm:$0xf]  ;;  %v6015_v30 = vld [vmem:[#allocation3 + $0x130] sm:$0xf0]  ;;  %v6290_v28 = vor.u32 %v7607_v33, %v6287_v60 }
 0x3a5   :  { %3629 = vmatpush.bf16.msrb.mxu3 %v6066_v46  ;;  %v7571_v50 = vld [vmem:[#allocation3 + $0x224] sm:$0xf]  ;;  %v6143_v5 = vld [vmem:[#allocation3 + $0x230] sm:$0xf0]  ;;  %v6018_v12 = vor.u32 %v7539_v11, %v6015_v30 }
 0x3a6   :  { %3654 = vmatpush.bf16.msra.mxu1 %v6338_v39  ;;  %v7503_v16 = vld [vmem:[#allocation3 + $0x4] sm:$0xf]  ;;  %v5871_v9 = vld [vmem:[#allocation3 + $0x10] sm:$0xf0]  ;;  %v6146_v19 = vor.u32 %v7571_v50, %v6143_v5 }
 0x3a7   :  { %v7535_v22 = vld [vmem:[#allocation3 + $0x104] sm:$0xf]  ;;  %v5999_v44 = vld [vmem:[#allocation3 + $0x110] sm:$0xf0]  ;;  %v5874_v57 = vor.u32 %v7503_v16, %v5871_v9 }
 0x3a8   :  { %3642 = vmatpush.bf16.msra.mxu0 %v6194_v47  ;;  %3617 = vmatpush.bf16.msrb.mxu2 %v5922_v21  ;;  %v7603_v13 = vld [vmem:[#allocation3 + $0x324] sm:$0xf]  ;;  %v6271_v62 = vld [vmem:[#allocation3 + $0x330] sm:$0xf0]  ;;  %v6002_v39 = vor.u32 %v7535_v22, %v5999_v44 }
 0x3a9   :  { %3630 = vmatpush.bf16.msrb.mxu3 %v6050_v7  ;;  %v7659_v25 = vld [vmem:[#allocation3 + $0x4e4] sm:$0xf]  ;;  %v6495_v27 = vld [vmem:[#allocation3 + $0x4f0] sm:$0xf0]  ;;  %v6274_v41 = vor.u32 %v7603_v13, %v6271_v62 }
 0x3aa   :  { %3655 = vmatpush.bf16.msra.mxu1 %v6322_v52  ;;  %v7691_v32 = vld [vmem:[#allocation3 + $0x5e4] sm:$0xf]  ;;  %v6623_v35 = vld [vmem:[#allocation3 + $0x5f0] sm:$0xf0]  ;;  %v6498_v45 = vor.u32 %v7659_v25, %v6495_v27 }
 0x3ab   :  { %v7567_v56 = vld [vmem:[#allocation3 + $0x204] sm:$0xf]  ;;  %v6127_v36 = vld [vmem:[#allocation3 + $0x210] sm:$0xf0]  ;;  %v6626_v58 = vor.u32 %v7691_v32, %v6623_v35 }
 0x3ac   :  { %3643 = vmatpush.bf16.msra.mxu0 %v6178_v38  ;;  %3618 = vmatpush.bf16.msrb.mxu2 %v5906_v53  ;;  %v7723_v43 = vld [vmem:[#allocation3 + $0x6e4] sm:$0xf]  ;;  %v6751_v18 = vld [vmem:[#allocation3 + $0x6f0] sm:$0xf0]  ;;  %v6130_v47 = vor.u32 %v7567_v56, %v6127_v36 }
 0x3ad   :  { %3631 = vmatpush.bf16.msrb.mxu3 %v6034_v10  ;;  %v7599_v46 = vld [vmem:[#allocation3 + $0x304] sm:$0xf]  ;;  %v6255_v23 = vld [vmem:[#allocation3 + $0x310] sm:$0xf0]  ;;  %v6754_v49 = vor.u32 %v7723_v43, %v6751_v18 }
 0x3ae   :  { %3656 = vmatpush.bf16.msra.mxu1 %v6306_v29  ;;  %v7655_v20 = vld [vmem:[#allocation3 + $0x4c4] sm:$0xf]  ;;  %v6479_v15 = vld [vmem:[#allocation3 + $0x4d0] sm:$0xf0]  ;;  %v6258_v6 = vor.u32 %v7599_v46, %v6255_v23 }
 0x3af   :  { %v7755_v2 = vld [vmem:[#allocation3 + $0x7e4] sm:$0xf]  ;;  %v6879_v48 = vld [vmem:[#allocation3 + $0x7f0] sm:$0xf0]  ;;  %v6482_v3 = vor.u32 %v7655_v20, %v6479_v15 }
 0x3b0   :  { %3644 = vmatpush.bf16.msra.mxu0 %v6162_v63  ;;  %3619 = vmatpush.bf16.msrb.mxu2 %v5890_v8  ;;  %v7687_v21 = vld [vmem:[#allocation3 + $0x5c4] sm:$0xf]  ;;  %v6607_v52 = vld [vmem:[#allocation3 + $0x5d0] sm:$0xf0]  ;;  %v6882_v4 = vor.u32 %v7755_v2, %v6879_v48 }
 0x3b1   :  { %3632 = vmatpush.bf16.msrb.mxu3 %v6018_v12  ;;  %v7719_v7 = vld [vmem:[#allocation3 + $0x6c4] sm:$0xf]  ;;  %v6735_v26 = vld [vmem:[#allocation3 + $0x6d0] sm:$0xf0]  ;;  %v6610_v24 = vor.u32 %v7687_v21, %v6607_v52 }
 0x3b2   :  { %3657 = vmatpush.bf16.msra.mxu1 %v6290_v28  ;;  %v7651_v38 = vld [vmem:[#allocation3 + $0x4a4] sm:$0xf]  ;;  %v6463_v1 = vld [vmem:[#allocation3 + $0x4b0] sm:$0xf0]  ;;  %v6738_v53 = vor.u32 %v7719_v7, %v6735_v26 }
 0x3b3   :  { %v7751_v51 = vld [vmem:[#allocation3 + $0x7c4] sm:$0xf]  ;;  %v6863_v17 = vld [vmem:[#allocation3 + $0x7d0] sm:$0xf0]  ;;  %v6466_v33 = vor.u32 %v7651_v38, %v6463_v1 }
 0x3b4   :  { %3645 = vmatpush.bf16.msra.mxu0 %v6146_v19  ;;  %3620 = vmatpush.bf16.msrb.mxu2 %v5874_v57  ;;  %v7683_v29 = vld [vmem:[#allocation3 + $0x5a4] sm:$0xf]  ;;  %v6591_v55 = vld [vmem:[#allocation3 + $0x5b0] sm:$0xf0]  ;;  %v6866_v60 = vor.u32 %v7751_v51, %v6863_v17 }
 0x3b5   :  { %3633 = vmatpush.bf16.msrb.mxu3 %v6002_v39  ;;  %v7715_v10 = vld [vmem:[#allocation3 + $0x6a4] sm:$0xf]  ;;  %v6719_v59 = vld [vmem:[#allocation3 + $0x6b0] sm:$0xf0]  ;;  %v6594_v11 = vor.u32 %v7683_v29, %v6591_v55 }
 0x3b6   :  { %3658 = vmatpush.bf16.msra.mxu1 %v6274_v41  ;;  %v7647_v63 = vld [vmem:[#allocation3 + $0x484] sm:$0xf]  ;;  %v6447_v30 = vld [vmem:[#allocation3 + $0x490] sm:$0xf0]  ;;  %v6722_v8 = vor.u32 %v7715_v10, %v6719_v59 }
 0x3b7   :  { %3621 = vmatmul.bf16.vlgmr.msrb.gmra.mxu2 %v8665_v14  ;;  %v7747_v50 = vld [vmem:[#allocation3 + $0x7a4] sm:$0xf]  ;;  %v6847_v5 = vld [vmem:[#allocation3 + $0x7b0] sm:$0xf0]  ;;  %v6450_v12 = vor.u32 %v7647_v63, %v6447_v30  ;;  %v7534_v30 = vld [vmem:[#allocation3 + $0xf4] sm:$0xf0] }
 0x3b8   :  { %3665 = vmatpush.bf16.msra.mxu2 %v6498_v45  ;;  %3646 = vmatpush.bf16.msra.mxu0 %v6130_v47  ;;  %v7679_v28 = vld [vmem:[#allocation3 + $0x584] sm:$0xf]  ;;  %v6575_v16 = vld [vmem:[#allocation3 + $0x590] sm:$0xf0]  ;;  %v6850_v44 = vor.u32 %v7747_v50, %v6847_v5  ;;  %v6117_v50 = vld [vmem:[#allocation3 + $0x1e8] sm:$0xf] }
 0x3b9   :  { %3678 = vmatpush.bf16.msra.mxu3 %v6626_v58  ;;  %v7711_v9 = vld [vmem:[#allocation3 + $0x684] sm:$0xf]  ;;  %v6703_v22 = vld [vmem:[#allocation3 + $0x690] sm:$0xf0]  ;;  %v6578_v62 = vor.u32 %v7679_v28, %v6575_v16  ;;  %v7566_v5 = vld [vmem:[#allocation3 + $0x1f4] sm:$0xf0] }
 0x3ba   :  { %3659 = vmatpush.bf16.msra.mxu1 %v6258_v6  ;;  %3634 = vmatmul.bf16.vlgmr.msrb.gmra.mxu3 %v8669_v31  ;;  %v7643_v13 = vld [vmem:[#allocation3 + $0x464] sm:$0xf]  ;;  %v6431_v19 = vld [vmem:[#allocation3 + $0x470] sm:$0xf0]  ;;  %v6706_v32 = vor.u32 %v7711_v9, %v6703_v22  ;;  %v6245_v22 = vld [vmem:[#allocation3 + $0x2e8] sm:$0xf] }
 0x3bb   :  { %3647 = vmatmul.bf16.vlgmr.msra.gmra.mxu0 %v8673_v37  ;;  %v7743_v25 = vld [vmem:[#allocation3 + $0x784] sm:$0xf]  ;;  %v6831_v27 = vld [vmem:[#allocation3 + $0x790] sm:$0xf0]  ;;  %v6434_v41 = vor.u32 %v7643_v13, %v6431_v19 }
 0x3bc   :  { %3691 = vmatpush.bf16.msrb.mxu0 %v6754_v49  ;;  %3666 = vmatpush.bf16.msra.mxu2 %v6482_v3  ;;  %v7675_v35 = vld [vmem:[#allocation3 + $0x564] sm:$0xf]  ;;  %v6559_v56 = vld [vmem:[#allocation3 + $0x570] sm:$0xf0]  ;;  %v6834_v43 = vor.u32 %v7743_v25, %v6831_v27  ;;  %v5973_v25 = vld [vmem:[#allocation3 + $0xc8] sm:$0xf]  ;;  %v6118_v27 = vor.u32 %v7566_v5, %v6117_v50 }
 0x3bd   :  { %3679 = vmatpush.bf16.msra.mxu3 %v6610_v24  ;;  %3660 = vmatmul.bf16.vlgmr.msra.gmra.mxu1 %v8677_v61  ;;  %v7707_v36 = vld [vmem:[#allocation3 + $0x664] sm:$0xf]  ;;  %v6687_v57 = vld [vmem:[#allocation3 + $0x670] sm:$0xf0]  ;;  %v6562_v39 = vor.u32 %v7675_v35, %v6559_v56  ;;  %v7530_v35 = vld [vmem:[#allocation3 + $0xd4] sm:$0xf0] }
 0x3be   :  { %3704 = vmatpush.bf16.msrb.mxu1 %v6882_v4  ;;  %v7639_v18 = vld [vmem:[#allocation3 + $0x444] sm:$0xf]  ;;  %v6415_v45 = vld [vmem:[#allocation3 + $0x450] sm:$0xf0]  ;;  %v6690_v20 = vor.u32 %v7707_v36, %v6687_v57  ;;  %v6373_v56 = vld [vmem:[#allocation3 + $0x3e8] sm:$0xf] }
 0x3bf   :  { %v7739_v46 = vld [vmem:[#allocation3 + $0x764] sm:$0xf]  ;;  %v6815_v23 = vld [vmem:[#allocation3 + $0x770] sm:$0xf0]  ;;  %v6418_v48 = vor.u32 %v7639_v18, %v6415_v45  ;;  %v7630_v36 = vld [vmem:[#allocation3 + $0x3f4] sm:$0xf0] }
 0x3c0   :  { %3692 = vmatpush.bf16.msrb.mxu0 %v6738_v53  ;;  %3667 = vmatpush.bf16.msra.mxu2 %v6466_v33  ;;  %v7671_v58 = vld [vmem:[#allocation3 + $0x544] sm:$0xf]  ;;  %v6543_v47 = vld [vmem:[#allocation3 + $0x550] sm:$0xf0]  ;;  %v6818_v49 = vor.u32 %v7739_v46, %v6815_v23  ;;  %v7594_v45 = vld [vmem:[#allocation3 + $0x2d4] sm:$0xf0]  ;;  %v5974_v46 = vor.u32 %v7530_v35, %v5973_v25  ;;  %v6374_v23 = vor.u32 %v7630_v36, %v6373_v56 }
 0x3c1   :  { %3680 = vmatpush.bf16.msra.mxu3 %v6594_v11  ;;  %v7703_v15 = vld [vmem:[#allocation3 + $0x644] sm:$0xf]  ;;  %v6671_v2 = vld [vmem:[#allocation3 + $0x650] sm:$0xf0]  ;;  %v6546_v52 = vor.u32 %v7671_v58, %v6543_v47  ;;  %v5989_v11 = vld [vmem:[#allocation3 + $0xe8] sm:$0xf] }
 0x3c2   :  { %3705 = vmatpush.bf16.msrb.mxu1 %v6866_v60  ;;  %v7635_v21 = vld [vmem:[#allocation3 + $0x424] sm:$0xf]  ;;  %v6399_v6 = vld [vmem:[#allocation3 + $0x430] sm:$0xf0]  ;;  %v6674_v3 = vor.u32 %v7703_v15, %v6671_v2  ;;  %v5990_v13 = vor.u32 %v7534_v30, %v5989_v11  ;;  %v7526_v47 = vld [vmem:[#allocation3 + $0xb4] sm:$0xf0] }
 0x3c3   :  { %v7735_v7 = vld [vmem:[#allocation3 + $0x744] sm:$0xf]  ;;  %v6799_v26 = vld [vmem:[#allocation3 + $0x750] sm:$0xf0]  ;;  %v6402_v51 = vor.u32 %v7635_v21, %v6399_v6  ;;  %v6357_v15 = vld [vmem:[#allocation3 + $0x3c8] sm:$0xf] }
 0x3c4   :  { %3693 = vmatpush.bf16.msrb.mxu0 %v6722_v8  ;;  %3668 = vmatpush.bf16.msra.mxu2 %v6450_v12  ;;  %v7667_v4 = vld [vmem:[#allocation3 + $0x524] sm:$0xf]  ;;  %v6527_v38 = vld [vmem:[#allocation3 + $0x530] sm:$0xf0]  ;;  %v6802_v17 = vor.u32 %v7735_v7, %v6799_v26  ;;  %v7598_v12 = vld [vmem:[#allocation3 + $0x2f4] sm:$0xf0] }
 0x3c5   :  { %3681 = vmatpush.bf16.msra.mxu3 %v6578_v62  ;;  %v7699_v24 = vld [vmem:[#allocation3 + $0x624] sm:$0xf]  ;;  %v6655_v1 = vld [vmem:[#allocation3 + $0x630] sm:$0xf0]  ;;  %v6530_v10 = vor.u32 %v7667_v4, %v6527_v38  ;;  %v6246_v57 = vor.u32 %v7598_v12, %v6245_v22  ;;  %v7626_v2 = vld [vmem:[#allocation3 + $0x3d4] sm:$0xf0] }
 0x3c6   :  { %3706 = vmatpush.bf16.msrb.mxu1 %v6850_v44  ;;  %v7631_v53 = vld [vmem:[#allocation3 + $0x404] sm:$0xf]  ;;  %v6383_v29 = vld [vmem:[#allocation3 + $0x410] sm:$0xf0]  ;;  %v6658_v63 = vor.u32 %v7699_v24, %v6655_v1  ;;  %v7558_v21 = vld [vmem:[#allocation3 + $0x1b4] sm:$0xf0]  ;;  %v6358_v26 = vor.u32 %v7626_v2, %v6357_v15 }
 0x3c7   :  { %v7663_v55 = vld [vmem:[#allocation3 + $0x504] sm:$0xf]  ;;  %v6511_v59 = vld [vmem:[#allocation3 + $0x510] sm:$0xf0]  ;;  %v6386_v16 = vor.u32 %v7631_v53, %v6383_v29  ;;  %v7590_v6 = vld [vmem:[#allocation3 + $0x2b4] sm:$0xf0] }
 0x3c8   :  { %3694 = vmatpush.bf16.msrb.mxu0 %v6706_v32  ;;  %3669 = vmatpush.bf16.msra.mxu2 %v6434_v41  ;;  %v7731_v33 = vld [vmem:[#allocation3 + $0x724] sm:$0xf]  ;;  %v6783_v60 = vld [vmem:[#allocation3 + $0x730] sm:$0xf0]  ;;  %v6514_v44 = vor.u32 %v7663_v55, %v6511_v59  ;;  %v6101_v41 = vld [vmem:[#allocation3 + $0x1c8] sm:$0xf] }
 0x3c9   :  { %3682 = vmatpush.bf16.msra.mxu3 %v6562_v39  ;;  %v7695_v8 = vld [vmem:[#allocation3 + $0x604] sm:$0xf]  ;;  %v6639_v28 = vld [vmem:[#allocation3 + $0x610] sm:$0xf0]  ;;  %v6786_v9 = vor.u32 %v7731_v33, %v6783_v60  ;;  %v6229_v39 = vld [vmem:[#allocation3 + $0x2c8] sm:$0xf] }
 0x3ca   :  { %3707 = vmatpush.bf16.msrb.mxu1 %v6834_v43  ;;  %v7727_v62 = vld [vmem:[#allocation3 + $0x704] sm:$0xf]  ;;  %v6767_v19 = vld [vmem:[#allocation3 + $0x710] sm:$0xf0]  ;;  %v6642_v32 = vor.u32 %v7695_v8, %v6639_v28  ;;  %v7562_v43 = vld [vmem:[#allocation3 + $0x1d4] sm:$0xf0] }
 0x3cb   :  { %v6770_v18 = vor.u32 %v7727_v62, %v6767_v19  ;;  %v6102_v58 = vor.u32 %v7562_v43, %v6101_v41  ;;  %v7522_v38 = vld [vmem:[#allocation3 + $0x94] sm:$0xf0]  ;;  %v6341_v24 = vld [vmem:[#allocation3 + $0x3a8] sm:$0xf] }
 0x3cc   :  { %3695 = vmatpush.bf16.msrb.mxu0 %v6690_v20  ;;  %3670 = vmatpush.bf16.msra.mxu2 %v6418_v48  ;;  %v5957_v20 = vld [vmem:[#allocation3 + $0xa8] sm:$0xf]  ;;  %v6230_v48 = vor.u32 %v7594_v45, %v6229_v39  ;;  %v7622_v1 = vld [vmem:[#allocation3 + $0x3b4] sm:$0xf0] }
 0x3cd   :  { %3683 = vmatpush.bf16.msra.mxu3 %v6546_v52  ;;  %v6213_v52 = vld [vmem:[#allocation3 + $0x2a8] sm:$0xf]  ;;  %v5958_v7 = vor.u32 %v7526_v47, %v5957_v20  ;;  %v7554_v53 = vld [vmem:[#allocation3 + $0x194] sm:$0xf0]  ;;  %v6342_v59 = vor.u32 %v7622_v1, %v6341_v24 }
 0x3ce   :  { %3708 = vmatpush.bf16.msrb.mxu1 %v6818_v49  ;;  %v6085_v49 = vld [vmem:[#allocation3 + $0x1a8] sm:$0xf]  ;;  %v7586_v55 = vld [vmem:[#allocation3 + $0x294] sm:$0xf0] }
 0x3cf   :  { %v6086_v4 = vor.u32 %v7558_v21, %v6085_v49  ;;  %v6197_v29 = vld [vmem:[#allocation3 + $0x288] sm:$0xf]  ;;  %v7618_v30 = vld [vmem:[#allocation3 + $0x394] sm:$0xf0] }
 0x3d0   :  { %3696 = vmatpush.bf16.msrb.mxu0 %v6674_v3  ;;  %3671 = vmatpush.bf16.msra.mxu2 %v6402_v51  ;;  %v5941_v3 = vld [vmem:[#allocation3 + $0x88] sm:$0xf]  ;;  %v6214_v51 = vor.u32 %v7590_v6, %v6213_v52  ;;  %v6198_v50 = vor.u32 %v7586_v55, %v6197_v29  ;;  %v7550_v8 = vld [vmem:[#allocation3 + $0x174] sm:$0xf0] }
 0x3d1   :  { %3684 = vmatpush.bf16.msra.mxu3 %v6530_v10  ;;  %v5942_v10 = vor.u32 %v7522_v38, %v5941_v3  ;;  %v5925_v33 = vld [vmem:[#allocation3 + $0x68] sm:$0xf]  ;;  %v7614_v19 = vld [vmem:[#allocation3 + $0x374] sm:$0xf0] }
 0x3d2   :  { %3709 = vmatpush.bf16.msrb.mxu1 %v6802_v17  ;;  %v6069_v17 = vld [vmem:[#allocation3 + $0x188] sm:$0xf]  ;;  %v7578_v56 = vld [vmem:[#allocation3 + $0x254] sm:$0xf0] }
 0x3d3   :  { %v6070_v60 = vor.u32 %v7554_v53, %v6069_v17  ;;  %v6325_v11 = vld [vmem:[#allocation3 + $0x388] sm:$0xf]  ;;  %v7610_v45 = vld [vmem:[#allocation3 + $0x354] sm:$0xf0] }
 0x3d4   :  { %3697 = vmatpush.bf16.msrb.mxu0 %v6658_v63  ;;  %3672 = vmatpush.bf16.msra.mxu2 %v6386_v16  ;;  %v7518_v63 = vld [vmem:[#allocation3 + $0x74] sm:$0xf0]  ;;  %v6053_v5 = vld [vmem:[#allocation3 + $0x168] sm:$0xf]  ;;  %v6326_v22 = vor.u32 %v7618_v30, %v6325_v11 }
 0x3d5   :  { %3685 = vmatpush.bf16.msra.mxu3 %v6514_v44  ;;  %v6181_v28 = vld [vmem:[#allocation3 + $0x268] sm:$0xf]  ;;  %v7582_v16 = vld [vmem:[#allocation3 + $0x274] sm:$0xf0]  ;;  %v6054_v44 = vor.u32 %v7550_v8, %v6053_v5 }
 0x3d6   :  { %3710 = vmatpush.bf16.msrb.mxu1 %v6786_v9  ;;  %v5926_v9 = vor.u32 %v7518_v63, %v5925_v33  ;;  %v5909_v12 = vld [vmem:[#allocation3 + $0x48] sm:$0xf]  ;;  %v6182_v25 = vor.u32 %v7582_v16, %v6181_v28  ;;  %v7542_v20 = vld [vmem:[#allocation3 + $0x134] sm:$0xf0] }
 0x3d7   :  { %3673 = vmatmul.bf16.vlgmr.msra.gmra.mxu2 %v8685_v54  ;;  %v6309_v62 = vld [vmem:[#allocation3 + $0x368] sm:$0xf]  ;;  %v7574_v47 = vld [vmem:[#allocation3 + $0x234] sm:$0xf0] }
 0x3d8   :  { %3717 = vmatpush.bf16.msrb.mxu2 %v5990_v13  ;;  %3698 = vmatpush.bf16.msrb.mxu0 %v6642_v32  ;;  %v7514_v13 = vld [vmem:[#allocation3 + $0x54] sm:$0xf0]  ;;  %v6165_v35 = vld [vmem:[#allocation3 + $0x248] sm:$0xf] }
 0x3d9   :  { %3730 = vmatpush.bf16.msrb.mxu3 %v6118_v27  ;;  %v6037_v27 = vld [vmem:[#allocation3 + $0x148] sm:$0xf]  ;;  %v7546_v32 = vld [vmem:[#allocation3 + $0x154] sm:$0xf0]  ;;  %v5910_v36 = vor.u32 %v7514_v13, %v5909_v12 }
 0x3da   :  { %3711 = vmatpush.bf16.msrb.mxu1 %v6770_v18  ;;  %3686 = vmatmul.bf16.vlgmr.msra.gmra.mxu3 %v8689_v34  ;;  %v5893_v41 = vld [vmem:[#allocation3 + $0x28] sm:$0xf]  ;;  %v6038_v43 = vor.u32 %v7546_v32, %v6037_v27  ;;  %v7510_v18 = vld [vmem:[#allocation3 + $0x34] sm:$0xf0] }
 0x3db   :  { %3699 = vmatmul.bf16.vlgmr.msrb.gmra.mxu0 %v8693_v40  ;;  %v6293_v39 = vld [vmem:[#allocation3 + $0x348] sm:$0xf]  ;;  %v5894_v15 = vor.u32 %v7510_v18, %v5893_v41  ;;  %v7506_v49 = vld [vmem:[#allocation3 + $0x14] sm:$0xf0] }
 0x3dc   :  { %3743 = vmatpush.bf16.msra.mxu0 %v6246_v57  ;;  %3718 = vmatpush.bf16.msrb.mxu2 %v5974_v46  ;;  %v6310_v57 = vor.u32 %v7614_v19, %v6309_v62  ;;  %v6166_v46 = vor.u32 %v7578_v56, %v6165_v35  ;;  %v6294_v2 = vor.u32 %v7610_v45, %v6293_v39  ;;  %v6005_v21 = vld [vmem:[#allocation3 + $0x108] sm:$0xf]  ;;  %v7538_v6 = vld [vmem:[#allocation3 + $0x114] sm:$0xf0] }
 0x3dd   :  { %3731 = vmatpush.bf16.msrb.mxu3 %v6102_v58  ;;  %3712 = vmatmul.bf16.vlgmr.msrb.gmra.mxu1 %v8698_v0  ;;  %v6149_v58 = vld [vmem:[#allocation3 + $0x228] sm:$0xf]  ;;  %v7662_v38 = vld [vmem:[#allocation3 + $0x4f4] sm:$0xf0] }
 0x3de   :  { %3756 = vmatpush.bf16.msra.mxu1 %v6374_v23  ;;  %v6021_v23 = vld [vmem:[#allocation3 + $0x128] sm:$0xf]  ;;  %v6150_v3 = vor.u32 %v7574_v47, %v6149_v58  ;;  %v7694_v1 = vld [vmem:[#allocation3 + $0x5f4] sm:$0xf0] }
 0x3df   :  { %v6022_v52 = vor.u32 %v7542_v20, %v6021_v23  ;;  %v6629_v24 = vld [vmem:[#allocation3 + $0x5e8] sm:$0xf]  ;;  %v7570_v17 = vld [vmem:[#allocation3 + $0x214] sm:$0xf0] }
 0x3e0   :  { %3744 = vmatpush.bf16.msra.mxu0 %v6230_v48  ;;  %3719 = vmatpush.bf16.msrb.mxu2 %v5958_v7  ;;  %v5877_v48 = vld [vmem:[#allocation3 + $0x8] sm:$0xf]  ;;  %v7602_v63 = vld [vmem:[#allocation3 + $0x314] sm:$0xf0]  ;;  %v6630_v30 = vor.u32 %v7694_v1, %v6629_v24 }
 0x3e1   :  { %3732 = vmatpush.bf16.msrb.mxu3 %v6086_v4  ;;  %v6277_v7 = vld [vmem:[#allocation3 + $0x328] sm:$0xf]  ;;  %v5878_v53 = vor.u32 %v7506_v49, %v5877_v48  ;;  %v7658_v5 = vld [vmem:[#allocation3 + $0x4d4] sm:$0xf0] }
 0x3e2   :  { %3757 = vmatpush.bf16.msra.mxu1 %v6358_v26  ;;  %v7606_v26 = vld [vmem:[#allocation3 + $0x334] sm:$0xf0]  ;;  %v6501_v4 = vld [vmem:[#allocation3 + $0x4e8] sm:$0xf] }
 0x3e3   :  { %v6278_v29 = vor.u32 %v7606_v26, %v6277_v7  ;;  %v6757_v55 = vld [vmem:[#allocation3 + $0x6e8] sm:$0xf]  ;;  %v6502_v33 = vor.u32 %v7662_v38, %v6501_v4  ;;  %v7758_v28 = vld [vmem:[#allocation3 + $0x7f4] sm:$0xf0] }
 0x3e4   :  { %3745 = vmatpush.bf16.msra.mxu0 %v6214_v51  ;;  %3720 = vmatpush.bf16.msrb.mxu2 %v5942_v10  ;;  %v6133_v51 = vld [vmem:[#allocation3 + $0x208] sm:$0xf]  ;;  %v7726_v10 = vld [vmem:[#allocation3 + $0x6f4] sm:$0xf0] }
 0x3e5   :  { %3733 = vmatpush.bf16.msrb.mxu3 %v6070_v60  ;;  %v6261_v60 = vld [vmem:[#allocation3 + $0x308] sm:$0xf]  ;;  %v6758_v16 = vor.u32 %v7726_v10, %v6757_v55  ;;  %v7722_v13 = vld [vmem:[#allocation3 + $0x6d4] sm:$0xf0] }
 0x3e6   :  { %3758 = vmatpush.bf16.msra.mxu1 %v6342_v59  ;;  %v6006_v59 = vor.u32 %v7538_v6, %v6005_v21  ;;  %v6485_v11 = vld [vmem:[#allocation3 + $0x4c8] sm:$0xf]  ;;  %v6262_v12 = vor.u32 %v7602_v63, %v6261_v60  ;;  %v7654_v32 = vld [vmem:[#allocation3 + $0x4b4] sm:$0xf0] }
 0x3e7   :  { %v6885_v8 = vld [vmem:[#allocation3 + $0x7e8] sm:$0xf]  ;;  %v6486_v62 = vor.u32 %v7658_v5, %v6485_v11  ;;  %v7754_v56 = vld [vmem:[#allocation3 + $0x7d4] sm:$0xf0] }
 0x3e8   :  { %3746 = vmatpush.bf16.msra.mxu0 %v6198_v50  ;;  %3721 = vmatpush.bf16.msrb.mxu2 %v5926_v9  ;;  %v6134_v50 = vor.u32 %v7570_v17, %v6133_v51  ;;  %v6613_v9 = vld [vmem:[#allocation3 + $0x5c8] sm:$0xf]  ;;  %v6886_v19 = vor.u32 %v7758_v28, %v6885_v8  ;;  %v7686_v41 = vld [vmem:[#allocation3 + $0x5b4] sm:$0xf0] }
 0x3e9   :  { %3734 = vmatpush.bf16.msrb.mxu3 %v6054_v44  ;;  %v6741_v44 = vld [vmem:[#allocation3 + $0x6c8] sm:$0xf]  ;;  %v7718_v18 = vld [vmem:[#allocation3 + $0x6b4] sm:$0xf0] }
 0x3ea   :  { %3759 = vmatpush.bf16.msra.mxu1 %v6326_v22  ;;  %v7690_v22 = vld [vmem:[#allocation3 + $0x5d4] sm:$0xf0]  ;;  %v6869_v35 = vld [vmem:[#allocation3 + $0x7c8] sm:$0xf] }
 0x3eb   :  { %v6614_v27 = vor.u32 %v7690_v22, %v6613_v9  ;;  %v6870_v45 = vor.u32 %v7754_v56, %v6869_v35  ;;  %v7650_v20 = vld [vmem:[#allocation3 + $0x494] sm:$0xf0]  ;;  %v6853_v58 = vld [vmem:[#allocation3 + $0x7a8] sm:$0xf] }
 0x3ec   :  { %3747 = vmatpush.bf16.msra.mxu0 %v6182_v25  ;;  %3722 = vmatpush.bf16.msrb.mxu2 %v5910_v36  ;;  %v6469_v25 = vld [vmem:[#allocation3 + $0x4a8] sm:$0xf]  ;;  %v6742_v36 = vor.u32 %v7722_v13, %v6741_v44  ;;  %v7750_v47 = vld [vmem:[#allocation3 + $0x7b4] sm:$0xf0] }
 0x3ed   :  { %3735 = vmatpush.bf16.msrb.mxu3 %v6038_v43  ;;  %v6725_v43 = vld [vmem:[#allocation3 + $0x6a8] sm:$0xf]  ;;  %v6470_v39 = vor.u32 %v7654_v32, %v6469_v25  ;;  %v7682_v48 = vld [vmem:[#allocation3 + $0x594] sm:$0xf0]  ;;  %v6854_v6 = vor.u32 %v7750_v47, %v6853_v58 }
 0x3ee   :  { %3760 = vmatpush.bf16.msra.mxu1 %v6310_v57  ;;  %v6597_v57 = vld [vmem:[#allocation3 + $0x5a8] sm:$0xf]  ;;  %v7714_v21 = vld [vmem:[#allocation3 + $0x694] sm:$0xf0] }
 0x3ef   :  { %v6598_v23 = vor.u32 %v7686_v41, %v6597_v57  ;;  %v6709_v49 = vld [vmem:[#allocation3 + $0x688] sm:$0xf]  ;;  %v7746_v38 = vld [vmem:[#allocation3 + $0x794] sm:$0xf0] }
 0x3f0   :  { %3748 = vmatpush.bf16.msra.mxu0 %v6166_v46  ;;  %3723 = vmatpush.bf16.msrb.mxu2 %v5894_v15  ;;  %v6453_v46 = vld [vmem:[#allocation3 + $0x488] sm:$0xf]  ;;  %v6726_v15 = vor.u32 %v7718_v18, %v6725_v43  ;;  %v6710_v24 = vor.u32 %v7714_v21, %v6709_v49  ;;  %v7678_v51 = vld [vmem:[#allocation3 + $0x574] sm:$0xf0]  ;;  %v7532_v21 = vld [vmem:[#allocation3 + $0xec] sm:$0xf] }
 0x3f1   :  { %3736 = vmatpush.bf16.msrb.mxu3 %v6022_v52  ;;  %v6454_v52 = vor.u32 %v7650_v20, %v6453_v46  ;;  %v6437_v7 = vld [vmem:[#allocation3 + $0x468] sm:$0xf]  ;;  %v7642_v60 = vld [vmem:[#allocation3 + $0x454] sm:$0xf0] }
 0x3f2   :  { %3761 = vmatpush.bf16.msra.mxu1 %v6294_v2  ;;  %v6581_v2 = vld [vmem:[#allocation3 + $0x588] sm:$0xf]  ;;  %v7742_v11 = vld [vmem:[#allocation3 + $0x774] sm:$0xf0] }
 0x3f3   :  { %v6582_v26 = vor.u32 %v7682_v48, %v6581_v2  ;;  %v6837_v4 = vld [vmem:[#allocation3 + $0x788] sm:$0xf]  ;;  %v7674_v5 = vld [vmem:[#allocation3 + $0x554] sm:$0xf0] }
 0x3f4   :  { %3749 = vmatpush.bf16.msra.mxu0 %v6150_v3  ;;  %3724 = vmatpush.bf16.msrb.mxu2 %v5878_v53  ;;  %v7646_v3 = vld [vmem:[#allocation3 + $0x474] sm:$0xf0]  ;;  %v6565_v1 = vld [vmem:[#allocation3 + $0x568] sm:$0xf]  ;;  %v6838_v55 = vor.u32 %v7746_v38, %v6837_v4 }
 0x3f5   :  { %3737 = vmatpush.bf16.msrb.mxu3 %v6006_v59  ;;  %v6693_v17 = vld [vmem:[#allocation3 + $0x668] sm:$0xf]  ;;  %v7710_v53 = vld [vmem:[#allocation3 + $0x674] sm:$0xf0]  ;;  %v8718_v59 = vld [vmem:[%s8951_s9 + $0xc] sm:$0xf] }
 0x3f6   :  { %3762 = vmatpush.bf16.msra.mxu1 %v6278_v29  ;;  %v6438_v29 = vor.u32 %v7646_v3, %v6437_v7  ;;  %v6421_v10 = vld [vmem:[#allocation3 + $0x448] sm:$0xf]  ;;  %v2221_v9 = vperm.slane %v8718_v59, 0  ;;  %v7670_v56 = vld [vmem:[#allocation3 + $0x534] sm:$0xf0] }
 0x3f7   :  { %3725 = vmatmul.bf16.vlgmr.msrb.gmra.mxu2 %v8665_v14  ;;  %v6821_v63 = vld [vmem:[#allocation3 + $0x768] sm:$0xf]  ;;  %v7702_v41 = vld [vmem:[#allocation3 + $0x634] sm:$0xf0] }
 0x3f8   :  { %3769 = vmatpush.bf16.msra.mxu2 %v6502_v33  ;;  %3750 = vmatpush.bf16.msra.mxu0 %v6134_v50  ;;  %v6566_v33 = vor.u32 %v7678_v51, %v6565_v1  ;;  %v6549_v50 = vld [vmem:[#allocation3 + $0x548] sm:$0xf]  ;;  %v3544_v8 = vpop.f32.mrf.mxu0  ;;  %v6822_v44 = vor.u32 %v7742_v11, %v6821_v63  ;;  %v7666_v47 = vld [vmem:[#allocation3 + $0x514] sm:$0xf0] }
 0x3f9   :  { %3782 = vmatpush.bf16.msra.mxu3 %v6630_v30  ;;  %v6694_v30 = vor.u32 %v7710_v53, %v6693_v17  ;;  %v6677_v28 = vld [vmem:[#allocation3 + $0x648] sm:$0xf]  ;;  %v7734_v2 = vld [vmem:[#allocation3 + $0x734] sm:$0xf0]  ;;  %v7596_v17 = vld [vmem:[#allocation3 + $0x2ec] sm:$0xf] }
 0x3fa   :  { %3763 = vmatpush.bf16.msra.mxu1 %v6262_v12  ;;  %3738 = vmatmul.bf16.vlgmr.msrb.gmra.mxu3 %v8669_v31  ;;  %v3557_v22 = vpop.f32.mrf.mxu1  ;;  %v6422_v12 = vor.u32 %v7642_v60, %v6421_v10  ;;  %v6405_v13 = vld [vmem:[#allocation3 + $0x428] sm:$0xf]  ;;  %v7698_v4 = vld [vmem:[#allocation3 + $0x614] sm:$0xf0]  ;;  %v6247_v53 = vld [vmem:[#allocation3 + $0x2f8] sm:$0xf0] }
 0x3fb   :  { %3751 = vmatmul.bf16.vlgmr.msra.gmra.mxu0 %v8673_v37  ;;  %v6805_v25 = vld [vmem:[#allocation3 + $0x748] sm:$0xf]  ;;  %v7528_v60 = vld [vmem:[#allocation3 + $0xcc] sm:$0xf] }
 0x3fc   :  { %3795 = vmatpush.bf16.msrb.mxu0 %v6758_v16  ;;  %3770 = vmatpush.bf16.msra.mxu2 %v6486_v62  ;;  %v7706_v16 = vld [vmem:[#allocation3 + $0x654] sm:$0xf0]  ;;  %v6550_v62 = vor.u32 %v7674_v5, %v6549_v50  ;;  %v6533_v35 = vld [vmem:[#allocation3 + $0x528] sm:$0xf]  ;;  %v5975_v50 = vld [vmem:[#allocation3 + $0xd8] sm:$0xf0] }
 0x3fd   :  { %3783 = vmatpush.bf16.msra.mxu3 %v6614_v27  ;;  %3764 = vmatmul.bf16.vlgmr.msra.gmra.mxu1 %v8677_v61  ;;  %v7738_v27 = vld [vmem:[#allocation3 + $0x754] sm:$0xf0]  ;;  %v6678_v32 = vor.u32 %v7706_v16, %v6677_v28  ;;  %v6661_v57 = vld [vmem:[#allocation3 + $0x628] sm:$0xf]  ;;  %v3531_v18 = vpop.f32.mrf.mxu3  ;;  %v6534_v58 = vor.u32 %v7670_v56, %v6533_v35  ;;  %v7628_v5 = vld [vmem:[#allocation3 + $0x3ec] sm:$0xf]  ;;  %v6250_v16 = vor.u32 %v7596_v17, %v6247_v53 }
 0x3fe   :  { %3808 = vmatpush.bf16.msrb.mxu1 %v6886_v19  ;;  %v7638_v19 = vld [vmem:[#allocation3 + $0x434] sm:$0xf0]  ;;  %v6389_v46 = vld [vmem:[#allocation3 + $0x408] sm:$0xf]  ;;  %v6662_v49 = vor.u32 %v7702_v41, %v6661_v57  ;;  %v5959_v35 = vld [vmem:[#allocation3 + $0xb8] sm:$0xf0] }
 0x3ff   :  { %v6517_v20 = vld [vmem:[#allocation3 + $0x508] sm:$0xf]  ;;  %v7624_v56 = vld [vmem:[#allocation3 + $0x3cc] sm:$0xf]  ;;  %v6055_v17 = vld [vmem:[#allocation3 + $0x178] sm:$0xf0] }
 0x400   :  { %3796 = vmatpush.bf16.msrb.mxu0 %v6742_v36  ;;  %3771 = vmatpush.bf16.msra.mxu2 %v6470_v39  ;;  %v3518_v36 = vpop.f32.mrf.mxu2  ;;  %v6406_v39 = vor.u32 %v7638_v19, %v6405_v13  ;;  %v3546_v7 = vpop.f32.mrf.mxu0  ;;  %v6645_v3 = vld [vmem:[#allocation3 + $0x608] sm:$0xf]  ;;  %v6231_v19 = vld [vmem:[#allocation3 + $0x2d8] sm:$0xf0]  ;;  %v7556_v41 = vld [vmem:[#allocation3 + $0x1ac] sm:$0xf] }
 0x401   :  { %3784 = vmatpush.bf16.msra.mxu3 %v6598_v23  ;;  %v3519_v43 = vadd.f32 %v3518_v36, %v2221_v9  ;;  %v7634_v23 = vld [vmem:[#allocation3 + $0x414] sm:$0xf0]  ;;  %v6773_v10 = vld [vmem:[#allocation3 + $0x708] sm:$0xf]  ;;  %v7560_v9 = vld [vmem:[#allocation3 + $0x1cc] sm:$0xf] }
 0x402   :  { %3809 = vmatpush.bf16.msrb.mxu1 %v6870_v45  ;;  %v6806_v45 = vor.u32 %v7738_v27, %v6805_v25  ;;  %v6390_v1 = vor.u32 %v7634_v23, %v6389_v46  ;;  %v7524_v27 = vld [vmem:[#allocation3 + $0xac] sm:$0xf]  ;;  %v6359_v36 = vld [vmem:[#allocation3 + $0x3d8] sm:$0xf0] }
 0x403   :  { %v3532_v48 = vadd.f32 %v3531_v18, %v3519_v43  ;;  %v6087_v43 = vld [vmem:[#allocation3 + $0x1b8] sm:$0xf0]  ;;  %v7588_v18 = vld [vmem:[#allocation3 + $0x2ac] sm:$0xf]  ;;  %v6362_v46 = vor.u32 %v7624_v56, %v6359_v36 }
 0x404   :  { %3797 = vmatpush.bf16.msrb.mxu0 %v6726_v15  ;;  %3772 = vmatpush.bf16.msra.mxu2 %v6454_v52  ;;  %v6789_v15 = vld [vmem:[#allocation3 + $0x728] sm:$0xf]  ;;  %v5991_v52 = vld [vmem:[#allocation3 + $0xf8] sm:$0xf0]  ;;  %v7520_v23 = vld [vmem:[#allocation3 + $0x8c] sm:$0xf] }
 0x405   :  { %3785 = vmatpush.bf16.msra.mxu3 %v6582_v26  ;;  %v6119_v26 = vld [vmem:[#allocation3 + $0x1f8] sm:$0xf0]  ;;  %v3545_v38 = vadd.f32 %v3544_v8, %v3532_v48  ;;  %v6790_v51 = vor.u32 %v7734_v2, %v6789_v15  ;;  %v7552_v48 = vld [vmem:[#allocation3 + $0x18c] sm:$0xf] }
 0x406   :  { %3810 = vmatpush.bf16.msrb.mxu1 %v6854_v6  ;;  %v7564_v6 = vld [vmem:[#allocation3 + $0x1ec] sm:$0xf]  ;;  %v6375_v8 = vld [vmem:[#allocation3 + $0x3f8] sm:$0xf0] }
 0x407   :  { %v8721_v63 = vadd.f32 %v3557_v22, %v3545_v38  ;;  %v6122_v11 = vor.u32 %v7564_v6, %v6119_v26  ;;  %v5978_v22 = vor.u32 %v7528_v60, %v5975_v50  ;;  %v6378_v25 = vor.u32 %v7628_v5, %v6375_v8  ;;  %v6343_v15 = vld [vmem:[#allocation3 + $0x3b8] sm:$0xf0]  ;;  %v7516_v26 = vld [vmem:[#allocation3 + $0x6c] sm:$0xf] }
 0x408   :  { %3798 = vmatpush.bf16.msrb.mxu0 %v6710_v24  ;;  %3773 = vmatpush.bf16.msra.mxu2 %v6438_v29  ;;  %v3559_v24 = vpop.f32.mrf.mxu1  ;;  %v6518_v29 = vor.u32 %v7666_v47, %v6517_v20  ;;  %v3520_v28 = vpop.f32.mrf.mxu2  ;;  %v6090_v20 = vor.u32 %v7556_v41, %v6087_v43  ;;  %v7620_v47 = vld [vmem:[#allocation3 + $0x3ac] sm:$0xf]  ;;  %v6311_v50 = vld [vmem:[#allocation3 + $0x378] sm:$0xf0] }
 0x409   :  { %3786 = vmatpush.bf16.msra.mxu3 %v6566_v33  ;;  %v7730_v33 = vld [vmem:[#allocation3 + $0x714] sm:$0xf0]  ;;  %v6346_v7 = vor.u32 %v7620_v47, %v6343_v15  ;;  %v7616_v38 = vld [vmem:[#allocation3 + $0x38c] sm:$0xf]  ;;  %v6327_v24 = vld [vmem:[#allocation3 + $0x398] sm:$0xf0] }
 0x40a   :  { %3811 = vmatpush.bf16.msrb.mxu1 %v6838_v55  ;;  %v5994_v55 = vor.u32 %v7532_v21, %v5991_v52  ;;  %v6774_v13 = vor.u32 %v7730_v33, %v6773_v10  ;;  %v7584_v21 = vld [vmem:[#allocation3 + $0x28c] sm:$0xf]  ;;  %v6199_v52 = vld [vmem:[#allocation3 + $0x298] sm:$0xf0]  ;;  %v6330_v10 = vor.u32 %v7616_v38, %v6327_v24 }
 0x40b   :  { %v7580_v53 = vld [vmem:[#allocation3 + $0x26c] sm:$0xf]  ;;  %v6039_v28 = vld [vmem:[#allocation3 + $0x158] sm:$0xf0] }
 0x40c   :  { %3799 = vmatpush.bf16.msrb.mxu0 %v6694_v30  ;;  %3774 = vmatpush.bf16.msra.mxu2 %v6422_v12  ;;  %v6646_v30 = vor.u32 %v7698_v4, %v6645_v3  ;;  %v6103_v12 = vld [vmem:[#allocation3 + $0x1d8] sm:$0xf0]  ;;  %v7512_v33 = vld [vmem:[#allocation3 + $0x4c] sm:$0xf] }
 0x40d   :  { %3787 = vmatpush.bf16.msra.mxu3 %v6550_v62  ;;  %v7592_v62 = vld [vmem:[#allocation3 + $0x2cc] sm:$0xf]  ;;  %v5927_v4 = vld [vmem:[#allocation3 + $0x78] sm:$0xf0] }
 0x40e   :  { %3812 = vmatpush.bf16.msrb.mxu1 %v6822_v44  ;;  %v3533_v44 = vpop.f32.mrf.mxu3  ;;  %v6234_v57 = vor.u32 %v7592_v62, %v6231_v19  ;;  %v7544_v8 = vld [vmem:[#allocation3 + $0x14c] sm:$0xf]  ;;  %v6023_v43 = vld [vmem:[#allocation3 + $0x138] sm:$0xf0] }
 0x40f   :  { %v7508_v19 = vld [vmem:[#allocation3 + $0x2c] sm:$0xf]  ;;  %v6135_v38 = vld [vmem:[#allocation3 + $0x218] sm:$0xf0] }
 0x410   :  { %3800 = vmatpush.bf16.msrb.mxu0 %v6678_v32  ;;  %3775 = vmatpush.bf16.msra.mxu2 %v6406_v39  ;;  %v6106_v32 = vor.u32 %v7560_v9, %v6103_v12  ;;  %v6215_v39 = vld [vmem:[#allocation3 + $0x2b8] sm:$0xf0]  ;;  %v7576_v9 = vld [vmem:[#allocation3 + $0x24c] sm:$0xf] }
 0x411   :  { %3788 = vmatpush.bf16.msra.mxu3 %v6534_v58  ;;  %v5943_v58 = vld [vmem:[#allocation3 + $0x98] sm:$0xf0]  ;;  %v6218_v2 = vor.u32 %v7588_v18, %v6215_v39  ;;  %v7540_v41 = vld [vmem:[#allocation3 + $0x12c] sm:$0xf] }
 0x412   :  { %3813 = vmatpush.bf16.msrb.mxu1 %v6806_v45  ;;  %v5962_v45 = vor.u32 %v7524_v27, %v5959_v35  ;;  %v5946_v6 = vor.u32 %v7520_v23, %v5943_v58  ;;  %v6167_v12 = vld [vmem:[#allocation3 + $0x258] sm:$0xf0]  ;;  %v7572_v18 = vld [vmem:[#allocation3 + $0x22c] sm:$0xf]  ;;  %v6026_v15 = vor.u32 %v7540_v41, %v6023_v43 }
 0x413   :  { %v5895_v27 = vld [vmem:[#allocation3 + $0x38] sm:$0xf0]  ;;  %v7536_v47 = vld [vmem:[#allocation3 + $0x10c] sm:$0xf] }
 0x414   :  { %3801 = vmatpush.bf16.msrb.mxu0 %v6662_v49  ;;  %3776 = vmatpush.bf16.msra.mxu2 %v6390_v1  ;;  %v6071_v49 = vld [vmem:[#allocation3 + $0x198] sm:$0xf0]  ;;  %v6202_v1 = vor.u32 %v7584_v21, %v6199_v52  ;;  %v7660_v52 = vld [vmem:[#allocation3 + $0x4ec] sm:$0xf] }
 0x415   :  { %3789 = vmatpush.bf16.msra.mxu3 %v6518_v29  ;;  %v6074_v3 = vor.u32 %v7552_v48, %v6071_v49  ;;  %v6183_v29 = vld [vmem:[#allocation3 + $0x278] sm:$0xf0]  ;;  %v7604_v48 = vld [vmem:[#allocation3 + $0x32c] sm:$0xf] }
 0x416   :  { %3814 = vmatpush.bf16.msrb.mxu1 %v6790_v51  ;;  %v7548_v51 = vld [vmem:[#allocation3 + $0x16c] sm:$0xf]  ;;  %v6186_v5 = vor.u32 %v7580_v53, %v6183_v29  ;;  %v6295_v35 = vld [vmem:[#allocation3 + $0x358] sm:$0xf0] }
 0x417   :  { %3777 = vmatmul.bf16.vlgmr.msra.gmra.mxu2 %v8685_v54  ;;  %v6058_v60 = vor.u32 %v7548_v51, %v6055_v17  ;;  %v6151_v39 = vld [vmem:[#allocation3 + $0x238] sm:$0xf0]  ;;  %v7724_v53 = vld [vmem:[#allocation3 + $0x6ec] sm:$0xf] }
 0x418   :  { %3821 = vmatpush.bf16.msrb.mxu2 %v5994_v55  ;;  %3802 = vmatpush.bf16.msrb.mxu0 %v6646_v30  ;;  %v5930_v55 = vor.u32 %v7516_v26, %v5927_v4  ;;  %v7612_v30 = vld [vmem:[#allocation3 + $0x36c] sm:$0xf]  ;;  %v5879_v58 = vld [vmem:[#allocation3 + $0x18] sm:$0xf0]  ;;  %v6154_v21 = vor.u32 %v7572_v18, %v6151_v39 }
 0x419   :  { %3834 = vmatpush.bf16.msrb.mxu3 %v6122_v11  ;;  %v5911_v11 = vld [vmem:[#allocation3 + $0x58] sm:$0xf0]  ;;  %v6314_v62 = vor.u32 %v7612_v30, %v6311_v50  ;;  %v7568_v4 = vld [vmem:[#allocation3 + $0x20c] sm:$0xf] }
 0x41a   :  { %3815 = vmatpush.bf16.msrb.mxu1 %v6774_v13  ;;  %3790 = vmatmul.bf16.vlgmr.msra.gmra.mxu3 %v8689_v34  ;;  %v3609_v44 = vpop.f32.mrf.mxu1  ;;  %v5914_v13 = vor.u32 %v7512_v33, %v5911_v11  ;;  %v6759_v29 = vld [vmem:[#allocation3 + $0x6f8] sm:$0xf0]  ;;  %v7600_v33 = vld [vmem:[#allocation3 + $0x30c] sm:$0xf] }
 0x41b   :  { %3803 = vmatmul.bf16.vlgmr.msrb.gmra.mxu0 %v8693_v40  ;;  %v7656_v11 = vld [vmem:[#allocation3 + $0x4cc] sm:$0xf]  ;;  %v6599_v18 = vld [vmem:[#allocation3 + $0x5b8] sm:$0xf0] }
 0x41c   :  { %3847 = vmatpush.bf16.msra.mxu0 %v6250_v16  ;;  %3822 = vmatpush.bf16.msrb.mxu2 %v5978_v22  ;;  %v3596_v16 = vpop.f32.mrf.mxu0  ;;  %v3570_v22 = vpop.f32.mrf.mxu2  ;;  %v7684_v43 = vld [vmem:[#allocation3 + $0x5ac] sm:$0xf] }
 0x41d   :  { %3835 = vmatpush.bf16.msrb.mxu3 %v6106_v32  ;;  %3816 = vmatmul.bf16.vlgmr.msrb.gmra.mxu1 %v8698_v0  ;;  %v7608_v32 = vld [vmem:[#allocation3 + $0x34c] sm:$0xf]  ;;  %v3571_v56 = vadd.f32 %v3570_v22, %v8721_v63  ;;  %v3583_v36 = vpop.f32.mrf.mxu3  ;;  %v6279_v63 = vld [vmem:[#allocation3 + $0x338] sm:$0xf0] }
 0x41e   :  { %3860 = vmatpush.bf16.msra.mxu1 %v6378_v25  ;;  %v6042_v25 = vor.u32 %v7544_v8, %v6039_v28  ;;  %v6298_v23 = vor.u32 %v7608_v32, %v6295_v35  ;;  %v6282_v17 = vor.u32 %v7604_v48, %v6279_v63  ;;  %v6487_v8 = vld [vmem:[#allocation3 + $0x4d8] sm:$0xf0]  ;;  %v7756_v28 = vld [vmem:[#allocation3 + $0x7ec] sm:$0xf] }
 0x41f   :  { %v6743_v22 = vld [vmem:[#allocation3 + $0x6d8] sm:$0xf0]  ;;  %v7652_v32 = vld [vmem:[#allocation3 + $0x4ac] sm:$0xf] }
 0x420   :  { %3848 = vmatpush.bf16.msra.mxu0 %v6234_v57  ;;  %3823 = vmatpush.bf16.msrb.mxu2 %v5962_v45  ;;  %v6170_v57 = vor.u32 %v7576_v9, %v6167_v12  ;;  %v3584_v45 = vadd.f32 %v3583_v36, %v3571_v56  ;;  %v6762_v12 = vor.u32 %v7724_v53, %v6759_v29  ;;  %v6471_v56 = vld [vmem:[#allocation3 + $0x4b8] sm:$0xf0]  ;;  %v7752_v36 = vld [vmem:[#allocation3 + $0x7cc] sm:$0xf] }
 0x421   :  { %3836 = vmatpush.bf16.msrb.mxu3 %v6090_v20  ;;  %v7504_v20 = vld [vmem:[#allocation3 + $0xc] sm:$0xf]  ;;  %v6583_v63 = vld [vmem:[#allocation3 + $0x598] sm:$0xf0] }
 0x422   :  { %3861 = vmatpush.bf16.msra.mxu1 %v6362_v46  ;;  %v5898_v46 = vor.u32 %v7508_v19, %v5895_v27  ;;  %v3597_v49 = vadd.f32 %v3596_v16, %v3584_v45  ;;  %v3611_v24 = vpop.f32.mrf.mxu1  ;;  %v5882_v51 = vor.u32 %v7504_v20, %v5879_v58  ;;  %v6887_v16 = vld [vmem:[#allocation3 + $0x7f8] sm:$0xf0]  ;;  %v7720_v19 = vld [vmem:[#allocation3 + $0x6cc] sm:$0xf]  ;;  %v6602_v58 = vor.u32 %v7684_v43, %v6599_v18 }
 0x423   :  { %v6890_v27 = vor.u32 %v7756_v28, %v6887_v16  ;;  %v6746_v41 = vor.u32 %v7720_v19, %v6743_v22  ;;  %v7716_v39 = vld [vmem:[#allocation3 + $0x6ac] sm:$0xf]  ;;  %v6727_v45 = vld [vmem:[#allocation3 + $0x6b8] sm:$0xf0] }
 0x424   :  { %3849 = vmatpush.bf16.msra.mxu0 %v6218_v2  ;;  %3824 = vmatpush.bf16.msrb.mxu2 %v5946_v6  ;;  %v6007_v2 = vld [vmem:[#allocation3 + $0x118] sm:$0xf0]  ;;  %v3598_v26 = vpop.f32.mrf.mxu0  ;;  %v3572_v30 = vpop.f32.mrf.mxu2  ;;  %v7648_v20 = vld [vmem:[#allocation3 + $0x48c] sm:$0xf] }
 0x425   :  { %3837 = vmatpush.bf16.msrb.mxu3 %v6074_v3  ;;  %v6503_v6 = vld [vmem:[#allocation3 + $0x4f8] sm:$0xf0]  ;;  %v3585_v9 = vpop.f32.mrf.mxu3  ;;  %v7680_v48 = vld [vmem:[#allocation3 + $0x58c] sm:$0xf] }
 0x426   :  { %3862 = vmatpush.bf16.msra.mxu1 %v6346_v7  ;;  %v7692_v7 = vld [vmem:[#allocation3 + $0x5ec] sm:$0xf]  ;;  %v6631_v3 = vld [vmem:[#allocation3 + $0x5f8] sm:$0xf0] }
 0x427   :  { %v6634_v50 = vor.u32 %v7692_v7, %v6631_v3  ;;  %v6586_v7 = vor.u32 %v7680_v48, %v6583_v63  ;;  %v6439_v26 = vld [vmem:[#allocation3 + $0x478] sm:$0xf0]  ;;  %v7744_v3 = vld [vmem:[#allocation3 + $0x78c] sm:$0xf] }
 0x428   :  { %3850 = vmatpush.bf16.msra.mxu0 %v6202_v1  ;;  %3825 = vmatpush.bf16.msrb.mxu2 %v5930_v55  ;;  %v8728_v1 = vadd.f32 %v3609_v44, %v3597_v49  ;;  %v6010_v55 = vor.u32 %v7536_v47, %v6007_v2  ;;  %v7688_v44 = vld [vmem:[#allocation3 + $0x5cc] sm:$0xf]  ;;  %v6455_v47 = vld [vmem:[#allocation3 + $0x498] sm:$0xf0] }
 0x429   :  { %3838 = vmatpush.bf16.msrb.mxu3 %v6058_v60  ;;  %v6263_v60 = vld [vmem:[#allocation3 + $0x318] sm:$0xf0]  ;;  %v7640_v29 = vld [vmem:[#allocation3 + $0x44c] sm:$0xf] }
 0x42a   :  { %3863 = vmatpush.bf16.msra.mxu1 %v6330_v10  ;;  %v6506_v10 = vor.u32 %v7660_v52, %v6503_v6  ;;  %v6855_v2 = vld [vmem:[#allocation3 + $0x7b8] sm:$0xf0]  ;;  %v7644_v6 = vld [vmem:[#allocation3 + $0x46c] sm:$0xf] }
 0x42b   :  { %v6711_v49 = vld [vmem:[#allocation3 + $0x698] sm:$0xf0]  ;;  %v7672_v30 = vld [vmem:[#allocation3 + $0x54c] sm:$0xf] }
 0x42c   :  { %3851 = vmatpush.bf16.msra.mxu0 %v6186_v5  ;;  %3826 = vmatpush.bf16.msrb.mxu2 %v5914_v13  ;;  %v6138_v5 = vor.u32 %v7568_v4, %v6135_v38  ;;  %v6615_v13 = vld [vmem:[#allocation3 + $0x5d8] sm:$0xf0]  ;;  %v7676_v38 = vld [vmem:[#allocation3 + $0x56c] sm:$0xf] }
 0x42d   :  { %3839 = vmatpush.bf16.msrb.mxu3 %v6042_v25  ;;  %v6490_v25 = vor.u32 %v7656_v11, %v6487_v8  ;;  %v6618_v35 = vor.u32 %v7688_v44, %v6615_v13  ;;  %v6839_v4 = vld [vmem:[#allocation3 + $0x798] sm:$0xf0]  ;;  %v7704_v28 = vld [vmem:[#allocation3 + $0x64c] sm:$0xf] }
 0x42e   :  { %3864 = vmatpush.bf16.msra.mxu1 %v6314_v62  ;;  %v6266_v62 = vor.u32 %v7600_v33, %v6263_v60  ;;  %v6567_v24 = vld [vmem:[#allocation3 + $0x578] sm:$0xf0]  ;;  %v6842_v53 = vor.u32 %v7744_v3, %v6839_v4  ;;  %v7740_v33 = vld [vmem:[#allocation3 + $0x76c] sm:$0xf] }
 0x42f   :  { %v6823_v60 = vld [vmem:[#allocation3 + $0x778] sm:$0xf0]  ;;  %v7636_v13 = vld [vmem:[#allocation3 + $0x42c] sm:$0xf] }
 0x430   :  { %3852 = vmatpush.bf16.msra.mxu0 %v6170_v57  ;;  %3827 = vmatpush.bf16.msrb.mxu2 %v5898_v46  ;;  %v6871_v57 = vld [vmem:[#allocation3 + $0x7d8] sm:$0xf0]  ;;  %v6474_v46 = vor.u32 %v7652_v32, %v6471_v56  ;;  %v6826_v44 = vor.u32 %v7740_v33, %v6823_v60  ;;  %v7736_v22 = vld [vmem:[#allocation3 + $0x74c] sm:$0xf] }
 0x431   :  { %3840 = vmatpush.bf16.msrb.mxu3 %v6026_v15  ;;  %v7748_v15 = vld [vmem:[#allocation3 + $0x7ac] sm:$0xf]  ;;  %v6679_v16 = vld [vmem:[#allocation3 + $0x658] sm:$0xf0] }
 0x432   :  { %3865 = vmatpush.bf16.msra.mxu1 %v6298_v23  ;;  %v6874_v23 = vor.u32 %v7752_v36, %v6871_v57  ;;  %v6858_v52 = vor.u32 %v7748_v15, %v6855_v2  ;;  %v6407_v19 = vld [vmem:[#allocation3 + $0x438] sm:$0xf0]  ;;  %v6682_v32 = vor.u32 %v7704_v28, %v6679_v16  ;;  %v7664_v2 = vld [vmem:[#allocation3 + $0x50c] sm:$0xf] }
 0x433   :  { %v6535_v56 = vld [vmem:[#allocation3 + $0x538] sm:$0xf0]  ;;  %v6410_v18 = vor.u32 %v7636_v13, %v6407_v19  ;;  %v7728_v3 = vld [vmem:[#allocation3 + $0x70c] sm:$0xf] }
 0x434   :  { %3853 = vmatpush.bf16.msra.mxu0 %v6154_v21  ;;  %3828 = vmatpush.bf16.msrb.mxu2 %v5882_v51  ;;  %v6458_v21 = vor.u32 %v7648_v20, %v6455_v47  ;;  %v7708_v51 = vld [vmem:[#allocation3 + $0x66c] sm:$0xf]  ;;  %v6663_v43 = vld [vmem:[#allocation3 + $0x638] sm:$0xf0] }
 0x435   :  { %3841 = vmatpush.bf16.msrb.mxu3 %v6010_v55  ;;  %v6570_v55 = vor.u32 %v7676_v38, %v6567_v24  ;;  %v6391_v20 = vld [vmem:[#allocation3 + $0x418] sm:$0xf0] }
 0x436   :  { %3866 = vmatpush.bf16.msra.mxu1 %v6282_v17  ;;  %v6695_v17 = vld [vmem:[#allocation3 + $0x678] sm:$0xf0] }
 0x437   :  { %3829 = vmatmul.bf16.vlgmr.msrb.gmra.mxu2 %v8665_v14  ;;  %v6730_v14 = vor.u32 %v7716_v39, %v6727_v45  ;;  %v6698_v11 = vor.u32 %v7708_v51, %v6695_v17  ;;  %v7632_v45 = vld [vmem:[#allocation3 + $0x40c] sm:$0xf]  ;;  %v6791_v47 = vld [vmem:[#allocation3 + $0x738] sm:$0xf0] }
 0x438   :  { %3873 = vmatpush.bf16.msra.mxu2 %v6506_v10  ;;  %3854 = vmatpush.bf16.msra.mxu0 %v6138_v5  ;;  %v6423_v10 = vld [vmem:[#allocation3 + $0x458] sm:$0xf0]  ;;  %v2222_v5 = vperm.slane %v8718_v59, 1  ;;  %v3648_v8 = vpop.f32.mrf.mxu0 }
 0x439   :  { %3886 = vmatpush.bf16.msra.mxu3 %v6634_v50  ;;  %v6551_v50 = vld [vmem:[#allocation3 + $0x558] sm:$0xf0] }
 0x43a   :  { %3867 = vmatpush.bf16.msra.mxu1 %v6266_v62  ;;  %3842 = vmatmul.bf16.vlgmr.msrb.gmra.mxu3 %v8669_v31  ;;  %v7712_v31 = vld [vmem:[#allocation3 + $0x68c] sm:$0xf]  ;;  %v3661_v9 = vpop.f32.mrf.mxu1  ;;  %v6554_v62 = vor.u32 %v7672_v30, %v6551_v50  ;;  %v6775_v4 = vld [vmem:[#allocation3 + $0x718] sm:$0xf0] }
 0x43b   :  { %3855 = vmatmul.bf16.vlgmr.msra.gmra.mxu0 %v8673_v37  ;;  %v6714_v37 = vor.u32 %v7712_v31, %v6711_v49  ;;  %v7696_v31 = vld [vmem:[#allocation3 + $0x60c] sm:$0xf]  ;;  %v6647_v49 = vld [vmem:[#allocation3 + $0x618] sm:$0xf0]  ;;  %v6778_v51 = vor.u32 %v7728_v3, %v6775_v4 }
 0x43c   :  { %3899 = vmatpush.bf16.msrb.mxu0 %v6762_v12  ;;  %3874 = vmatpush.bf16.msra.mxu2 %v6490_v25  ;;  %v6426_v12 = vor.u32 %v7640_v29, %v6423_v10  ;;  %v6807_v25 = vld [vmem:[#allocation3 + $0x758] sm:$0xf0]  ;;  %v6650_v38 = vor.u32 %v7696_v31, %v6647_v49 }
 0x43d   :  { %3887 = vmatpush.bf16.msra.mxu3 %v6618_v35  ;;  %3868 = vmatmul.bf16.vlgmr.msra.gmra.mxu1 %v8677_v61  ;;  %v6442_v61 = vor.u32 %v7644_v6, %v6439_v26  ;;  %v7668_v35 = vld [vmem:[#allocation3 + $0x52c] sm:$0xf]  ;;  %v3635_v57 = vpop.f32.mrf.mxu3  ;;  %v6810_v39 = vor.u32 %v7736_v22, %v6807_v25 }
 0x43e   :  { %3912 = vmatpush.bf16.msrb.mxu1 %v6890_v27  ;;  %v3622_v27 = vpop.f32.mrf.mxu2 }
 0x43f   :  { %v3623_v36 = vadd.f32 %v3622_v27, %v2222_v5 }
 0x440   :  { %3900 = vmatpush.bf16.msrb.mxu0 %v6746_v41  ;;  %3875 = vmatpush.bf16.msra.mxu2 %v6474_v46  ;;  %v7700_v41 = vld [vmem:[#allocation3 + $0x62c] sm:$0xf]  ;;  %v3650_v63 = vpop.f32.mrf.mxu0 }
 0x441   :  { %3888 = vmatpush.bf16.msra.mxu3 %v6602_v58  ;;  %v3636_v46 = vadd.f32 %v3635_v57, %v3623_v36  ;;  %v7732_v58 = vld [vmem:[#allocation3 + $0x72c] sm:$0xf]  ;;  %v6666_v15 = vor.u32 %v7700_v41, %v6663_v43 }
 0x442   :  { %3913 = vmatpush.bf16.msrb.mxu1 %v6874_v23  ;;  %v6538_v23 = vor.u32 %v7668_v35, %v6535_v56  ;;  %v6794_v6 = vor.u32 %v7732_v58, %v6791_v47 }
 0x443   :  { %v3649_v48 = vadd.f32 %v3648_v8, %v3636_v46 }
 0x444   :  { %3901 = vmatpush.bf16.msrb.mxu0 %v6730_v14  ;;  %3876 = vmatpush.bf16.msra.mxu2 %v6458_v21  ;;  %v6519_v14 = vld [vmem:[#allocation3 + $0x518] sm:$0xf0]  ;;  %v3663_v21 = vpop.f32.mrf.mxu1 }
 0x445   :  { %3889 = vmatpush.bf16.msra.mxu3 %v6586_v7  ;;  %v3662_v7 = vadd.f32 %v3661_v9, %v3649_v48  ;;  %v6522_v26 = vor.u32 %v7664_v2, %v6519_v14  ;;  %v3637_v24 = vpop.f32.mrf.mxu3  ;;  %v8749_v48 = vmax.f32 %v8728_v1, 0.0 }
 0x446   :  { %3914 = vmatpush.bf16.msrb.mxu1 %v6858_v52  ;;  %v6394_v52 = vor.u32 %v7632_v45, %v6391_v20 }
 0x447   :  { %v3929_v49 = vrot.slane %v8749_v48, 4 }
 0x448   :  { %3902 = vmatpush.bf16.msrb.mxu0 %v6714_v37  ;;  %3877 = vmatpush.bf16.msra.mxu2 %v6442_v61  ;;  %v3624_v37 = vpop.f32.mrf.mxu2 }
 0x449   :  { %3890 = vmatpush.bf16.msra.mxu3 %v6570_v55 }
 0x44a   :  { %3915 = vmatpush.bf16.msrb.mxu1 %v6842_v53 }
 0x44c   :  { %3903 = vmatpush.bf16.msrb.mxu0 %v6698_v11  ;;  %3878 = vmatpush.bf16.msra.mxu2 %v6426_v12 }
 0x44d   :  { %3891 = vmatpush.bf16.msra.mxu3 %v6554_v62 }
 0x44e   :  { %3916 = vmatpush.bf16.msrb.mxu1 %v6826_v44 }
 0x450   :  { %3904 = vmatpush.bf16.msrb.mxu0 %v6682_v32  ;;  %3879 = vmatpush.bf16.msra.mxu2 %v6410_v18 }
 0x451   :  { %3892 = vmatpush.bf16.msra.mxu3 %v6538_v23 }
 0x452   :  { %3917 = vmatpush.bf16.msrb.mxu1 %v6810_v39 }
 0x454   :  { %3905 = vmatpush.bf16.msrb.mxu0 %v6666_v15  ;;  %3880 = vmatpush.bf16.msra.mxu2 %v6394_v52 }
 0x455   :  { %3893 = vmatpush.bf16.msra.mxu3 %v6522_v26  ;;  %v3930_v26 = vadd.f32 %v3929_v49, %v8749_v48 }
 0x456   :  { %3918 = vmatpush.bf16.msrb.mxu1 %v6794_v6 }
 0x457   :  { %3881 = vmatmul.bf16.vlgmr.msra.gmra.mxu2 %v8685_v54  ;;  %v2223_v54 = vperm.slane %v8718_v59, 2  ;;  %v3931_v24 = vrot.slane %v3930_v26, 2 }
 0x458   :  { %3906 = vmatpush.bf16.msrb.mxu0 %v6650_v38  ;;  %3894 = vmatmul.bf16.vlgmr.msra.gmra.mxu3 %v8689_v34  ;;  %v3700_v17 = vpop.f32.mrf.mxu0 }
 0x45a   :  { %3919 = vmatpush.bf16.msrb.mxu1 %v6778_v51  ;;  %v3713_v61 = vpop.f32.mrf.mxu1  ;;  %v3674_v53 = vpop.f32.mrf.mxu2 }
 0x45b   :  { %3907 = vmatmul.bf16.vlgmr.msrb.gmra.mxu0 %v8693_v40  ;;  %v3675_v29 = vadd.f32 %v3674_v53, %v3662_v7  ;;  %v3932_v53 = vadd.f32 %v3931_v24, %v3930_v26 }
 0x45d   :  { %3920 = vmatmul.bf16.vlgmr.msrb.gmra.mxu1 %v8698_v0  ;;  %v3687_v55 = vpop.f32.mrf.mxu3 }
 0x45e   :  { %v3688_v10 = vadd.f32 %v3687_v55, %v3675_v29 }
 0x460   :  { %v3701_v33 = vadd.f32 %v3700_v17, %v3688_v10  ;;  %v3702_v60 = vpop.f32.mrf.mxu0 }
 0x461   :  { %v3933_v60 = vrot.slane %v3932_v53, 1 }
 0x462   :  { %v3715_v11 = vpop.f32.mrf.mxu1  ;;  %v3714_v30 = vadd.f32 %v3713_v61, %v3701_v33  ;;  %v3676_v50 = vpop.f32.mrf.mxu2 }
 0x463   :  { %v2224_v50 = vperm.slane %v8718_v59, 3 }
 0x464   :  { %v8740_v27 = vmax.f32 %v3714_v30, 0.0 }
 0x465   :  { %v3689_v5 = vpop.f32.mrf.mxu3 }
 0x466   :  { %v3935_v57 = vrot.slane %v8740_v27, 4  ;;  %v3934_v5 = vadd.f32 %v3933_v60, %v3932_v53  ;;  %v7005_v60 = vld [vmem:[#allocation10 + $0xe0] sm:$0xf] }
 0x468   :  { %v3936_v45 = vadd.f32 %v3935_v57, %v8740_v27 }
 0x46a   :  { %v3937_v47 = vrot.slane %v3936_v45, 2 }
 0x46c   :  { %v3938_v2 = vadd.f32 %v3937_v47, %v3936_v45 }
 0x46e   :  { %v3939_v63 = vrot.slane %v3938_v2, 1 }
 0x470   :  { %v3940_v21 = vadd.f32 %v3939_v63, %v3938_v2  ;;  %v6949_v2 = vld [vmem:[#allocation10 + $0x70] sm:$0xf] }
 0x471   :  { %v7013_v63 = vld [vmem:[#allocation10 + $0xf0] sm:$0xf] }
 0x472   :  { %v8754_v3 = vmul.f32 %v3940_v21, %v8341_v42  ;;  %v7790_v21 = vld [vmem:[#allocation10 + $0xf4] sm:$0xf0] }
 0x474   :  { %v3958_v1 = vsub.f32 %v8740_v27, %v8754_v3 }
 0x476   :  { %v3962_v29 = vmul.f32 %v3958_v1, %v3958_v1 }
 0x478   :  { %v3752_v34 = vpop.f32.mrf.mxu0  ;;  %v3971_v11 = vrot.slane %v3962_v29, 4 }
 0x47a   :  { %v3765_v8 = vpop.f32.mrf.mxu1  ;;  %v3726_v28 = vpop.f32.mrf.mxu2 }
 0x47b   :  { %v3727_v40 = vadd.f32 %v3726_v28, %v2223_v54  ;;  %v3972_v54 = vadd.f32 %v3971_v11, %v3962_v29  ;;  %v8765_v28 = vmul.f32 %v3934_v5, %v8341_v42  ;;  %v7788_v11 = vld [vmem:[#allocation10 + $0xe4] sm:$0xf0] }
 0x47c   :  { %v7006_v5 = vor.u32 %v7788_v11, %v7005_v60  ;;  %v7814_v60 = vld [vmem:[#allocation10 + $0x1b4] sm:$0xf0] }
 0x47d   :  { %v3739_v16 = vpop.f32.mrf.mxu3 }
 0x47e   :  { %v3740_v0 = vadd.f32 %v3739_v16, %v3727_v40  ;;  %v3973_v40 = vrot.slane %v3972_v54, 2 }
 0x480   :  { %v3753_v9 = vadd.f32 %v3752_v34, %v3740_v0  ;;  %v3754_v12 = vpop.f32.mrf.mxu0 }
 0x481   :  { %v3974_v12 = vadd.f32 %v3973_v40, %v3972_v54  ;;  %v7804_v54 = vld [vmem:[#allocation10 + $0x164] sm:$0xf0] }
 0x482   :  { %v3767_v44 = vpop.f32.mrf.mxu1  ;;  %v3766_v13 = vadd.f32 %v3765_v8, %v3753_v9  ;;  %v3728_v62 = vpop.f32.mrf.mxu2  ;;  %v3957_v9 = vsub.f32 %v8749_v48, %v8765_v28 }
 0x485   :  { %v3741_v19 = vpop.f32.mrf.mxu3 }
 0x486   :  { %v3961_v19 = vmul.f32 %v3957_v9, %v3957_v9 }
 0x488   :  { %v3965_v57 = vrot.slane %v3961_v19, 4 }
 0x498   :  { %v3804_v22 = vpop.f32.mrf.mxu0 }
 0x49a   :  { %v3817_v25 = vpop.f32.mrf.mxu1  ;;  %v3778_v32 = vpop.f32.mrf.mxu2 }
 0x49b   :  { %v3779_v35 = vadd.f32 %v3778_v32, %v3766_v13 }
 0x49d   :  { %v3791_v56 = vpop.f32.mrf.mxu3 }
 0x49e   :  { %v3792_v36 = vadd.f32 %v3791_v56, %v3779_v35 }
 0x4a0   :  { %v3805_v41 = vadd.f32 %v3804_v22, %v3792_v36  ;;  %v3806_v43 = vpop.f32.mrf.mxu0  ;;  %v3975_v22 = vrot.slane %v3974_v12, 1 }
 0x4a2   :  { %v3819_v18 = vpop.f32.mrf.mxu1  ;;  %v3818_v39 = vadd.f32 %v3817_v25, %v3805_v41  ;;  %v3780_v46 = vpop.f32.mrf.mxu2  ;;  %v3976_v41 = vadd.f32 %v3975_v22, %v3974_v12  ;;  %v7786_v22 = vld [vmem:[#allocation10 + $0xd4] sm:$0xf0] }
 0x4a3   :  { %v3966_v46 = vadd.f32 %v3965_v57, %v3961_v19  ;;  %v6997_v19 = vld [vmem:[#allocation10 + $0xd0] sm:$0xf] }
 0x4a4   :  { %v8744_v23 = vmax.f32 %v3818_v39, 0.0 }
 0x4a5   :  { %v3793_v20 = vpop.f32.mrf.mxu3  ;;  %v3967_v24 = vrot.slane %v3966_v46, 2 }
 0x4a6   :  { %v3941_v58 = vrot.slane %v8744_v23, 4  ;;  %v3990_v20 = vmul.f32 %v3976_v41, %v8341_v42 }
 0x4a7   :  { %v3968_v40 = vadd.f32 %v3967_v24, %v3966_v46 }
 0x4a8   :  { %v3942_v15 = vadd.f32 %v3941_v58, %v8744_v23  ;;  %v8772_v1 = vadd.f32 1e-05, %v3990_v20  ;;  %v6989_v20 = vld [vmem:[#allocation10 + $0xc0] sm:$0xf] }
 0x4a9   :  { %v3969_v57 = vrot.slane %v3968_v40, 1 }
 0x4aa   :  { %v3943_v14 = vrot.slane %v3942_v15, 2  ;;  %7920 = vrsqrt.f32 %v8772_v1  ;;  %vm4014_vm15 = vweird.f32 %v8772_v1 }
 0x4ac   :  { %v3944_v31 = vadd.f32 %v3943_v14, %v3942_v15  ;;  %v7774_v14 = vld [vmem:[#allocation10 + $0x74] sm:$0xf0] }
 0x4ad   :  { %v6950_v49 = vor.u32 %v7774_v14, %v6949_v2  ;;  %v7800_v14 = vld [vmem:[#allocation10 + $0x144] sm:$0xf0] }
 0x4ae   :  { %v3945_v52 = vrot.slane %v3944_v31, 1 }
 0x4af   :  { %4487 = vmatpush.bf16.msrb.mxu2 %v6950_v49  ;;  %v3970_v49 = vadd.f32 %v3969_v57, %v3968_v40  ;;  %v6973_v40 = vld [vmem:[#allocation10 + $0xa0] sm:$0xf]  ;;  %v6901_v57 = vld [vmem:[#allocation10 + $0x10] sm:$0xf] }
 0x4b0   :  { %v3946_v4 = vadd.f32 %v3945_v52, %v3944_v31  ;;  %v7077_v52 = vld [vmem:[#allocation10 + $0x170] sm:$0xf] }
 0x4b2   :  { %v8759_v51 = vmul.f32 %v3946_v4, %v8341_v42  ;;  %v7014_v4 = vor.u32 %v7790_v21, %v7013_v63  ;;  %v7117_v63 = vld [vmem:[#allocation10 + $0x1c0] sm:$0xf] }
 0x4b4   :  { %v3959_v55 = vsub.f32 %v8744_v23, %v8759_v51  ;;  %4500 = vmatpush.bf16.msrb.mxu3 %v7014_v4  ;;  %v6917_v4 = vld [vmem:[#allocation10 + $0x30] sm:$0xf] }
 0x4b6   :  { %v3963_v30 = vmul.f32 %v3959_v55, %v3959_v55  ;;  %v6941_v55 = vld [vmem:[#allocation10 + $0x60] sm:$0xf] }
 0x4b8   :  { %v3856_v6 = vpop.f32.mrf.mxu0  ;;  %v3977_v34 = vrot.slane %v3963_v30, 4  ;;  %4501 = vmatpush.bf16.msrb.mxu3 %v7006_v5 }
 0x4ba   :  { %v3869_v7 = vpop.f32.mrf.mxu1  ;;  %v3830_v37 = vpop.f32.mrf.mxu2  ;;  %v3978_v16 = vadd.f32 %v3977_v34, %v3963_v30  ;;  %v7069_v30 = vld [vmem:[#allocation10 + $0x160] sm:$0xf] }
 0x4bb   :  { %v3831_v8 = vadd.f32 %v3830_v37, %v2224_v50  ;;  %v7133_v34 = vld [vmem:[#allocation10 + $0x1e0] sm:$0xf] }
 0x4bc   :  { %v3979_v44 = vrot.slane %v3978_v16, 2 }
 0x4bd   :  { %v3843_v38 = vpop.f32.mrf.mxu3 }
 0x4be   :  { %v3844_v0 = vadd.f32 %v3843_v38, %v3831_v8  ;;  %v3980_v59 = vadd.f32 %v3979_v44, %v3978_v16  ;;  %v7141_v38 = vld [vmem:[#allocation10 + $0x1f0] sm:$0xf]  ;;  %v7820_v8 = vld [vmem:[#allocation10 + $0x1e4] sm:$0xf0] }
 0x4bf   :  { %v7134_v9 = vor.u32 %v7820_v8, %v7133_v34  ;;  %v6933_v44 = vld [vmem:[#allocation10 + $0x50] sm:$0xf]  ;;  %v6909_v34 = vld [vmem:[#allocation10 + $0x20] sm:$0xf]  ;;  %v7764_v8 = vld [vmem:[#allocation10 + $0x24] sm:$0xf0] }
 0x4c0   :  { %v3858_v17 = vpop.f32.mrf.mxu0  ;;  %v3857_v13 = vadd.f32 %v3856_v6, %v3844_v0  ;;  %v3981_v43 = vrot.slane %v3980_v59, 1  ;;  %v7806_v6 = vld [vmem:[#allocation10 + $0x174] sm:$0xf0]  ;;  %v7070_v0 = vor.u32 %v7804_v54, %v7069_v30  ;;  %v3989_v30 = vmul.f32 %v3970_v49, %v8341_v42 }
 0x4c1   :  { %v7078_v37 = vor.u32 %v7806_v6, %v7077_v52  ;;  %v8781_v6 = vpop.eup %7920 }
 0x4c2   :  { %v3871_v61 = vpop.f32.mrf.mxu1  ;;  %v3832_v10 = vpop.f32.mrf.mxu2  ;;  %v3870_v32 = vadd.f32 %v3869_v7, %v3857_v13  ;;  %v3982_v58 = vadd.f32 %v3981_v43, %v3980_v59  ;;  %v7770_v13 = vld [vmem:[#allocation10 + $0x54] sm:$0xf0]  ;;  %v7061_v59 = vld [vmem:[#allocation10 + $0x150] sm:$0xf]  ;;  %vm4015_vm14 = vweird.f32 %v8781_v6 }
 0x4c3   :  { %v7822_v61 = vld [vmem:[#allocation10 + $0x1f4] sm:$0xf0]  ;;  %4513 = vmatpush.bf16.msra.mxu0 %v7078_v37  ;;  %v7772_v10 = vld [vmem:[#allocation10 + $0x64] sm:$0xf0]  ;;  %vm8826_vm1 = vmor %vm4014_vm15, %vm4015_vm14 }
 0x4c4   :  { %v3991_v17 = vmul.f32 %v3982_v58, %v8341_v42  ;;  %v7142_v29 = vor.u32 %v7822_v61, %v7141_v38  ;;  %v7784_v58 = vld [vmem:[#allocation10 + $0xc4] sm:$0xf0]  ;;  %v7766_v37 = vld [vmem:[#allocation10 + $0x34] sm:$0xf0]  ;;  %v6981_v38 = vld [vmem:[#allocation10 + $0xb0] sm:$0xf] }
 0x4c5   :  { %v3845_v33 = vpop.f32.mrf.mxu3  ;;  %v6990_v2 = vor.u32 %v7784_v58, %v6989_v20  ;;  %v6918_v24 = vor.u32 %v7766_v37, %v6917_v4  ;;  %v7045_v61 = vld [vmem:[#allocation10 + $0x130] sm:$0xf]  ;;  %v6957_v4 = vld [vmem:[#allocation10 + $0x80] sm:$0xf] }
 0x4c6   :  { %v6942_v33 = vor.u32 %v7772_v10, %v6941_v55  ;;  %4526 = vmatpush.bf16.msra.mxu1 %v7142_v29  ;;  %v8777_v16 = vadd.f32 1e-05, %v3991_v17  ;;  %v7782_v17 = vld [vmem:[#allocation10 + $0xb4] sm:$0xf0] }
 0x4c7   :  { %4514 = vmatpush.bf16.msra.mxu0 %v7070_v0  ;;  %v6982_v55 = vor.u32 %v7782_v17, %v6981_v38  ;;  %v6910_v0 = vor.u32 %v7764_v8, %v6909_v34  ;;  %v7776_v38 = vld [vmem:[#allocation10 + $0x84] sm:$0xf0]  ;;  %v7015_v8 = vld [vmem:[#allocation10 + $0xf8] sm:$0xf0] }
 0x4c8   :  { %4488 = vmatpush.bf16.msrb.mxu2 %v6942_v33  ;;  %7922 = vrsqrt.f32 %v8777_v16  ;;  %v7109_v33 = vld [vmem:[#allocation10 + $0x1b0] sm:$0xf]  ;;  %v7792_v17 = vld [vmem:[#allocation10 + $0x104] sm:$0xf0]  ;;  %vm4024_vm2 = vweird.f32 %v8777_v16 }
 0x4c9   :  { %v7110_v5 = vor.u32 %v7814_v60, %v7109_v33  ;;  %v7808_v33 = vld [vmem:[#allocation10 + $0x184] sm:$0xf0] }
 0x4ca   :  { %4527 = vmatpush.bf16.msra.mxu1 %v7134_v9  ;;  %v7780_v9 = vld [vmem:[#allocation10 + $0xa4] sm:$0xf0] }
 0x4ce   :  { %v8788_v11 = vpop.eup %7922 }
 0x4cf   :  { %vm4025_vm0 = vweird.f32 %v8788_v11 }
 0x4d0   :  { %vm8837_vm5 = vmor %vm4024_vm2, %vm4025_vm0 }
 0x4d8   :  { %v3908_v62 = vpop.f32.mrf.mxu0 }
 0x4da   :  { %v3921_v25 = vpop.f32.mrf.mxu1  ;;  %v3882_v35 = vpop.f32.mrf.mxu2 }
 0x4db   :  { %v3883_v56 = vadd.f32 %v3882_v35, %v3870_v32  ;;  %v3895_v36 = vpop.f32.mrf.mxu3  ;;  %v6998_v32 = vor.u32 %v7786_v22, %v6997_v19  ;;  %v7802_v35 = vld [vmem:[#allocation10 + $0x154] sm:$0xf0]  ;;  %v6974_v19 = vor.u32 %v7780_v9, %v6973_v40  ;;  %v7805_v40 = vld [vmem:[#allocation10 + $0x174] sm:$0xf] }
 0x4dc   :  { %v7062_v41 = vor.u32 %v7802_v35, %v7061_v59  ;;  %v7101_v59 = vld [vmem:[#allocation10 + $0x1a0] sm:$0xf] }
 0x4dd   :  { %v3896_v18 = vadd.f32 %v3895_v36, %v3883_v56  ;;  %v7125_v56 = vld [vmem:[#allocation10 + $0x1d0] sm:$0xf]  ;;  %v7818_v36 = vld [vmem:[#allocation10 + $0x1d4] sm:$0xf0]  ;;  %4502 = vmatpush.bf16.msrb.mxu3 %v6998_v32  ;;  %v8795_v32 = vadd.f32 1e-05, %v3989_v30 }
 0x4de   :  { %v7126_v43 = vor.u32 %v7818_v36, %v7125_v56  ;;  %4515 = vmatpush.bf16.msra.mxu0 %v7062_v41  ;;  %v7762_v41 = vld [vmem:[#allocation10 + $0x14] sm:$0xf0]  ;;  %v7773_v30 = vld [vmem:[#allocation10 + $0x74] sm:$0xf] }
 0x4df   :  { %v3909_v45 = vadd.f32 %v3908_v62, %v3896_v18  ;;  %v6934_v62 = vor.u32 %v7770_v13, %v6933_v44  ;;  %v7796_v44 = vld [vmem:[#allocation10 + $0x124] sm:$0xf0]  ;;  %v4019_v13 = vmul.f32 %v8788_v11, %v8777_v16  ;;  %7924 = vrsqrt.f32 %v8795_v32  ;;  %v6903_v16 = vld [vmem:[#allocation10 + $0x18] sm:$0xf0] }
 0x4e0   :  { %v3910_v39 = vpop.f32.mrf.mxu0  ;;  %4528 = vmatpush.bf16.msra.mxu1 %v7126_v43  ;;  %v6965_v43 = vld [vmem:[#allocation10 + $0x90] sm:$0xf]  ;;  %vm4004_vm10 = vweird.f32 %v8795_v32 }
 0x4e1   :  { %v3922_v15 = vadd.f32 %v3921_v25, %v3909_v45  ;;  %4489 = vmatpush.bf16.msrb.mxu2 %v6934_v62  ;;  %v6925_v39 = vld [vmem:[#allocation10 + $0x40] sm:$0xf]  ;;  %v7768_v45 = vld [vmem:[#allocation10 + $0x44] sm:$0xf0]  ;;  %4503 = vmatpush.bf16.msrb.mxu3 %v6990_v2  ;;  %v4020_v20 = vmul.f32 %v8788_v11, %v4019_v13  ;;  %v7093_v2 = vld [vmem:[#allocation10 + $0x190] sm:$0xf] }
 0x4e2   :  { %v3923_v47 = vpop.f32.mrf.mxu1  ;;  %v3884_v31 = vpop.f32.mrf.mxu2  ;;  %v6926_v46 = vor.u32 %v7768_v45, %v6925_v39  ;;  %v7778_v39 = vld [vmem:[#allocation10 + $0x94] sm:$0xf0]  ;;  %v7029_v45 = vld [vmem:[#allocation10 + $0x110] sm:$0xf]  ;;  %v7821_v13 = vld [vmem:[#allocation10 + $0x1f4] sm:$0xf] }
 0x4e3   :  { %v8770_v7 = vmax.f32 %v3922_v15, 0.0  ;;  %v3897_v26 = vpop.f32.mrf.mxu3  ;;  %v7053_v47 = vld [vmem:[#allocation10 + $0x140] sm:$0xf]  ;;  %v7816_v31 = vld [vmem:[#allocation10 + $0x1c4] sm:$0xf0] }
 0x4e4   :  { %v7054_v21 = vor.u32 %v7800_v14, %v7053_v47  ;;  %v7118_v52 = vor.u32 %v7816_v31, %v7117_v63  ;;  %v6966_v47 = vor.u32 %v7778_v39, %v6965_v43  ;;  %v7810_v14 = vld [vmem:[#allocation10 + $0x194] sm:$0xf0]  ;;  %v7071_v43 = vld [vmem:[#allocation10 + $0x168] sm:$0xf0] }
 0x4e5   :  { %v3947_v53 = vrot.slane %v8770_v7, 4  ;;  %4490 = vmatpush.bf16.msrb.mxu2 %v6926_v46  ;;  %4504 = vmatpush.bf16.msrb.mxu3 %v6982_v55  ;;  %v7794_v46 = vld [vmem:[#allocation10 + $0x114] sm:$0xf0]  ;;  %v7094_v31 = vor.u32 %v7810_v14, %v7093_v2  ;;  %v8804_v9 = vpop.eup %7924  ;;  %v7785_v2 = vld [vmem:[#allocation10 + $0xd4] sm:$0xf] }
 0x4e6   :  { %4516 = vmatpush.bf16.msra.mxu0 %v7054_v21  ;;  %4529 = vmatpush.bf16.msra.mxu1 %v7118_v52  ;;  %v6893_v21 = vld [vmem:[#allocation10] sm:$0xf]  ;;  %v7760_v52 = vld [vmem:[#allocation10 + $0x4] sm:$0xf0]  ;;  %v3999_v39 = vmul.f32 %v8804_v9, %v8795_v32  ;;  %v6999_v14 = vld [vmem:[#allocation10 + $0xd8] sm:$0xf0]  ;;  %vm4005_vm7 = vweird.f32 %v8804_v9 }
 0x4e7   :  { %v3948_v50 = vadd.f32 %v3947_v53, %v8770_v7  ;;  %v7798_v53 = vld [vmem:[#allocation10 + $0x134] sm:$0xf0]  ;;  %v6894_v37 = vor.u32 %v7760_v52, %v6893_v21  ;;  %v7063_v21 = vld [vmem:[#allocation10 + $0x158] sm:$0xf0]  ;;  %v7817_v52 = vld [vmem:[#allocation10 + $0x1d4] sm:$0xf] }
 0x4e8   :  { %v7046_v10 = vor.u32 %v7798_v53, %v7045_v61  ;;  %v8802_v61 = vmul.f32 0.5, %v4020_v20  ;;  %v7135_v20 = vld [vmem:[#allocation10 + $0x1e8] sm:$0xf0]  ;;  %vm4006_vm11 = vmor %vm4004_vm10, %vm4005_vm7 }
 0x4e9   :  { %v3949_v12 = vrot.slane %v3948_v50, 2  ;;  %4491 = vmatpush.bf16.msrb.mxu2 %v6918_v24  ;;  %4505 = vmatpush.bf16.msrb.mxu3 %v6974_v19  ;;  %v7021_v24 = vld [vmem:[#allocation10 + $0x100] sm:$0xf]  ;;  %v7771_v19 = vld [vmem:[#allocation10 + $0x64] sm:$0xf] }
 0x4ea   :  { %4517 = vmatpush.bf16.msra.mxu0 %v7046_v10  ;;  %4530 = vmatpush.bf16.msra.mxu1 %v7110_v5  ;;  %v7022_v55 = vor.u32 %v7792_v17, %v7021_v24  ;;  %v7085_v10 = vld [vmem:[#allocation10 + $0x180] sm:$0xf]  ;;  %v7789_v5 = vld [vmem:[#allocation10 + $0xf4] sm:$0xf]  ;;  %v7767_v24 = vld [vmem:[#allocation10 + $0x44] sm:$0xf] }
 0x4eb   :  { %v3950_v25 = vadd.f32 %v3949_v12, %v3948_v50  ;;  %v4009_v50 = vmul.f32 %v8781_v6, %v8772_v1  ;;  %v7037_v12 = vld [vmem:[#allocation10 + $0x120] sm:$0xf]  ;;  %v7086_v60 = vor.u32 %v7808_v33, %v7085_v10  ;;  %v6927_v17 = vld [vmem:[#allocation10 + $0x48] sm:$0xf0]  ;;  %v7799_v33 = vld [vmem:[#allocation10 + $0x144] sm:$0xf] }
 0x4ec   :  { %v7038_v22 = vor.u32 %v7796_v44, %v7037_v12  ;;  %v7018_v12 = vor.u32 %v7789_v5, %v7015_v8  ;;  %v6991_v10 = vld [vmem:[#allocation10 + $0xc8] sm:$0xf0]  ;;  %v7795_v1 = vld [vmem:[#allocation10 + $0x124] sm:$0xf] }
 0x4ed   :  { %v3951_v18 = vrot.slane %v3950_v25, 1  ;;  %v4010_v35 = vmul.f32 %v8781_v6, %v4009_v50  ;;  %4492 = vmatpush.bf16.msrb.mxu2 %v6910_v0  ;;  %4506 = vmatpush.bf16.msrb.mxu3 %v6966_v47  ;;  %v6951_v50 = vld [vmem:[#allocation10 + $0x78] sm:$0xf0] }
 0x4ee   :  { %4518 = vmatpush.bf16.msra.mxu0 %v7038_v22  ;;  %v6954_v34 = vor.u32 %v7773_v30, %v6951_v50  ;;  %v7079_v0 = vld [vmem:[#allocation10 + $0x178] sm:$0xf0]  ;;  %v7815_v30 = vld [vmem:[#allocation10 + $0x1c4] sm:$0xf]  ;;  %v7119_v50 = vld [vmem:[#allocation10 + $0x1c8] sm:$0xf0] }
 0x4ef   :  { %v3952_v15 = vadd.f32 %v3951_v18, %v3950_v25  ;;  %v7812_v25 = vld [vmem:[#allocation10 + $0x1a4] sm:$0xf0]  ;;  %v6902_v18 = vor.u32 %v7762_v41, %v6901_v57  ;;  %v8800_v63 = vmul.f32 0.5, %v4010_v35  ;;  %v7082_v44 = vor.u32 %v7805_v40, %v7079_v0  ;;  %v7787_v35 = vld [vmem:[#allocation10 + $0xe4] sm:$0xf] }
 0x4f0   :  { %v7102_v56 = vor.u32 %v7812_v25, %v7101_v59  ;;  %v6943_v25 = vld [vmem:[#allocation10 + $0x68] sm:$0xf0]  ;;  %v7803_v41 = vld [vmem:[#allocation10 + $0x164] sm:$0xf] }
 0x4f1   :  { %v8784_v26 = vmul.f32 %v3952_v15, %v8341_v42  ;;  %v7030_v15 = vor.u32 %v7794_v46, %v7029_v45  ;;  %4493 = vmatpush.bf16.msrb.mxu2 %v6902_v18  ;;  %v7819_v18 = vld [vmem:[#allocation10 + $0x1e4] sm:$0xf]  ;;  %v7074_v46 = vor.u32 %v7803_v41, %v7071_v43  ;;  %v4012_v5 = vsub.f32 1.5, %v8800_v63  ;;  %v7111_v41 = vld [vmem:[#allocation10 + $0x1b8] sm:$0xf0] }
 0x4f2   :  { %4531 = vmatpush.bf16.msra.mxu1 %v7102_v56  ;;  %v7007_v56 = vld [vmem:[#allocation10 + $0xe8] sm:$0xf0]  ;;  %v7138_v47 = vor.u32 %v7819_v18, %v7135_v20  ;;  %v7779_v20 = vld [vmem:[#allocation10 + $0xa4] sm:$0xf] }
 0x4f3   :  { %v3960_v29 = vsub.f32 %v8770_v7, %v8784_v26  ;;  %4519 = vmatpush.bf16.msra.mxu0 %v7030_v15  ;;  %v7010_v57 = vor.u32 %v7787_v35, %v7007_v56  ;;  %v6935_v15 = vld [vmem:[#allocation10 + $0x58] sm:$0xf0]  ;;  %v4013_v63 = vmul.f32 %v8781_v6, %v4012_v5  ;;  %v7797_v35 = vld [vmem:[#allocation10 + $0x134] sm:$0xf] }
 0x4f4   :  { %v7809_v5 = vld [vmem:[#allocation10 + $0x194] sm:$0xf] }
 0x4f5   :  { %v3964_v54 = vmul.f32 %v3960_v29, %v3960_v29  ;;  %v6958_v29 = vor.u32 %v7776_v38, %v6957_v4  ;;  %4494 = vmatpush.bf16.msrb.mxu2 %v6894_v37  ;;  %v7002_v4 = vor.u32 %v7785_v2, %v6999_v14  ;;  %v7127_v38 = vld [vmem:[#allocation10 + $0x1d8] sm:$0xf0]  ;;  %v6975_v14 = vld [vmem:[#allocation10 + $0xa8] sm:$0xf0] }
 0x4f6   :  { %4532 = vmatpush.bf16.msra.mxu1 %v7094_v31 }
 0x4f7   :  { %v3983_v62 = vrot.slane %v3964_v54, 4  ;;  %4507 = vmatpush.bf16.msrb.mxu3 %v6958_v29  ;;  %4520 = vmatpush.bf16.msra.mxu0 %v7022_v55  ;;  %v7130_v29 = vor.u32 %v7817_v52, %v7127_v38  ;;  %v7783_v55 = vld [vmem:[#allocation10 + $0xc4] sm:$0xf] }
 0x4f8   :  { %v7811_v52 = vld [vmem:[#allocation10 + $0x1a4] sm:$0xf] }
 0x4f9   :  { %v3984_v36 = vadd.f32 %v3983_v62, %v3964_v54  ;;  %v7143_v62 = vld [vmem:[#allocation10 + $0x1f8] sm:$0xf0]  ;;  %4539 = vmatpush.bf16.msra.mxu2 %v6954_v34  ;;  %v6994_v34 = vor.u32 %v7783_v55, %v6991_v10  ;;  %v7793_v10 = vld [vmem:[#allocation10 + $0x114] sm:$0xf] }
 0x4fa   :  { %4533 = vmatpush.bf16.msra.mxu1 %v7086_v60  ;;  %v7146_v59 = vor.u32 %v7821_v13, %v7143_v62  ;;  %v7055_v60 = vld [vmem:[#allocation10 + $0x148] sm:$0xf0]  ;;  %v7765_v62 = vld [vmem:[#allocation10 + $0x34] sm:$0xf]  ;;  %v6967_v55 = vld [vmem:[#allocation10 + $0x98] sm:$0xf0] }
 0x4fb   :  { %v3985_v58 = vrot.slane %v3984_v36, 2  ;;  %4552 = vmatpush.bf16.msra.mxu3 %v7018_v12  ;;  %4565 = vmatpush.bf16.msrb.mxu0 %v7082_v44  ;;  %v7058_v8 = vor.u32 %v7799_v33, %v7055_v60  ;;  %v4022_v12 = vsub.f32 1.5, %v8802_v61  ;;  %v7122_v44 = vor.u32 %v7815_v30, %v7119_v50  ;;  %v7031_v50 = vld [vmem:[#allocation10 + $0x118] sm:$0xf0] }
 0x4fd   :  { %v3986_v49 = vadd.f32 %v3985_v58, %v3984_v36  ;;  %v6946_v36 = vor.u32 %v7771_v19, %v6943_v25  ;;  %v7769_v58 = vld [vmem:[#allocation10 + $0x54] sm:$0xf]  ;;  %v6919_v19 = vld [vmem:[#allocation10 + $0x38] sm:$0xf0] }
 0x4fe   :  { %4578 = vmatpush.bf16.msrb.mxu1 %v7146_v59  ;;  %v6938_v31 = vor.u32 %v7769_v58, %v6935_v15  ;;  %v6922_v59 = vor.u32 %v7765_v62, %v6919_v19  ;;  %v6983_v25 = vld [vmem:[#allocation10 + $0xb8] sm:$0xf0]  ;;  %v4023_v15 = vmul.f32 %v8788_v11, %v4022_v12  ;;  %v6959_v62 = vld [vmem:[#allocation10 + $0x88] sm:$0xf0] }
 0x4ff   :  { %v3987_v53 = vrot.slane %v3986_v49, 1  ;;  %4540 = vmatpush.bf16.msra.mxu2 %v6946_v36  ;;  %4553 = vmatpush.bf16.msra.mxu3 %v7010_v57  ;;  %v7047_v36 = vld [vmem:[#allocation10 + $0x138] sm:$0xf0]  ;;  %v7813_v57 = vld [vmem:[#allocation10 + $0x1b4] sm:$0xf] }
 0x500   :  { %4566 = vmatpush.bf16.msrb.mxu0 %v7074_v46  ;;  %v7050_v43 = vor.u32 %v7797_v35, %v7047_v36  ;;  %v7114_v18 = vor.u32 %v7813_v57, %v7111_v41  ;;  %v6911_v46 = vld [vmem:[#allocation10 + $0x28] sm:$0xf0]  ;;  %v4027_v60 = vsel %vm8837_vm5, %v8788_v11, %v4023_v15 }
 0x501   :  { %v3988_v54 = vadd.f32 %v3987_v53, %v3986_v49  ;;  %v7801_v49 = vld [vmem:[#allocation10 + $0x154] sm:$0xf]  ;;  %v4000_v53 = vmul.f32 %v8804_v9, %v3999_v39  ;;  %v7763_v39 = vld [vmem:[#allocation10 + $0x24] sm:$0xf]  ;;  %v4043_v19 = vrot.slane %v4027_v60, 6 }
 0x502   :  { %v7066_v37 = vor.u32 %v7801_v49, %v7063_v21  ;;  %4579 = vmatpush.bf16.msrb.mxu1 %v7138_v47  ;;  %v6914_v49 = vor.u32 %v7763_v39, %v6911_v46  ;;  %v7039_v21 = vld [vmem:[#allocation10 + $0x128] sm:$0xf0] }
 0x503   :  { %v3992_v22 = vmul.f32 %v3988_v54, %v8341_v42  ;;  %4541 = vmatpush.bf16.msra.mxu2 %v6938_v31  ;;  %v6930_v54 = vor.u32 %v7767_v24, %v6927_v17  ;;  %4554 = vmatpush.bf16.msra.mxu3 %v7002_v4  ;;  %v4001_v0 = vmul.f32 0.5, %v4000_v53  ;;  %v4017_v31 = vsel %vm8826_vm1, %v8781_v6, %v4013_v63  ;;  %v7103_v4 = vld [vmem:[#allocation10 + $0x1a8] sm:$0xf0]  ;;  %v7761_v17 = vld [vmem:[#allocation10 + $0x14] sm:$0xf] }
 0x504   :  { %4567 = vmatpush.bf16.msrb.mxu0 %v7066_v37  ;;  %v6978_v24 = vor.u32 %v7779_v20, %v6975_v14  ;;  %v7042_v6 = vor.u32 %v7795_v1, %v7039_v21  ;;  %v7106_v53 = vor.u32 %v7811_v52, %v7103_v4  ;;  %v3993_v35 = vld [vmem:[#allocation14 + $0xa] sm:$0xf]  ;;  %v4050_v52 = vld [vmem:[#allocation16 + $0xa] sm:$0xf] }
 0x505   :  { %v8809_v45 = vadd.f32 1e-05, %v3992_v22  ;;  %v7781_v22 = vld [vmem:[#allocation10 + $0xb4] sm:$0xf]  ;;  %v4002_v58 = vsub.f32 1.5, %v4001_v0 }
 0x506   :  { %4580 = vmatpush.bf16.msrb.mxu1 %v7130_v29  ;;  %v6986_v61 = vor.u32 %v7781_v22, %v6983_v25  ;;  %v7777_v29 = vld [vmem:[#allocation10 + $0x94] sm:$0xf]  ;;  %v7759_v0 = vld [vmem:[#allocation10 + $0x4] sm:$0xf]  ;;  %v7023_v25 = vld [vmem:[#allocation10 + $0x108] sm:$0xf0] }
 0x507   :  { %7926 = vrsqrt.f32 %v8809_v45  ;;  %4542 = vmatpush.bf16.msra.mxu2 %v6930_v54  ;;  %4555 = vmatpush.bf16.msra.mxu3 %v6994_v34  ;;  %v4003_v33 = vmul.f32 %v8804_v9, %v4002_v58  ;;  %vm4034_vm3 = vweird.f32 %v8809_v45  ;;  %v7095_v54 = vld [vmem:[#allocation10 + $0x198] sm:$0xf0]  ;;  %v4042_v34 = vrot.slane %v4017_v31, 7 }
 0x508   :  { %4568 = vmatpush.bf16.msrb.mxu0 %v7058_v8  ;;  %v6906_v8 = vor.u32 %v7761_v17, %v6903_v16  ;;  %v6970_v11 = vor.u32 %v7777_v29, %v6967_v55  ;;  %v7098_v63 = vor.u32 %v7809_v5, %v7095_v54 }
 0x509   :  { %v4007_v32 = vsel %vm4006_vm11, %v8804_v9, %v4003_v33 }
 0x50a   :  { %4581 = vmatpush.bf16.msrb.mxu1 %v7122_v44  ;;  %v7034_v44 = vor.u32 %v7793_v10, %v7031_v50 }
 0x50b   :  { %4543 = vmatpush.bf16.msra.mxu2 %v6922_v59  ;;  %4556 = vmatpush.bf16.msra.mxu3 %v6986_v61  ;;  %v7791_v59 = vld [vmem:[#allocation10 + $0x104] sm:$0xf]  ;;  %v4045_v61 = vsel %vm584_vm12, %v4007_v32, %v4042_v34 }
 0x50c   :  { %4569 = vmatpush.bf16.msrb.mxu0 %v7050_v43 }
 0x50d   :  { %v8814_v40 = vpop.eup %7926 }
 0x50e   :  { %v4029_v13 = vmul.f32 %v8814_v40, %v8809_v45  ;;  %vm4035_vm6 = vweird.f32 %v8814_v40  ;;  %4582 = vmatpush.bf16.msrb.mxu1 %v7114_v18  ;;  %v7775_v45 = vld [vmem:[#allocation10 + $0x84] sm:$0xf]  ;;  %v7026_v18 = vor.u32 %v7791_v59, %v7023_v25 }
 0x50f   :  { %vm4036_vm9 = vmor %vm4034_vm3, %vm4035_vm6  ;;  %4544 = vmatpush.bf16.msra.mxu2 %v6914_v49  ;;  %4557 = vmatpush.bf16.msra.mxu3 %v6978_v24  ;;  %v6962_v43 = vor.u32 %v7775_v45, %v6959_v62 }
 0x510   :  { %v4030_v56 = vmul.f32 %v8814_v40, %v4029_v13  ;;  %4570 = vmatpush.bf16.msrb.mxu0 %v7042_v6  ;;  %v6895_v13 = vld [vmem:[#allocation10 + $0x8] sm:$0xf0] }
 0x511   :  { %v6898_v57 = vor.u32 %v7759_v0, %v6895_v13 }
 0x512   :  { %v4031_v2 = vmul.f32 0.5, %v4030_v56  ;;  %4583 = vmatpush.bf16.msrb.mxu1 %v7106_v53  ;;  %v7087_v56 = vld [vmem:[#allocation10 + $0x188] sm:$0xf0] }
 0x513   :  { %4545 = vmatpush.bf16.msra.mxu2 %v6906_v8  ;;  %4558 = vmatpush.bf16.msra.mxu3 %v6970_v11 }
 0x514   :  { %v4032_v38 = vsub.f32 1.5, %v4031_v2  ;;  %4571 = vmatpush.bf16.msrb.mxu0 %v7034_v44 }
 0x516   :  { %v4033_v30 = vmul.f32 %v8814_v40, %v4032_v38  ;;  %4584 = vmatpush.bf16.msrb.mxu1 %v7098_v63 }
 0x517   :  { %4546 = vmatpush.bf16.msra.mxu2 %v6898_v57  ;;  %4559 = vmatpush.bf16.msra.mxu3 %v6962_v43 }
 0x518   :  { %v4037_v12 = vsel %vm4036_vm9, %v8814_v40, %v4033_v30  ;;  %v7807_v40 = vld [vmem:[#allocation10 + $0x184] sm:$0xf]  ;;  %4572 = vmatpush.bf16.msrb.mxu0 %v7026_v18 }
 0x519   :  { %v4044_v22 = vrot.slane %v4037_v12, 5  ;;  %v7090_v46 = vor.u32 %v7807_v40, %v7087_v56 }
 0x51b   :  { %v4046_v36 = vsel %vm1854_vm4, %v4043_v19, %v4044_v22  ;;  %4585 = vmatpush.bf16.msrb.mxu1 %v7090_v46 }
 0x51c   :  { %v4047_v41 = vsel %vm1856_vm8, %v4045_v61, %v4046_v36 }
 0x51d   :  { %v4049_v39 = vmul.f32 %v4047_v41, %v3993_v35 }
 0x51f   :  { %v4055_v20 = vperm.slane %v4049_v39, 3  ;;  %v4052_v9 = vperm.slane %v4049_v39, 0  ;;  %v4053_v58 = vperm.slane %v4049_v39, 1  ;;  %v4054_v47 = vperm.slane %v4049_v39, 2 }
 0x521   :  { %v4063_v15 = vmul.f32 %v4055_v20, %v8784_v26  ;;  %v4061_v2 = vmul.f32 %v4053_v58, %v8754_v3  ;;  %v4062_v14 = vmul.f32 %v4054_v47, %v8759_v51  ;;  %v4060_v31 = vmul.f32 %v4052_v9, %v8765_v28 }
 0x522   :  { %v4076_v26 = vmul.f32 %v4052_v9, %v8749_v48  ;;  %v4077_v3 = vmul.f32 %v4053_v58, %v8740_v27  ;;  %v4078_v51 = vmul.f32 %v4054_v47, %v8744_v23  ;;  %v4079_v6 = vmul.f32 %v4055_v20, %v8770_v7  ;;  %v4161_v27 = vld [vmem:[%s8951_s9 + $0x10] sm:$0x3] }
 0x523   :  { %v4070_v1 = vrot.slane %v4063_v15, 5  ;;  %v4068_v49 = vrot.slane %v4061_v2, 7  ;;  %v4069_v21 = vrot.slane %v4062_v14, 6  ;;  %v4163_v7 = vperm.slane %v4161_v27, 0 }
 0x524   :  { %v4164_v32 = vperm.slane %v4161_v27, 1 }
 0x525   :  { %v4071_v4 = vsel %vm584_vm12, %v4060_v31, %v4068_v49  ;;  %v4072_v37 = vsel %vm1854_vm4, %v4069_v21, %v4070_v1 }
 0x526   :  { %v4073_v38 = vsel %vm1856_vm8, %v4071_v4, %v4072_v37 }
 0x527   :  { %v4075_v24 = vsub.f32 %v4050_v52, %v4073_v38  ;;  %v7205_v38 = vld [vmem:[#allocation11 + $0x70] sm:$0xf] }
 0x529   :  { %v4081_v17 = vperm.slane %v4075_v24, 0  ;;  %v4082_v28 = vperm.slane %v4075_v24, 1  ;;  %v4083_v16 = vperm.slane %v4075_v24, 2  ;;  %v4084_v53 = vperm.slane %v4075_v24, 3  ;;  %v7838_v24 = vld [vmem:[#allocation11 + $0x74] sm:$0xf0] }
 0x52b   :  { %v4089_v29 = vadd.f32 %v4081_v17, %v4076_v26  ;;  %v4090_v55 = vadd.f32 %v4082_v28, %v4077_v3  ;;  %v4091_v10 = vadd.f32 %v4083_v16, %v4078_v51  ;;  %v4092_v33 = vadd.f32 %v4084_v53, %v4079_v6  ;;  %v7269_v26 = vld [vmem:[#allocation11 + $0xf0] sm:$0xf]  ;;  %v7854_v17 = vld [vmem:[#allocation11 + $0xf4] sm:$0xf0]  ;;  %v7837_v28 = vld [vmem:[#allocation11 + $0x74] sm:$0xf] }
 0x52c   :  { %v7206_v6 = vor.u32 %v7838_v24, %v7205_v38  ;;  %v7270_v16 = vor.u32 %v7854_v17, %v7269_v26  ;;  %v7207_v53 = vld [vmem:[#allocation11 + $0x78] sm:$0xf0]  ;;  %v7237_v26 = vld [vmem:[#allocation11 + $0xb0] sm:$0xf]  ;;  %v7845_v17 = vld [vmem:[#allocation11 + $0xb4] sm:$0xf] }
 0x52d   :  { %v4157_v60 = vpack.c.bf16 %v4089_v29, %v4089_v29  ;;  %v4158_v30 = vpack.c.bf16 %v4090_v55, %v4090_v55  ;;  %v4159_v50 = vpack.c.bf16 %v4091_v10, %v4091_v10  ;;  %v4160_v5 = vpack.c.bf16 %v4092_v33, %v4092_v33  ;;  %v7853_v29 = vld [vmem:[#allocation11 + $0xf4] sm:$0xf]  ;;  %v7271_v55 = vld [vmem:[#allocation11 + $0xf8] sm:$0xf0] }
 0x52f   :  { %4495 = vmatmul.bf16.vlgmr.msrb.gmra.mxu2 %v4157_v60  ;;  %4508 = vmatmul.bf16.vlgmr.msrb.gmra.mxu3 %v4158_v30 }
 0x530   :  { %4521 = vmatmul.bf16.vlgmr.msra.gmra.mxu0 %v4159_v50  ;;  %4534 = vmatmul.bf16.vlgmr.msra.gmra.mxu1 %v4160_v5 }
 0x531   :  { %4877 = vmatpush.bf16.msrb.mxu2 %v7206_v6  ;;  %4890 = vmatpush.bf16.msrb.mxu3 %v7270_v16  ;;  %v7175_v6 = vld [vmem:[#allocation11 + $0x38] sm:$0xf0] }
 0x53f   :  { %4547 = vmatmul.bf16.vlgmr.msra.gmra.mxu2 %v4157_v60  ;;  %4560 = vmatmul.bf16.vlgmr.msra.gmra.mxu3 %v4158_v30  ;;  %v7210_v60 = vor.u32 %v7837_v28, %v7207_v53  ;;  %v7274_v30 = vor.u32 %v7853_v29, %v7271_v55  ;;  %v7239_v28 = vld [vmem:[#allocation11 + $0xb8] sm:$0xf0]  ;;  %v7165_v55 = vld [vmem:[#allocation11 + $0x20] sm:$0xf] }
 0x540   :  { %4573 = vmatmul.bf16.vlgmr.msrb.gmra.mxu0 %v4159_v50  ;;  %4586 = vmatmul.bf16.vlgmr.msrb.gmra.mxu1 %v4160_v5  ;;  %v7197_v50 = vld [vmem:[#allocation11 + $0x60] sm:$0xf]  ;;  %v7836_v5 = vld [vmem:[#allocation11 + $0x64] sm:$0xf0] }
 0x541   :  { %v7198_v27 = vor.u32 %v7836_v5, %v7197_v50  ;;  %4903 = vmatpush.bf16.msra.mxu0 %v7210_v60  ;;  %4916 = vmatpush.bf16.msra.mxu1 %v7274_v30  ;;  %v7242_v30 = vor.u32 %v7845_v17, %v7239_v28  ;;  %v7229_v50 = vld [vmem:[#allocation11 + $0xa0] sm:$0xf]  ;;  %v7844_v5 = vld [vmem:[#allocation11 + $0xa4] sm:$0xf0] }
 0x543   :  { %4878 = vmatpush.bf16.msrb.mxu2 %v7198_v27  ;;  %v7827_v27 = vld [vmem:[#allocation11 + $0x24] sm:$0xf] }
 0x5ad   :  { %v4522_v23 = vpop.f32.mrf.mxu0  ;;  %v4535_v48 = vpop.f32.mrf.mxu1 }
 0x5b2   :  { %v4496_v54 = vpop.f32.mrf.mxu2  ;;  %v4509_v34 = vpop.f32.mrf.mxu3 }
 0x5b3   :  { %v4497_v8 = vadd.f32 %v4496_v54, %v4163_v7  ;;  %v7835_v7 = vld [vmem:[#allocation11 + $0x64] sm:$0xf] }
 0x5b5   :  { %v4510_v0 = vadd.f32 %v4509_v34, %v4497_v8  ;;  %v4524_v12 = vpop.f32.mrf.mxu0  ;;  %v4537_v11 = vpop.f32.mrf.mxu1 }
 0x5b6   :  { %v7851_v12 = vld [vmem:[#allocation11 + $0xe4] sm:$0xf]  ;;  %v7263_v11 = vld [vmem:[#allocation11 + $0xe8] sm:$0xf0] }
 0x5b7   :  { %v4523_v44 = vadd.f32 %v4522_v23, %v4510_v0  ;;  %v7261_v23 = vld [vmem:[#allocation11 + $0xe0] sm:$0xf]  ;;  %v7199_v0 = vld [vmem:[#allocation11 + $0x68] sm:$0xf0] }
 0x5b9   :  { %v4536_v13 = vadd.f32 %v4535_v48, %v4523_v44  ;;  %v7852_v48 = vld [vmem:[#allocation11 + $0xe4] sm:$0xf0]  ;;  %v7202_v44 = vor.u32 %v7835_v7, %v7199_v0  ;;  %v7231_v7 = vld [vmem:[#allocation11 + $0xa8] sm:$0xf0]  ;;  %v7230_v0 = vor.u32 %v7844_v5, %v7229_v50  ;;  %v4654_v5 = vld [vmem:[#allocation16 + $0xe] sm:$0x3] }
 0x5ba   :  { %v4498_v45 = vpop.f32.mrf.mxu2  ;;  %v4511_v62 = vpop.f32.mrf.mxu3  ;;  %v7262_v8 = vor.u32 %v7852_v48, %v7261_v23  ;;  %v7167_v23 = vld [vmem:[#allocation11 + $0x28] sm:$0xf0]  ;;  %v7843_v48 = vld [vmem:[#allocation11 + $0xa4] sm:$0xf] }
 0x5bb   :  { %v8873_v19 = vmax.f32 %v4536_v13, 0.0  ;;  %v7266_v13 = vor.u32 %v7851_v12, %v7263_v11  ;;  %v7189_v45 = vld [vmem:[#allocation11 + $0x50] sm:$0xf]  ;;  %v7834_v62 = vld [vmem:[#allocation11 + $0x54] sm:$0xf0]  ;;  %4904 = vmatpush.bf16.msra.mxu0 %v7202_v44 }
 0x5bc   :  { %4891 = vmatpush.bf16.msrb.mxu3 %v7262_v8  ;;  %v7157_v12 = vld [vmem:[#allocation11 + $0x10] sm:$0xf]  ;;  %v7826_v11 = vld [vmem:[#allocation11 + $0x14] sm:$0xf0] }
 0x5bd   :  { %v4593_v22 = vrot.slane %v8873_v19, 4  ;;  %v4574_v63 = vpop.f32.mrf.mxu0  ;;  %v4587_v59 = vpop.f32.mrf.mxu1  ;;  %4917 = vmatpush.bf16.msra.mxu1 %v7266_v13  ;;  %v7170_v13 = vor.u32 %v7827_v27, %v7167_v23 }
 0x5bf   :  { %v4594_v25 = vadd.f32 %v4593_v22, %v8873_v19  ;;  %v7253_v22 = vld [vmem:[#allocation11 + $0xd0] sm:$0xf] }
 0x5c1   :  { %v4595_v35 = vrot.slane %v4594_v25, 2 }
 0x5c2   :  { %v4548_v40 = vpop.f32.mrf.mxu2  ;;  %v4561_v56 = vpop.f32.mrf.mxu3 }
 0x5c3   :  { %v4596_v61 = vadd.f32 %v4595_v35, %v4594_v25  ;;  %v4549_v36 = vadd.f32 %v4548_v40, %v4164_v32  ;;  %v7850_v25 = vld [vmem:[#allocation11 + $0xd4] sm:$0xf0]  ;;  %v7833_v32 = vld [vmem:[#allocation11 + $0x54] sm:$0xf]  ;;  %v7191_v35 = vld [vmem:[#allocation11 + $0x58] sm:$0xf0] }
 0x5c5   :  { %v4597_v57 = vrot.slane %v4596_v61, 1  ;;  %v4562_v41 = vadd.f32 %v4561_v56, %v4549_v36  ;;  %v4576_v43 = vpop.f32.mrf.mxu0  ;;  %v4589_v18 = vpop.f32.mrf.mxu1  ;;  %v7254_v56 = vor.u32 %v7850_v25, %v7253_v22  ;;  %v7255_v36 = vld [vmem:[#allocation11 + $0xd8] sm:$0xf0]  ;;  %v7842_v22 = vld [vmem:[#allocation11 + $0x94] sm:$0xf0] }
 0x5c6   :  { %v7194_v43 = vor.u32 %v7833_v32, %v7191_v35  ;;  %v7841_v25 = vld [vmem:[#allocation11 + $0x94] sm:$0xf]  ;;  %v7223_v32 = vld [vmem:[#allocation11 + $0x98] sm:$0xf0] }
 0x5c7   :  { %v4598_v39 = vadd.f32 %v4597_v57, %v4596_v61  ;;  %v4575_v46 = vadd.f32 %v4574_v63, %v4562_v41  ;;  %v7849_v61 = vld [vmem:[#allocation11 + $0xd4] sm:$0xf]  ;;  %v7181_v57 = vld [vmem:[#allocation11 + $0x40] sm:$0xf]  ;;  %4892 = vmatpush.bf16.msrb.mxu3 %v7254_v56  ;;  %v7158_v56 = vor.u32 %v7826_v11, %v7157_v12 }
 0x5c8   :  { %v7258_v18 = vor.u32 %v7849_v61, %v7255_v36  ;;  %4905 = vmatpush.bf16.msra.mxu0 %v7194_v43  ;;  %v7149_v36 = vld [vmem:[#allocation11] sm:$0xf] }
 0x5c9   :  { %v8878_v20 = vmul.f32 %v4598_v39, %v8341_v42  ;;  %v4588_v9 = vadd.f32 %v4587_v59, %v4575_v46  ;;  %v7190_v59 = vor.u32 %v7834_v62, %v7189_v45  ;;  %v7832_v39 = vld [vmem:[#allocation11 + $0x44] sm:$0xf0]  ;;  %v7245_v46 = vld [vmem:[#allocation11 + $0xc0] sm:$0xf]  ;;  %v7234_v45 = vor.u32 %v7843_v48, %v7231_v7  ;;  %v7221_v62 = vld [vmem:[#allocation11 + $0x90] sm:$0xf] }
 0x5ca   :  { %v4550_v58 = vpop.f32.mrf.mxu2  ;;  %v4563_v47 = vpop.f32.mrf.mxu3  ;;  %4918 = vmatpush.bf16.msra.mxu1 %v7258_v18  ;;  %v7222_v61 = vor.u32 %v7842_v22, %v7221_v62 }
 0x5cb   :  { %v4607_v15 = vsub.f32 %v8873_v19, %v8878_v20  ;;  %v8882_v2 = vmax.f32 %v4588_v9, 0.0  ;;  %v7848_v9 = vld [vmem:[#allocation11 + $0xc4] sm:$0xf0]  ;;  %v7831_v58 = vld [vmem:[#allocation11 + $0x44] sm:$0xf]  ;;  %4879 = vmatpush.bf16.msrb.mxu2 %v7190_v59 }
 0x5cc   :  { %v7183_v47 = vld [vmem:[#allocation11 + $0x48] sm:$0xf0]  ;;  %v7159_v59 = vld [vmem:[#allocation11 + $0x18] sm:$0xf0] }
 0x5cd   :  { %v4609_v14 = vmul.f32 %v4607_v15, %v4607_v15  ;;  %v4599_v1 = vrot.slane %v8882_v2, 4  ;;  %v7186_v38 = vor.u32 %v7831_v58, %v7183_v47  ;;  %v7151_v47 = vld [vmem:[#allocation11 + $0x8] sm:$0xf0] }
 0x5cf   :  { %v4611_v31 = vrot.slane %v4609_v14, 4  ;;  %v4600_v49 = vadd.f32 %v4599_v1, %v8882_v2  ;;  %v7847_v1 = vld [vmem:[#allocation11 + $0xc4] sm:$0xf]  ;;  %4906 = vmatpush.bf16.msra.mxu0 %v7186_v38 }
 0x5d1   :  { %v4612_v21 = vadd.f32 %v4611_v31, %v4609_v14  ;;  %v4601_v52 = vrot.slane %v4600_v49, 2  ;;  %v7182_v14 = vor.u32 %v7832_v39, %v7181_v57  ;;  %v7247_v31 = vld [vmem:[#allocation11 + $0xc8] sm:$0xf0]  ;;  %v7824_v57 = vld [vmem:[#allocation11 + $0x4] sm:$0xf0]  ;;  %v7226_v39 = vor.u32 %v7841_v25, %v7223_v32 }
 0x5d2   :  { %v7250_v24 = vor.u32 %v7847_v1, %v7247_v31  ;;  %v7150_v1 = vor.u32 %v7824_v57, %v7149_v36 }
 0x5d3   :  { %v4613_v4 = vrot.slane %v4612_v21, 2  ;;  %v4602_v37 = vadd.f32 %v4601_v52, %v4600_v49  ;;  %v7173_v52 = vld [vmem:[#allocation11 + $0x30] sm:$0xf]  ;;  %4880 = vmatpush.bf16.msrb.mxu2 %v7182_v14  ;;  %v7215_v14 = vld [vmem:[#allocation11 + $0x88] sm:$0xf0] }
 0x5d4   :  { %4919 = vmatpush.bf16.msra.mxu1 %v7250_v24 }
 0x5d5   :  { %v4614_v3 = vadd.f32 %v4613_v4, %v4612_v21  ;;  %v4603_v51 = vrot.slane %v4602_v37, 1  ;;  %v7246_v21 = vor.u32 %v7848_v9, %v7245_v46  ;;  %v7830_v4 = vld [vmem:[#allocation11 + $0x34] sm:$0xf0]  ;;  %v7840_v46 = vld [vmem:[#allocation11 + $0x84] sm:$0xf0] }
 0x5d6   :  { %v7174_v53 = vor.u32 %v7830_v4, %v7173_v52  ;;  %v7823_v9 = vld [vmem:[#allocation11 + $0x4] sm:$0xf] }
 0x5d7   :  { %v4615_v10 = vrot.slane %v4614_v3, 1  ;;  %v4604_v33 = vadd.f32 %v4603_v51, %v4602_v37  ;;  %v7829_v51 = vld [vmem:[#allocation11 + $0x34] sm:$0xf]  ;;  %4893 = vmatpush.bf16.msrb.mxu3 %v7246_v21  ;;  %v7154_v21 = vor.u32 %v7823_v9, %v7151_v47 }
 0x5d8   :  { %v7178_v60 = vor.u32 %v7829_v51, %v7175_v6  ;;  %4881 = vmatpush.bf16.msrb.mxu2 %v7174_v53  ;;  %4920 = vmatpush.bf16.msra.mxu1 %v7242_v30  ;;  %v4625_v53 = vld [vmem:[#allocation14 + $0xe] sm:$0x3] }
 0x5d9   :  { %v4616_v54 = vadd.f32 %v4615_v10, %v4614_v3  ;;  %v8887_v34 = vmul.f32 %v4604_v33, %v8341_v42  ;;  %v7846_v3 = vld [vmem:[#allocation11 + $0xb4] sm:$0xf0]  ;;  %v7828_v10 = vld [vmem:[#allocation11 + $0x24] sm:$0xf0] }
 0x5da   :  { %v7238_v29 = vor.u32 %v7846_v3, %v7237_v26  ;;  %v7166_v8 = vor.u32 %v7828_v10, %v7165_v55  ;;  %4907 = vmatpush.bf16.msra.mxu0 %v7178_v60 }
 0x5db   :  { %v4608_v63 = vsub.f32 %v8882_v2, %v8887_v34  ;;  %v4623_v40 = vmul.f32 %v4616_v54, %v8341_v42 }
 0x5dc   :  { %4894 = vmatpush.bf16.msrb.mxu3 %v7238_v29  ;;  %4882 = vmatpush.bf16.msrb.mxu2 %v7166_v8 }
 0x5dd   :  { %v4610_v41 = vmul.f32 %v4608_v63, %v4608_v63  ;;  %v8892_v49 = vadd.f32 1e-05, %v4623_v40  ;;  %v7825_v63 = vld [vmem:[#allocation11 + $0x14] sm:$0xf]  ;;  %4921 = vmatpush.bf16.msra.mxu1 %v7234_v45 }
 0x5de   :  { %4908 = vmatpush.bf16.msra.mxu0 %v7170_v13  ;;  %v7162_v18 = vor.u32 %v7825_v63, %v7159_v59 }
 0x5df   :  { %v4617_v15 = vrot.slane %v4610_v41, 4  ;;  %7928 = vrsqrt.f32 %v8892_v49  ;;  %vm4634_vm15 = vweird.f32 %v8892_v49 }
 0x5e0   :  { %4895 = vmatpush.bf16.msrb.mxu3 %v7230_v0  ;;  %4883 = vmatpush.bf16.msrb.mxu2 %v7158_v56 }
 0x5e1   :  { %v4618_v37 = vadd.f32 %v4617_v15, %v4610_v41  ;;  %v7213_v41 = vld [vmem:[#allocation11 + $0x80] sm:$0xf]  ;;  %v7839_v15 = vld [vmem:[#allocation11 + $0x84] sm:$0xf]  ;;  %4922 = vmatpush.bf16.msra.mxu1 %v7226_v39 }
 0x5e2   :  { %v7214_v31 = vor.u32 %v7840_v46, %v7213_v41  ;;  %4909 = vmatpush.bf16.msra.mxu0 %v7162_v18  ;;  %v7218_v52 = vor.u32 %v7839_v15, %v7215_v14 }
 0x5e3   :  { %v4619_v16 = vrot.slane %v4618_v37, 2 }
 0x5e4   :  { %4896 = vmatpush.bf16.msrb.mxu3 %v7222_v61  ;;  %4884 = vmatpush.bf16.msrb.mxu2 %v7150_v1  ;;  %v7862_v1 = vld [vmem:[#allocation13 + $0x38] sm:$0xff] }
 0x5e5   :  { %v4620_v33 = vadd.f32 %v4619_v16, %v4618_v37  ;;  %v7929_v35 = vpop.eup %7928  ;;  %4923 = vmatpush.bf16.msra.mxu1 %v7218_v52 }
 0x5e6   :  { %v4629_v58 = vmul.f32 %v7929_v35, %v8892_v49  ;;  %4910 = vmatpush.bf16.msra.mxu0 %v7154_v21  ;;  %vm4635_vm8 = vweird.f32 %v7929_v35 }
 0x5e7   :  { %v4621_v54 = vrot.slane %v4620_v33, 1  ;;  %vm4636_vm0 = vmor %vm4634_vm15, %vm4635_vm8 }
 0x5e8   :  { %v4630_v4 = vmul.f32 %v7929_v35, %v4629_v58  ;;  %4897 = vmatpush.bf16.msrb.mxu3 %v7214_v31  ;;  %v7870_v31 = vld [vmem:[#allocation13 + $0x78] sm:$0xff]  ;;  %5149 = vmatpush.bf16.msra.mxu2 %v7862_v1  ;;  %v4992_v1 = vld [vmem:[#allocation16 + $0x10] sm:$0x3] }
 0x5e9   :  { %v4622_v44 = vadd.f32 %v4621_v54, %v4620_v33 }
 0x5ea   :  { %v4631_v24 = vmul.f32 0.5, %v4630_v4 }
 0x5eb   :  { %v4624_v40 = vmul.f32 %v4622_v44, %v8341_v42 }
 0x5ec   :  { %v4632_v3 = vsub.f32 1.5, %v4631_v24  ;;  %5162 = vmatpush.bf16.msra.mxu3 %v7870_v31  ;;  %v7869_v24 = vld [vmem:[#allocation13 + $0x70] sm:$0xff] }
 0x5ed   :  { %v4627_v43 = vadd.f32 1e-05, %v4624_v40 }
 0x5ee   :  { %v4633_v17 = vmul.f32 %v7929_v35, %v4632_v3 }
 0x5ef   :  { %7930 = vrsqrt.f32 %v4627_v43  ;;  %vm4644_vm13 = vweird.f32 %v4627_v43 }
 0x5f0   :  { %v4637_v55 = vsel %vm4636_vm0, %v7929_v35, %v4633_v17  ;;  %5163 = vmatpush.bf16.msra.mxu3 %v7869_v24  ;;  %v7860_v17 = vld [vmem:[#allocation13 + $0x28] sm:$0xff] }
 0x5f5   :  { %v7931_v37 = vpop.eup %7930 }
 0x5f6   :  { %v4639_v38 = vmul.f32 %v7931_v37, %v4627_v43  ;;  %vm4645_vm4 = vweird.f32 %v7931_v37 }
 0x5f7   :  { %vm4646_vm14 = vmor %vm4644_vm13, %vm4645_vm4 }
 0x5f8   :  { %v4640_v26 = vmul.f32 %v7931_v37, %v4639_v38  ;;  %v7861_v38 = vld [vmem:[#allocation13 + $0x30] sm:$0xff] }
 0x5f9   :  { %5150 = vmatpush.bf16.msra.mxu2 %v7861_v38 }
 0x5fa   :  { %v4641_v51 = vmul.f32 0.5, %v4640_v26 }
 0x5fc   :  { %v4642_v6 = vsub.f32 1.5, %v4641_v51 }
 0x5fd   :  { %5151 = vmatpush.bf16.msra.mxu2 %v7860_v17 }
 0x5fe   :  { %v4643_v28 = vmul.f32 %v7931_v37, %v4642_v6 }
 0x600   :  { %v4647_v16 = vsel %vm4646_vm14, %v7931_v37, %v4643_v28  ;;  %v7868_v28 = vld [vmem:[#allocation13 + $0x68] sm:$0xff] }
 0x601   :  { %v4650_v29 = vrot.slane %v4647_v16, 7  ;;  %5164 = vmatpush.bf16.msra.mxu3 %v7868_v28 }
 0x603   :  { %v4651_v10 = vsel %vm584_vm12, %v4637_v55, %v4650_v29 }
 0x604   :  { %v4653_v33 = vmul.f32 %v4651_v10, %v4625_v53  ;;  %v7859_v10 = vld [vmem:[#allocation13 + $0x20] sm:$0xff] }
 0x605   :  { %5152 = vmatpush.bf16.msra.mxu2 %v7859_v10 }
 0x606   :  { %v4656_v60 = vperm.slane %v4653_v33, 0  ;;  %v4657_v30 = vperm.slane %v4653_v33, 1  ;;  %v7867_v33 = vld [vmem:[#allocation13 + $0x60] sm:$0xff] }
 0x607   :  { %5165 = vmatpush.bf16.msra.mxu3 %v7867_v33 }
 0x608   :  { %v4661_v50 = vmul.f32 %v4657_v30, %v8887_v34  ;;  %v4660_v27 = vmul.f32 %v4656_v60, %v8878_v20  ;;  %v4668_v49 = vmul.f32 %v4656_v60, %v8873_v19  ;;  %v4669_v8 = vmul.f32 %v4657_v30, %v8882_v2  ;;  %v4711_v20 = vld [vmem:[%s8951_s9 + $0x12] sm:$0x3] }
 0x609   :  { %v4714_v34 = vperm.slane %v4711_v20, 1  ;;  %v4713_v22 = vperm.slane %v4711_v20, 0 }
 0x60a   :  { %v4664_v23 = vrot.slane %v4661_v50, 7 }
 0x60c   :  { %v4665_v48 = vsel %vm584_vm12, %v4660_v27, %v4664_v23  ;;  %v7858_v27 = vld [vmem:[#allocation13 + $0x18] sm:$0xff] }
 0x60d   :  { %v4667_v7 = vsub.f32 %v4654_v5, %v4665_v48  ;;  %v7866_v23 = vld [vmem:[#allocation13 + $0x58] sm:$0xff]  ;;  %5153 = vmatpush.bf16.msra.mxu2 %v7858_v27 }
 0x60e   :  { %5166 = vmatpush.bf16.msra.mxu3 %v7866_v23 }
 0x60f   :  { %v4671_v54 = vperm.slane %v4667_v7, 0  ;;  %v4672_v0 = vperm.slane %v4667_v7, 1 }
 0x611   :  { %v4675_v12 = vadd.f32 %v4671_v54, %v4668_v49  ;;  %v4676_v11 = vadd.f32 %v4672_v0, %v4669_v8  ;;  %v7857_v54 = vld [vmem:[#allocation13 + $0x10] sm:$0xff] }
 0x612   :  { %v7865_v8 = vld [vmem:[#allocation13 + $0x50] sm:$0xff]  ;;  %5154 = vmatpush.bf16.msra.mxu2 %v7857_v54 }
 0x613   :  { %v4709_v44 = vpack.c.bf16 %v4675_v12, %v4675_v12  ;;  %v4710_v13 = vpack.c.bf16 %v4676_v11, %v4676_v11  ;;  %5167 = vmatpush.bf16.msra.mxu3 %v7865_v8 }
 0x615   :  { %4885 = vmatmul.bf16.vlgmr.msrb.gmra.mxu2 %v4709_v44  ;;  %4898 = vmatmul.bf16.vlgmr.msrb.gmra.mxu3 %v4710_v13 }
 0x616   :  { %4911 = vmatmul.bf16.vlgmr.msra.gmra.mxu0 %v4709_v44  ;;  %4924 = vmatmul.bf16.vlgmr.msra.gmra.mxu1 %v4710_v13  ;;  %v7856_v44 = vld [vmem:[#allocation13 + $0x8] sm:$0xff] }
 0x617   :  { %v7864_v13 = vld [vmem:[#allocation13 + $0x48] sm:$0xff]  ;;  %5155 = vmatpush.bf16.msra.mxu2 %v7856_v44 }
 0x618   :  { %5168 = vmatpush.bf16.msra.mxu3 %v7864_v13 }
 0x693   :  { %v4912_v45 = vpop.f32.mrf.mxu0  ;;  %v4925_v62 = vpop.f32.mrf.mxu1 }
 0x694   :  { %v4913_v19 = vadd.f32 %v4912_v45, %v4714_v34  ;;  %v7855_v45 = vld [vmem:[#allocation13] sm:$0xff] }
 0x695   :  { %5156 = vmatpush.bf16.msra.mxu2 %v7855_v45 }
 0x696   :  { %v4926_v63 = vadd.f32 %v4925_v62, %v4913_v19  ;;  %v7863_v62 = vld [vmem:[#allocation13 + $0x40] sm:$0xff] }
 0x697   :  { %5169 = vmatpush.bf16.msra.mxu3 %v7863_v62 }
 0x698   :  { %v8907_v2 = vmax.f32 %v4926_v63, 0.0  ;;  %v4886_v59 = vpop.f32.mrf.mxu2  ;;  %v4899_v25 = vpop.f32.mrf.mxu3 }
 0x699   :  { %v4887_v32 = vadd.f32 %v4886_v59, %v4713_v22 }
 0x69a   :  { %v4937_v35 = vrot.slane %v8907_v2, 4 }
 0x69b   :  { %v4900_v40 = vadd.f32 %v4899_v25, %v4887_v32  ;;  %v4914_v56 = vpop.f32.mrf.mxu0  ;;  %v4927_v61 = vpop.f32.mrf.mxu1 }
 0x69c   :  { %v4938_v36 = vadd.f32 %v4937_v35, %v8907_v2 }
 0x69d   :  { %v8911_v57 = vmax.f32 %v4900_v40, 0.0 }
 0x69e   :  { %v4939_v41 = vrot.slane %v4938_v36, 2 }
 0x69f   :  { %v4931_v43 = vrot.slane %v8911_v57, 4 }
 0x6a0   :  { %v4940_v18 = vadd.f32 %v4939_v41, %v4938_v36  ;;  %v4888_v39 = vpop.f32.mrf.mxu2  ;;  %v4901_v46 = vpop.f32.mrf.mxu3 }
 0x6a1   :  { %v4932_v9 = vadd.f32 %v4931_v43, %v8911_v57  ;;  %v4963_v43 = vld [vmem:[#allocation14 + $0x10] sm:$0x3] }
 0x6a2   :  { %v4941_v58 = vrot.slane %v4940_v18, 1 }
 0x6a3   :  { %v4933_v47 = vrot.slane %v4932_v9, 2 }
 0x6a4   :  { %v4942_v15 = vadd.f32 %v4941_v58, %v4940_v18 }
 0x6a5   :  { %v4934_v14 = vadd.f32 %v4933_v47, %v4932_v9 }
 0x6a6   :  { %v8916_v21 = vmul.f32 %v4942_v15, %v8341_v42 }
 0x6a7   :  { %v4935_v52 = vrot.slane %v4934_v14, 1 }
 0x6a8   :  { %v4946_v4 = vsub.f32 %v8907_v2, %v8916_v21 }
 0x6a9   :  { %v4936_v37 = vadd.f32 %v4935_v52, %v4934_v14 }
 0x6aa   :  { %v4948_v26 = vmul.f32 %v4946_v4, %v4946_v4 }
 0x6ab   :  { %v8921_v3 = vmul.f32 %v4936_v37, %v8341_v42 }
 0x6ac   :  { %v4955_v51 = vrot.slane %v4948_v26, 4 }
 0x6ad   :  { %v4945_v6 = vsub.f32 %v8911_v57, %v8921_v3 }
 0x6ae   :  { %v4956_v16 = vadd.f32 %v4955_v51, %v4948_v26 }
 0x6af   :  { %v4947_v53 = vmul.f32 %v4945_v6, %v4945_v6 }
 0x6b0   :  { %v4957_v29 = vrot.slane %v4956_v16, 2 }
 0x6b1   :  { %v4949_v55 = vrot.slane %v4947_v53, 4 }
 0x6b2   :  { %v4958_v60 = vadd.f32 %v4957_v29, %v4956_v16 }
 0x6b3   :  { %v4950_v30 = vadd.f32 %v4949_v55, %v4947_v53 }
 0x6b4   :  { %v4959_v50 = vrot.slane %v4958_v60, 1 }
 0x6b5   :  { %v4951_v5 = vrot.slane %v4950_v30, 2 }
 0x6b6   :  { %v4960_v48 = vadd.f32 %v4959_v50, %v4958_v60 }
 0x6b7   :  { %v4952_v7 = vadd.f32 %v4951_v5, %v4950_v30 }
 0x6b8   :  { %v4962_v49 = vmul.f32 %v4960_v48, %v8341_v42 }
 0x6b9   :  { %v4953_v0 = vrot.slane %v4952_v7, 1 }
 0x6ba   :  { %v4965_v12 = vadd.f32 1e-05, %v4962_v49 }
 0x6bb   :  { %v4954_v11 = vadd.f32 %v4953_v0, %v4952_v7 }
 0x6bc   :  { %7932 = vrsqrt.f32 %v4965_v12  ;;  %vm4982_vm2 = vweird.f32 %v4965_v12 }
 0x6bd   :  { %v4961_v20 = vmul.f32 %v4954_v11, %v8341_v42 }
 0x6bf   :  { %v4964_v34 = vadd.f32 1e-05, %v4961_v20 }
 0x6c1   :  { %7934 = vrsqrt.f32 %v4964_v34  ;;  %vm4972_vm7 = vweird.f32 %v4964_v34 }
 0x6c2   :  { %v7933_v19 = vpop.eup %7932 }
 0x6c3   :  { %v4977_v22 = vmul.f32 %v7933_v19, %v4965_v12  ;;  %vm4983_vm1 = vweird.f32 %v7933_v19 }
 0x6c4   :  { %vm4984_vm5 = vmor %vm4982_vm2, %vm4983_vm1 }
 0x6c5   :  { %v4978_v63 = vmul.f32 %v7933_v19, %v4977_v22 }
 0x6c7   :  { %v7935_v59 = vpop.eup %7934  ;;  %v4979_v25 = vmul.f32 0.5, %v4978_v63 }
 0x6c8   :  { %v4967_v32 = vmul.f32 %v7935_v59, %v4964_v34  ;;  %vm4973_vm6 = vweird.f32 %v7935_v59 }
 0x6c9   :  { %v4980_v35 = vsub.f32 1.5, %v4979_v25  ;;  %vm4974_vm3 = vmor %vm4972_vm7, %vm4973_vm6 }
 0x6ca   :  { %v4968_v40 = vmul.f32 %v7935_v59, %v4967_v32 }
 0x6cb   :  { %v4981_v56 = vmul.f32 %v7933_v19, %v4980_v35 }
 0x6cc   :  { %v4969_v61 = vmul.f32 0.5, %v4968_v40 }
 0x6cd   :  { %v4985_v36 = vsel %vm4984_vm5, %v7933_v19, %v4981_v56 }
 0x6ce   :  { %v4970_v42 = vsub.f32 1.5, %v4969_v61  ;;  %v4988_v18 = vrot.slane %v4985_v36, 7 }
 0x6d0   :  { %v4971_v41 = vmul.f32 %v7935_v59, %v4970_v42 }
 0x6d2   :  { %v4975_v39 = vsel %vm4974_vm3, %v7935_v59, %v4971_v41 }
 0x6d3   :  { %v4989_v46 = vsel %vm584_vm12, %v4975_v39, %v4988_v18 }
 0x6d4   :  { %v4991_v9 = vmul.f32 %v4989_v46, %v4963_v43 }
 0x6d6   :  { %v4994_v58 = vperm.slane %v4991_v9, 0  ;;  %v4995_v47 = vperm.slane %v4991_v9, 1 }
 0x6d8   :  { %v4999_v15 = vmul.f32 %v4995_v47, %v8916_v21  ;;  %v4998_v14 = vmul.f32 %v4994_v58, %v8921_v3  ;;  %v5006_v37 = vmul.f32 %v4994_v58, %v8911_v57  ;;  %v5007_v24 = vmul.f32 %v4995_v47, %v8907_v2  ;;  %v7919_v2 = vld [vmem:[%s8951_s9 + $0x14] ss:$0 sm:$0xff] }
 0x6da   :  { %v5002_v31 = vrot.slane %v4999_v15, 7 }
 0x6dc   :  { %v5003_v52 = vsel %vm584_vm12, %v4998_v14, %v5002_v31 }
 0x6dd   :  { %v5005_v4 = vsub.f32 %v4992_v1, %v5003_v52 }
 0x6df   :  { %v5009_v38 = vperm.slane %v5005_v4, 0  ;;  %v5010_v26 = vperm.slane %v5005_v4, 1 }
 0x6e1   :  { %v5013_v51 = vadd.f32 %v5009_v38, %v5006_v37  ;;  %v5014_v6 = vadd.f32 %v5010_v26, %v5007_v24 }
 0x6e3   :  { %v5047_v17 = vpack.c.bf16 %v5013_v51, %v5013_v51  ;;  %v5048_v28 = vpack.c.bf16 %v5014_v6, %v5014_v6 }
 0x6e5   :  { %5157 = vmatmul.bf16.vlgmr.msra.gmra.mxu2 %v5047_v17  ;;  %5170 = vmatmul.bf16.vlgmr.msra.gmra.mxu3 %v5048_v28 }
 0x768   :  { %v5158_v57 = vpop.f32.mrf.mxu2  ;;  %v5171_v21 = vpop.f32.mrf.mxu3 }
 0x769   :  { %v5159_v3 = vadd.f32 %v7919_v2, %v5158_v57 }
 0x76b   :  { %v5172_v16 = vadd.f32 %v5171_v21, %v5159_v3 }
 0x76d   :  { %5175 = vst [vmem:[%s8954_s12] sm:$0xff] %v5172_v16 }
 0x770   :  { %v5160_v53 = vpop.f32.mrf.mxu2  ;;  %v5173_v29 = vpop.f32.mrf.mxu3 }
 0x771   :  { %8188 = dma.done.wait [#allocation7], 256  }
 0x772   :  { %8189 = vsyncadd [#allocation7], 4294967040 }
 0x773   :  { %5195 = vsyncpa [#allocation6], 1 }
 0x774   :  { %5196 = vsyncpa [#allocation9], 1 }
 0x775   :  { %5197 = vsyncpa [#allocation12], 1 }
 0x776   :  { %5198 = vsyncpa [#allocation15], 1 }
 0x777   :  { %5199 = vsyncpa [#allocation7], 1 }
 0x778   :  { %5200 = vsyncmov [#allocation4] }
 0x77b   :  { %s5201_s13 = vpop.sfrf %5200 }
 0x77c   :  { %p7339_p0 = scmp.ne.s32.totalorder %s5201_s13, 0 }
 0x77e   :  { %5205 = shalt.err (%p7339_p0)  }
 0x77f   :  { %5207 = vsyncmov [#allocation4 + $0x1] }
 0x782   :  { %s5208_s9 = vpop.sfrf %5207 }
 0x783   :  { %p7340_p1 = scmp.ne.s32.totalorder %s5208_s9, 0 }
 0x785   :  { %5212 = shalt.err (%p7340_p1)  }

</bundles_post_ra>
